<compile_context>
chip_gen: v7x
topology: tpu7x:2x2x1
jax: 0.10.0
libtpu: 0.0.40
codegen_flags: <defaults>
</compile_context>

<pallas_src>
import functools

import jax
import jax.numpy as jnp
from jax import lax
from jax.experimental import pallas as pl
from jax.experimental.pallas import tpu as pltpu

block_size = 256
n_embd = 384
dropout = 0.2  # identity in eval mode

_HP = 128  # each head block padded to a full 128-lane tile
_TR = 128  # score row/column tile size


def _head_kernel(x_ref, w_ref, o_ref, kv_ref, qt_ref):
    # x_ref:  (1, T, C)         bf16 input rows for this batch element
    # w_ref:  (C, 3*_HP)        bf16 fused weight [Wk*scale | Wv | Wq] (zero-padded lanes)
    # o_ref:  (1, TR, H)        f32 output rows for this row tile
    # kv_ref: (T, 2*_HP)        bf16 scratch [k*scale | v], persists across row tiles
    # qt_ref: (T//TR, _HP, TR)  bf16 scratch, q^T split into column tiles
    r = pl.program_id(1)
    TR = o_ref.shape[1]
    H = o_ref.shape[2]
    T = kv_ref.shape[0]
    n_col = T // TR

    # ---- fused Q/K/V projection: once per batch element, resident in VMEM ----
    @pl.when(r == 0)
    def _():
        for t in range(n_col):  # static: n_col chunks of TR rows
            sl = slice(t * TR, (t + 1) * TR)
            kqv = jnp.dot(x_ref[0, sl, :], w_ref[...],
                          preferred_element_type=jnp.float32)      # (TR, 3*_HP) f32
            kv_ref[sl, :] = kqv[:, :2 * _HP].astype(kv_ref.dtype)   # k*scale | v
            # One (TR,128) transpose per column tile, amortized over all row tiles.
            qt_ref[t] = kqv[:, 2 * _HP:].T.astype(qt_ref.dtype)

    row0 = pl.multiple_of(r * TR, TR)
    k_rows = kv_ref[pl.ds(row0, TR), :_HP]  # (TR, 128) bf16, scale already folded in

    m0 = jnp.full((TR, 1), -jnp.inf, jnp.float32)
    l0 = jnp.zeros((TR, 1), jnp.float32)
    acc0 = jnp.zeros((TR, _HP), jnp.float32)

    def col_tile(c, carry, *, masked):
        m, l, acc = carry
        col0 = pl.multiple_of(c * TR, TR)
        # Scores for this 128x128 block: plain MXU matmul, no transpose here.
        s = jnp.dot(k_rows, qt_ref[c], preferred_element_type=jnp.float32)  # (TR, TR) f32
        if masked:
            # Diagonal block: local col j <= local row i (global offsets cancel).
            tri = (lax.broadcasted_iota(jnp.int32, (TR, TR), 1)
                   <= lax.broadcasted_iota(jnp.int32, (TR, TR), 0))
            s = jnp.where(tri, s, -jnp.inf)
        m_new = jnp.maximum(m, jnp.max(s, axis=-1, keepdims=True))
        alpha = jnp.exp(m - m_new)
        p = jnp.exp(s - m_new)
        l_new = alpha * l + jnp.sum(p, axis=-1, keepdims=True)
        v_tile = kv_ref[pl.ds(col0, TR), _HP:2 * _HP]               # (TR, 128) bf16
        acc_new = alpha * acc + jnp.dot(p.astype(v_tile.dtype), v_tile,
                                        preferred_element_type=jnp.float32)
        return m_new, l_new, acc_new

    # Fully-unmasked column tiles (c < r): no mask build, no select.
    m, l, acc = lax.fori_loop(0, r, functools.partial(col_tile, masked=False),
                              (m0, l0, acc0))
    # Diagonal tile (c == r): the only block that needs the causal mask.
    m, l, acc = col_tile(r, (m, l, acc), masked=True)
    # Fully-masked tiles (c > r): never touched (no matmul / exp / select).

    # Column 0 of the diagonal block is always unmasked -> l >= 1, recip is safe.
    inv = pl.reciprocal(l, approx=True)   # EUP vrcp (otherwise-idle slot)
    inv = inv * (2.0 - l * inv)           # one Newton step -> ~f32 accuracy
    o_ref[0] = (acc[:, :H] * inv).astype(o_ref.dtype)


def prepare_head_weights(wk_t, wq_t, wv_t):
    """One-time weight prep (cache with the params, not per forward call).

    w*_t: (C, H), transposed from nn.Linear's (H, C) weight.
    Returns fused bf16 (C, 3*128) weight, layout [Wk*C**-0.5 | Wv | Wq],
    each head block zero-padded from H to 128 lanes.
    """
    C, H = wk_t.shape
    assert H <= _HP, "head_size must fit in one 128-lane tile"
    scale = float(C) ** -0.5  # module scales by C (=n_embd) ** -0.5, reproduced faithfully
    w = jnp.zeros((C, 3 * _HP), jnp.float32)
    w = w.at[:, 0:H].set(wk_t.astype(jnp.float32) * scale)
    w = w.at[:, _HP:_HP + H].set(wv_t.astype(jnp.float32))
    w = w.at[:, 2 * _HP:2 * _HP + H].set(wq_t.astype(jnp.float32))
    return w.astype(jnp.bfloat16)


@functools.partial(jax.jit, static_argnames=("head_size",))
def head_forward(x, w_fused, head_size):
    """x: (B, T, C) f32; w_fused: prepare_head_weights(...) output; returns (B, T, H) f32."""
    B, T, C = x.shape
    H = head_size
    TR = _TR if T >= _TR else T
    assert T % TR == 0 and TR % 8 == 0, "T must be a multiple of 8 (and 128 if > 128)"

    x_bf = x.astype(jnp.bfloat16)  # bf16 MXU operands, half the input DMA bytes

    return pl.pallas_call(
        _head_kernel,
        out_shape=jax.ShapeDtypeStruct((B, T, H), jnp.float32),
        grid_spec=pltpu.PrefetchScalarGridSpec(
            num_scalar_prefetch=0,
            grid=(B, T // TR),
            in_specs=[
                # x block index only changes with b -> DMA'd once per batch element.
                pl.BlockSpec((1, T, C), lambda b, r: (b, 0, 0)),
                pl.BlockSpec((C, 3 * _HP), lambda b, r: (0, 0)),
            ],
            out_specs=pl.BlockSpec((1, TR, H), lambda b, r: (b, r, 0)),
            scratch_shapes=[
                pltpu.VMEM((T, 2 * _HP), jnp.bfloat16),          # k*scale | v
                pltpu.VMEM((T // TR, _HP, TR), jnp.bfloat16),    # q^T, per column tile
            ],
        ),
        compiler_params=pltpu.CompilerParams(
            dimension_semantics=("parallel", "arbitrary")),
    )(x_bf, w_fused)


def head_reference(x, wk_t, wq_t, wv_t):
    """Pure-JAX f32 reference matching the PyTorch forward (eval mode)."""
    B, T, C = x.shape
    k = x @ wk_t
    q = x @ wq_t
    v = x @ wv_t
    wei = jnp.einsum("bth,bsh->bts", k, q) * (C ** -0.5)
    mask = jnp.tril(jnp.ones((T, T), dtype=bool))
    wei = jnp.where(mask[None], wei, -jnp.inf)
    wei = jax.nn.softmax(wei, axis=-1)
    return wei @ v


if __name__ == "__main__":
    B, T, H = 2, block_size, 64  # T = block_size = 256 exercises the causal tiling
    C = n_embd

    key = jax.random.PRNGKey(0)
    kx, kk, kq, kv = jax.random.split(key, 4)

    x = jax.random.normal(kx, (B, T, C), dtype=jnp.float32)
    # nn.Linear(n_embd, head_size) weight is (H, C); store transposed (C, H).
    bound = (1.0 / C) ** 0.5
    wk_t = jax.random.uniform(kk, (C, H), jnp.float32, -bound, bound)
    wq_t = jax.random.uniform(kq, (C, H), jnp.float32, -bound, bound)
    wv_t = jax.random.uniform(kv, (C, H), jnp.float32, -bound, bound)

    w_fused = prepare_head_weights(wk_t, wq_t, wv_t)  # one-time, cached with params

    out = head_forward(x, w_fused, H)
    jax.block_until_ready(out)

    ref = head_reference(x, wk_t, wq_t, wv_t)
    assert out.shape == (B, T, H)
    max_err = float(jnp.max(jnp.abs(out - ref)))
    # bf16 matmul operands (f32 accumulate) -> tolerance relaxed vs pure-f32.
    assert jnp.allclose(out, ref, atol=2e-2, rtol=2e-2), (
        f"mismatch vs reference (max abs err {max_err})")

    print("KERNEL_OK")
</pallas_src>

<mosaic_0001>
module attributes {stable_mosaic.version = 11 : i64} {
  func.func @_head_kernel(%arg0: i32, %arg1: i32, %arg2: memref<1x256x384xbf16, #tpu.memory_space<vmem>>, %arg3: memref<384x384xbf16, #tpu.memory_space<vmem>>, %arg4: memref<1x128x64xf32, #tpu.memory_space<vmem>>, %arg5: memref<256x256xbf16, #tpu.memory_space<vmem>>, %arg6: memref<2x128x128xbf16, #tpu.memory_space<vmem>>) attributes {dimension_semantics = [#tpu.dimension_semantics<parallel>, #tpu.dimension_semantics<arbitrary>], iteration_bounds = array<i64: 2, 2>, scalar_prefetch = 0 : i64, scratch_operands = 2 : i64, tpu.core_type = #tpu.core_type<tc>, window_params = [{transform_indices = @transform_0, window_bounds = array<i64: 1, 256, 384>}, {pipeline_mode = #tpu.pipeline_mode<synchronous>, transform_indices = @transform_1, window_bounds = array<i64: 384, 384>}, {transform_indices = @transform_2, window_bounds = array<i64: 1, 128, 64>}]} {
    %c0_i32 = arith.constant 0 : i32
    %0 = arith.cmpi eq, %arg1, %c0_i32 : i32
    %1 = arith.extui %0 : i1 to i32
    %c0_i32_0 = arith.constant 0 : i32
    %2 = arith.cmpi ne, %1, %c0_i32_0 : i32
    scf.if %2 {
      %c0_16 = arith.constant 0 : index
      %c0_17 = arith.constant 0 : index
      %c0_18 = arith.constant 0 : index
      %54 = vector.load %arg2[%c0_16, %c0_17, %c0_18] : memref<1x256x384xbf16, #tpu.memory_space<vmem>>, vector<1x128x384xbf16>
      %55 = vector.shape_cast %54 : vector<1x128x384xbf16> to vector<128x384xbf16>
      %c0_19 = arith.constant 0 : index
      %c0_20 = arith.constant 0 : index
      %56 = vector.load %arg3[%c0_19, %c0_20] : memref<384x384xbf16, #tpu.memory_space<vmem>>, vector<384x384xbf16>
      %cst_21 = arith.constant dense<0.000000e+00> : vector<128x384xf32>
      %57 = tpu.matmul %55, %56, %cst_21 {dimension_numbers = #tpu.dot_dimension_numbers<[1], [0], [0], [1], [0, 0, 1, 1], [], []>} : vector<128x384xbf16>, vector<384x384xbf16>, vector<128x384xf32> -> vector<128x384xf32>
      %58 = vector.extract_strided_slice %57 {offsets = [0, 0], sizes = [128, 256], strides = [1, 1]} : vector<128x384xf32> to vector<128x256xf32>
      %59 = arith.truncf %58 : vector<128x256xf32> to vector<128x256xbf16>
      %c0_22 = arith.constant 0 : index
      %c0_23 = arith.constant 0 : index
      %60 = vector.load %arg5[%c0_22, %c0_23] : memref<256x256xbf16, #tpu.memory_space<vmem>>, vector<128x256xbf16>
      tpu.vector_store %arg5[%c0_22, %c0_23], %59 {strides = array<i32>} : memref<256x256xbf16, #tpu.memory_space<vmem>>, vector<128x256xbf16>,
      %61 = vector.extract_strided_slice %57 {offsets = [0, 256], sizes = [128, 128], strides = [1, 1]} : vector<128x384xf32> to vector<128x128xf32>
      %62 = tpu.transpose %61, [1, 0] : vector<128x128xf32> -> vector<128x128xf32>
      %63 = arith.truncf %62 : vector<128x128xf32> to vector<128x128xbf16>
      %c0_24 = arith.constant 0 : index
      %c0_25 = arith.constant 0 : index
      %c0_26 = arith.constant 0 : index
      %64 = vector.load %arg6[%c0_24, %c0_25, %c0_26] : memref<2x128x128xbf16, #tpu.memory_space<vmem>>, vector<1x128x128xbf16>
      %65 = vector.shape_cast %64 : vector<1x128x128xbf16> to vector<128x128xbf16>
      %66 = vector.shape_cast %63 : vector<128x128xbf16> to vector<1x128x128xbf16>
      tpu.vector_store %arg6[%c0_24, %c0_25, %c0_26], %66 {strides = array<i32>} : memref<2x128x128xbf16, #tpu.memory_space<vmem>>, vector<1x128x128xbf16>,
      %c0_27 = arith.constant 0 : index
      %c128_28 = arith.constant 128 : index
      %c0_29 = arith.constant 0 : index
      %67 = vector.load %arg2[%c0_27, %c128_28, %c0_29] : memref<1x256x384xbf16, #tpu.memory_space<vmem>>, vector<1x128x384xbf16>
      %68 = vector.shape_cast %67 : vector<1x128x384xbf16> to vector<128x384xbf16>
      %c0_30 = arith.constant 0 : index
      %c0_31 = arith.constant 0 : index
      %69 = vector.load %arg3[%c0_30, %c0_31] : memref<384x384xbf16, #tpu.memory_space<vmem>>, vector<384x384xbf16>
      %cst_32 = arith.constant dense<0.000000e+00> : vector<128x384xf32>
      %70 = tpu.matmul %68, %69, %cst_32 {dimension_numbers = #tpu.dot_dimension_numbers<[1], [0], [0], [1], [0, 0, 1, 1], [], []>} : vector<128x384xbf16>, vector<384x384xbf16>, vector<128x384xf32> -> vector<128x384xf32>
      %71 = vector.extract_strided_slice %70 {offsets = [0, 0], sizes = [128, 256], strides = [1, 1]} : vector<128x384xf32> to vector<128x256xf32>
      %72 = arith.truncf %71 : vector<128x256xf32> to vector<128x256xbf16>
      %c128_33 = arith.constant 128 : index
      %c0_34 = arith.constant 0 : index
      %73 = vector.load %arg5[%c128_33, %c0_34] : memref<256x256xbf16, #tpu.memory_space<vmem>>, vector<128x256xbf16>
      tpu.vector_store %arg5[%c128_33, %c0_34], %72 {strides = array<i32>} : memref<256x256xbf16, #tpu.memory_space<vmem>>, vector<128x256xbf16>,
      %74 = vector.extract_strided_slice %70 {offsets = [0, 256], sizes = [128, 128], strides = [1, 1]} : vector<128x384xf32> to vector<128x128xf32>
      %75 = tpu.transpose %74, [1, 0] : vector<128x128xf32> -> vector<128x128xf32>
      %76 = arith.truncf %75 : vector<128x128xf32> to vector<128x128xbf16>
      %c1 = arith.constant 1 : index
      %c0_35 = arith.constant 0 : index
      %c0_36 = arith.constant 0 : index
      %77 = vector.load %arg6[%c1, %c0_35, %c0_36] : memref<2x128x128xbf16, #tpu.memory_space<vmem>>, vector<1x128x128xbf16>
      %78 = vector.shape_cast %77 : vector<1x128x128xbf16> to vector<128x128xbf16>
      %79 = vector.shape_cast %76 : vector<128x128xbf16> to vector<1x128x128xbf16>
      tpu.vector_store %arg6[%c1, %c0_35, %c0_36], %79 {strides = array<i32>} : memref<2x128x128xbf16, #tpu.memory_space<vmem>>, vector<1x128x128xbf16>,
    } else {
    }
    %c128_i32 = arith.constant 128 : i32
    %3 = arith.muli %arg1, %c128_i32 : i32
    %4 = tpu.assume_multiple %3, 128 : i32
    %5 = arith.index_cast %4 : i32 to index
    %c0 = arith.constant 0 : index
    %6 = vector.load %arg5[%5, %c0] : memref<256x256xbf16, #tpu.memory_space<vmem>>, vector<128x128xbf16>
    %cst = arith.constant 0xFF800000 : f32
    %7 = vector.broadcast %cst : f32 to vector<128x1xf32>
    %cst_1 = arith.constant 0.000000e+00 : f32
    %8 = vector.broadcast %cst_1 : f32 to vector<128x1xf32>
    %cst_2 = arith.constant 0.000000e+00 : f32
    %9 = vector.broadcast %cst_2 : f32 to vector<128x128xf32>
    %c0_i32_3 = arith.constant 0 : i32
    %10 = arith.subi %arg1, %c0_i32_3 : i32
    %11 = arith.addi %c0_i32_3, %10 : i32
    %c1_i32 = arith.constant 1 : i32
    %12:3 = scf.for %arg7 = %c0_i32_3 to %11 step %c1_i32 iter_args(%arg8 = %7, %arg9 = %8, %arg10 = %9) -> (vector<128x1xf32>, vector<128x1xf32>, vector<128x128xf32>)  : i32 {
      %c128_i32_16 = arith.constant 128 : i32
      %54 = arith.muli %arg7, %c128_i32_16 : i32
      %55 = tpu.assume_multiple %54, 128 : i32
      %56 = arith.index_cast %arg7 : i32 to index
      %c0_17 = arith.constant 0 : index
      %c0_18 = arith.constant 0 : index
      %57 = vector.load %arg6[%56, %c0_17, %c0_18] : memref<2x128x128xbf16, #tpu.memory_space<vmem>>, vector<1x128x128xbf16>
      %58 = vector.shape_cast %57 : vector<1x128x128xbf16> to vector<128x128xbf16>
      %cst_19 = arith.constant dense<0.000000e+00> : vector<128x128xf32>
      %59 = tpu.matmul %6, %58, %cst_19 {dimension_numbers = #tpu.dot_dimension_numbers<[1], [0], [0], [1], [0, 0, 1, 1], [], []>} : vector<128x128xbf16>, vector<128x128xbf16>, vector<128x128xf32> -> vector<128x128xf32>
      %cst_20 = arith.constant dense<0xFF800000> : vector<128xf32>
      %60 = vector.multi_reduction <maximumf>, %59, %cst_20 [1] : vector<128x128xf32> to vector<128xf32>
      %61 = vector.shape_cast %60 : vector<128xf32> to vector<128x1xf32>
      %62 = arith.maximumf %arg8, %61 : vector<128x1xf32>
      %63 = arith.subf %arg8, %62 : vector<128x1xf32>
      %64 = math.exp %63 : vector<128x1xf32>
      %65 = vector.broadcast %62 : vector<128x1xf32> to vector<128x128xf32>
      %66 = arith.subf %59, %65 : vector<128x128xf32>
      %67 = math.exp %66 : vector<128x128xf32>
      %68 = arith.mulf %64, %arg9 : vector<128x1xf32>
      %cst_21 = arith.constant dense<0.000000e+00> : vector<128xf32>
      %69 = vector.multi_reduction <add>, %67, %cst_21 [1] : vector<128x128xf32> to vector<128xf32>
      %70 = vector.shape_cast %69 : vector<128xf32> to vector<128x1xf32>
      %71 = arith.addf %68, %70 : vector<128x1xf32>
      %72 = arith.index_cast %55 : i32 to index
      %c128_22 = arith.constant 128 : index
      %73 = vector.load %arg5[%72, %c128_22] : memref<256x256xbf16, #tpu.memory_space<vmem>>, vector<128x128xbf16>
      %74 = vector.broadcast %64 : vector<128x1xf32> to vector<128x128xf32>
      %75 = arith.mulf %74, %arg10 : vector<128x128xf32>
      %76 = arith.truncf %67 : vector<128x128xf32> to vector<128x128xbf16>
      %cst_23 = arith.constant dense<0.000000e+00> : vector<128x128xf32>
      %77 = tpu.matmul %76, %73, %cst_23 {dimension_numbers = #tpu.dot_dimension_numbers<[1], [0], [0], [1], [0, 0, 1, 1], [], []>} : vector<128x128xbf16>, vector<128x128xbf16>, vector<128x128xf32> -> vector<128x128xf32>
      %78 = arith.addf %75, %77 : vector<128x128xf32>
      scf.yield %62, %71, %78 : vector<128x1xf32>, vector<128x1xf32>, vector<128x128xf32>
    }
    %c128_i32_4 = arith.constant 128 : i32
    %13 = arith.muli %arg1, %c128_i32_4 : i32
    %14 = tpu.assume_multiple %13, 128 : i32
    %15 = arith.index_cast %arg1 : i32 to index
    %c0_5 = arith.constant 0 : index
    %c0_6 = arith.constant 0 : index
    %16 = vector.load %arg6[%15, %c0_5, %c0_6] : memref<2x128x128xbf16, #tpu.memory_space<vmem>>, vector<1x128x128xbf16>
    %17 = vector.shape_cast %16 : vector<1x128x128xbf16> to vector<128x128xbf16>
    %cst_7 = arith.constant dense<0.000000e+00> : vector<128x128xf32>
    %18 = tpu.matmul %6, %17, %cst_7 {dimension_numbers = #tpu.dot_dimension_numbers<[1], [0], [0], [1], [0, 0, 1, 1], [], []>} : vector<128x128xbf16>, vector<128x128xbf16>, vector<128x128xf32> -> vector<128x128xf32>
    %19 = tpu.iota {dimensions = array<i32: 1>} : vector<128x128xi32>
    %20 = tpu.iota {dimensions = array<i32: 0>} : vector<128x128xi32>
    %21 = arith.cmpi sle, %19, %20 : vector<128x128xi32>
    %cst_8 = arith.constant 0xFF800000 : f32
    %22 = vector.broadcast %cst_8 : f32 to vector<128x128xf32>
    %23 = arith.select %21, %18, %22 : vector<128x128xi1>, vector<128x128xf32>
    %cst_9 = arith.constant dense<0xFF800000> : vector<128xf32>
    %24 = vector.multi_reduction <maximumf>, %23, %cst_9 [1] : vector<128x128xf32> to vector<128xf32>
    %25 = vector.shape_cast %24 : vector<128xf32> to vector<128x1xf32>
    %26 = arith.maximumf %12#0, %25 : vector<128x1xf32>
    %27 = arith.subf %12#0, %26 : vector<128x1xf32>
    %28 = math.exp %27 : vector<128x1xf32>
    %29 = vector.broadcast %26 : vector<128x1xf32> to vector<128x128xf32>
    %30 = arith.subf %23, %29 : vector<128x128xf32>
    %31 = math.exp %30 : vector<128x128xf32>
    %32 = arith.mulf %28, %12#1 : vector<128x1xf32>
    %cst_10 = arith.constant dense<0.000000e+00> : vector<128xf32>
    %33 = vector.multi_reduction <add>, %31, %cst_10 [1] : vector<128x128xf32> to vector<128xf32>
    %34 = vector.shape_cast %33 : vector<128xf32> to vector<128x1xf32>
    %35 = arith.addf %32, %34 : vector<128x1xf32>
    %36 = arith.index_cast %14 : i32 to index
    %c128 = arith.constant 128 : index
    %37 = vector.load %arg5[%36, %c128] : memref<256x256xbf16, #tpu.memory_space<vmem>>, vector<128x128xbf16>
    %38 = vector.broadcast %28 : vector<128x1xf32> to vector<128x128xf32>
    %39 = arith.mulf %38, %12#2 : vector<128x128xf32>
    %40 = arith.truncf %31 : vector<128x128xf32> to vector<128x128xbf16>
    %cst_11 = arith.constant dense<0.000000e+00> : vector<128x128xf32>
    %41 = tpu.matmul %40, %37, %cst_11 {dimension_numbers = #tpu.dot_dimension_numbers<[1], [0], [0], [1], [0, 0, 1, 1], [], []>} : vector<128x128xbf16>, vector<128x128xbf16>, vector<128x128xf32> -> vector<128x128xf32>
    %42 = arith.addf %39, %41 : vector<128x128xf32>
    %43 = tpu.reciprocal %35 {approx = true} : vector<128x1xf32> -> vector<128x1xf32>
    %44 = arith.mulf %35, %43 : vector<128x1xf32>
    %cst_12 = arith.constant 2.000000e+00 : f32
    %45 = vector.broadcast %cst_12 : f32 to vector<128x1xf32>
    %46 = arith.subf %45, %44 : vector<128x1xf32>
    %47 = arith.mulf %43, %46 : vector<128x1xf32>
    %48 = vector.extract_strided_slice %42 {offsets = [0, 0], sizes = [128, 64], strides = [1, 1]} : vector<128x128xf32> to vector<128x64xf32>
    %49 = vector.broadcast %47 : vector<128x1xf32> to vector<128x64xf32>
    %50 = arith.mulf %48, %49 : vector<128x64xf32>
    %c0_13 = arith.constant 0 : index
    %c0_14 = arith.constant 0 : index
    %c0_15 = arith.constant 0 : index
    %51 = vector.load %arg4[%c0_13, %c0_14, %c0_15] : memref<1x128x64xf32, #tpu.memory_space<vmem>>, vector<1x128x64xf32>
    %52 = vector.shape_cast %51 : vector<1x128x64xf32> to vector<128x64xf32>
    %53 = vector.shape_cast %50 : vector<128x64xf32> to vector<1x128x64xf32>
    tpu.vector_store %arg4[%c0_13, %c0_14, %c0_15], %53 {strides = array<i32>} : memref<1x128x64xf32, #tpu.memory_space<vmem>>, vector<1x128x64xf32>,
    return
  }
  func.func @transform_0(%arg0: i32, %arg1: i32) -> (i32, i32, i32) {
    %c0_i32 = arith.constant 0 : i32
    %c0_i32_0 = arith.constant 0 : i32
    %c0_i32_1 = arith.constant 0 : i32
    return %arg0, %c0_i32, %c0_i32_0 : i32, i32, i32
  }
  func.func @transform_1(%arg0: i32, %arg1: i32) -> (i32, i32) {
    %c0_i32 = arith.constant 0 : i32
    %c0_i32_0 = arith.constant 0 : i32
    %c0_i32_1 = arith.constant 0 : i32
    return %c0_i32, %c0_i32_0 : i32, i32
  }
  func.func @transform_2(%arg0: i32, %arg1: i32) -> (i32, i32, i32) {
    %c0_i32 = arith.constant 0 : i32
    %c0_i32_0 = arith.constant 0 : i32
    return %arg0, %arg1, %c0_i32 : i32, i32, i32
  }
}

</mosaic_0001>

<bundles_post_ra>
// kernel: head_forward.1
= control target key start
LH: loop header
LB: loop body
LE: loop exit
PB: predicated region body
PF: predicated region fallthrough
CT: control target
= control target key end

     0   :  { %s6667_s9 = smov 0   ;;  %s6669_s10 = smov 0   ;;  %s8890_s0 = inlined_call_operand.vmem [shape: bf16[2,256,384], index: 0, kind: input, shape index: {}]   ;;  %s8891_s1 = inlined_call_operand.vmem [shape: bf16[384,384], index: 1, kind: input, shape index: {}]   ;;  %s8892_s2 = inlined_call_operand.vmem [shape: f32[2,256,64], index: 2, kind: output, shape index: {}]  }
   0x1   :  { %s6671_s11 = smov 0   ;;  %s6673_s12 = smov 0  }
   0x2   :  { %s6675_s13 = smov 0  }
   0x3 LB: > { %s21_s14 = sadd.s32 1, %s6253_s11  ;;  %s24_s15 = sadd.s32 1, %s6257_s12  ;;  %s6261_s13 = sphi %s6675_s13, %s12_s13   ;;  %s6257_s12 = sphi %s6673_s12, %s9201_s12   ;;  %s6253_s11 = sphi %s6671_s11, %s9200_s11   ;;  %s6249_s10 = sphi %s6669_s10, %s9199_s10   ;;  %s6245_s9 = sphi %s6667_s9, %s9198_s9  }
   0x4   : > { %p22_p0 = scmp.ge.s32.totalorder %s21_s14, 2  ;;  %p3842_p1 = scmp.ge.s32.totalorder %s6261_s13, 1 }
   0x5   : > { %p126_p2 = scmp.lt.s32.totalorder %s6261_s13, 5 }
   0x6   : > { %s9203_s14 = smov (%p22_p0, %s21_s14), 0  ;;  %s9205_s15 = smov (!%p22_p0, %s24_s15), %s6257_s12 }
   0x7   : > { %p127_p3 = pnand %p3842_p1, %p126_p2  ;;  %p26_p4 = scmp.ge.s32.totalorder %s9205_s15, 2 }
   0x9   : > { %s9207_s15 = smov (%p26_p4, %s9205_s15), 0  ;;  %130 = sbr.rel (%p127_p3) target bundleno = 2035 (0x7f3), region = 28 }
  0x10   : > { %p152_p5 = scmp.lt.s32.totalorder %s6249_s10, 1  ;;  %s3844_s16 = sshll.u32 %s6245_s9, 4 }
  0x11   : > { %p160_p6 = scmp.lt.s32.totalorder %s3844_s16, 31  ;;  %p3847_p7 = scmp.ne.s32.totalorder %s6245_s9, 0 }
  0x12   : > { %s9209_s10 = smov (!%p152_p5, %s6249_s10), 1  ;;  %v6714_v0 = vld [vmem:[%s8891_s1 + $0x4] ss:$12 sps:$4 sm:$0xff] (!%p3847_p7)   ;;  %v6719_v1 = vld [vmem:[%s8891_s1] ss:$12 sps:$4 sm:$0xff] (!%p3847_p7)  }
  0x13   : > { %s9211_s16 = smov (!%p160_p6, %s3844_s16), 31  ;;  %s4537_s17 = smul.u32 384, %s9209_s10  ;;  %812 = vmatprep.subr.bf16.mxu0 (!%p3847_p7), %v6714_v0  ;;  %v6725_v2 = vld [vmem:[%s8891_s1 + $0x1c] ss:$12 sps:$4 sm:$0xff] (!%p3847_p7)   ;;  %v6731_v3 = vld [vmem:[%s8891_s1 + $0x18] ss:$12 sps:$4 sm:$0xff] (!%p3847_p7)  }
  0x14   : > { %s3845_s18 = sshll.u32 %s9209_s10, 5  ;;  %171 = sbr.rel (%p3847_p7) target bundleno = 686 (0x2ae), region = 32  ;;  %813 = vmatpush1.bf16.msra.mxu0 (!%p3847_p7), %v6719_v1  ;;  %v6737_v4 = vld [vmem:[%s8891_s1 + $0x34] ss:$12 sps:$4 sm:$0xff] (!%p3847_p7)   ;;  %v6743_v5 = vld [vmem:[%s8891_s1 + $0x30] ss:$12 sps:$4 sm:$0xff] (!%p3847_p7)  }
  0x15   : > { %s163_s19 = sadd.s32 %s3845_s18, %s9211_s16  ;;  %s6703_s22 = scalar_lea.vmem %s8890_s0, %s4537_s17  ;;  %814 = vmatprep.subr.bf16.mxu0 (!%p3847_p7), %v6725_v2  ;;  %v6749_v6 = vld [vmem:[%s8891_s1 + $0x4c] ss:$12 sps:$4 sm:$0xff] (!%p3847_p7)   ;;  %v6755_v7 = vld [vmem:[%s8891_s1 + $0x48] ss:$12 sps:$4 sm:$0xff] (!%p3847_p7)   ;;  %v6761_v8 = vld [vmem:[%s8891_s1 + $0x64] ss:$12 sps:$4 sm:$0xff] (!%p3847_p7)  }
  0x16   : > { %s3846_s23 = sshll.u32 %s163_s19, 3  ;;  %v6767_v9 = vld [vmem:[%s8891_s1 + $0x60] ss:$12 sps:$4 sm:$0xff] (!%p3847_p7)   ;;  %v6773_v10 = vld [vmem:[%s8891_s1 + $0x7c] ss:$12 sps:$4 sm:$0xff] (!%p3847_p7)  }
  0x17   : > { %s6708_s26 = scalar_lea.vmem %s8892_s2, %s3846_s23  ;;  %v6779_v11 = vld [vmem:[%s8891_s1 + $0x78] ss:$12 sps:$4 sm:$0xff] (!%p3847_p7)   ;;  %v6785_v12 = vld [vmem:[%s8891_s1 + $0x94] ss:$12 sps:$4 sm:$0xff] (!%p3847_p7)   ;;  %v6792_v14 = vld [vmem:[%s8891_s1 + $0x90] ss:$12 sps:$4 sm:$0xff] (!%p3847_p7)  }
  0x18   : > { %815 = vmatpush1.bf16.msra.mxu0 (!%p3847_p7), %v6731_v3  ;;  %v5517_v13 = vld [vmem:[%s6703_s22 + $0x4] ss:$12 sps:$4 sm:$0xff] (!%p3847_p7)   ;;  %v6798_v15 = vld [vmem:[%s8891_s1 + $0xac] ss:$12 sps:$4 sm:$0xff] (!%p3847_p7)   ;;  %v6804_v16 = vld [vmem:[%s8891_s1 + $0xa8] ss:$12 sps:$4 sm:$0xff] (!%p3847_p7)  }
  0x19   : > { %816 = vmatprep.subr.bf16.mxu0 (!%p3847_p7), %v6737_v4  ;;  %844 = vmatprep.mubr.bf16.mxu0 (!%p3847_p7), %v5517_v13  ;;  %v6810_v17 = vld [vmem:[%s8891_s1 + $0xc4] ss:$12 sps:$4 sm:$0xff] (!%p3847_p7)   ;;  %v6816_v18 = vld [vmem:[%s8891_s1 + $0xc0] ss:$12 sps:$4 sm:$0xff] (!%p3847_p7)   ;;  %v6822_v19 = vld [vmem:[%s8891_s1 + $0xdc] ss:$12 sps:$4 sm:$0xff] (!%p3847_p7)  }
  0x1a   : > { %1070 = vmatprep.mubr.bf16.mxu1 (!%p3847_p7), %v5517_v13  ;;  %v6827_v20 = vld [vmem:[%s8891_s1 + $0xd8] ss:$12 sps:$4 sm:$0xff] (!%p3847_p7)   ;;  %v6832_v21 = vld [vmem:[%s8891_s1 + $0xf4] ss:$12 sps:$4 sm:$0xff] (!%p3847_p7)   ;;  %v6852_v26 = vld [vmem:[%s8891_s1 + $0xf0] ss:$12 sps:$4 sm:$0xff] (!%p3847_p7)  }
  0x1b   : > { %v5545_v22 = vld [vmem:[%s8891_s1 + $0xc8] ss:$12 sps:$4 sm:$0xff]   ;;  %v5547_v24 = vld [vmem:[%s8891_s1 + $0xe0] ss:$12 sps:$4 sm:$0xff]   ;;  %v6868_v29 = vld [vmem:[%s8891_s1 + $0x124] ss:$12 sps:$4 sm:$0xff]  }
  0x1c   : > { %817 = vmatpush1.bf16.msra.mxu0 %v6743_v5  ;;  %v5546_v23 = vld [vmem:[%s8891_s1 + $0x8] ss:$12 sps:$4 sm:$0xff]   ;;  %4057 = vmatprep.subr.bf16.mxu1 %v5545_v22  ;;  %v5548_v25 = vld [vmem:[%s8891_s1 + $0x20] ss:$12 sps:$4 sm:$0xff]   ;;  %v5555_v30 = vld [vmem:[%s8891_s1 + $0xf8] ss:$12 sps:$4 sm:$0xff]  }
  0x1d   : > { %818 = vmatprep.subr.bf16.mxu0 %v6749_v6  ;;  %4058 = vmatpush3.bf16.msra.mxu1 %v5546_v23  ;;  %v6858_v27 = vld [vmem:[%s8891_s1 + $0x10c] ss:$12 sps:$4 sm:$0xff]   ;;  %v6863_v28 = vld [vmem:[%s8891_s1 + $0x108] ss:$12 sps:$4 sm:$0xff]   ;;  %v5557_v32 = vld [vmem:[%s8891_s1 + $0x110] ss:$12 sps:$4 sm:$0xff]  }
  0x1e   : > { %4059 = vmatprep.subr.bf16.mxu1 %v5547_v24  ;;  %v5556_v31 = vld [vmem:[%s8891_s1 + $0x38] ss:$12 sps:$4 sm:$0xff]   ;;  %v5558_v33 = vld [vmem:[%s8891_s1 + $0x50] ss:$12 sps:$4 sm:$0xff]   ;;  %v6888_v34 = vld [vmem:[%s8891_s1 + $0x120] ss:$12 sps:$4 sm:$0xff]  }
  0x1f   : > { %v5506_v35 = vld [vmem:[%s8891_s1 + $0x13c] ss:$12 sps:$4 sm:$0xff]   ;;  %v5508_v37 = vld [vmem:[%s8891_s1 + $0x138] ss:$12 sps:$4 sm:$0xff]   ;;  %v5567_v39 = vld [vmem:[%s8891_s1 + $0x140] ss:$12 sps:$4 sm:$0xff]  }
  0x20   : > { %819 = vmatpush1.bf16.msra.mxu0 %v6755_v7  ;;  %v5565_v36 = vld [vmem:[%s8891_s1 + $0x128] ss:$12 sps:$4 sm:$0xff]   ;;  %v5511_v41 = vld [vmem:[%s8891_s1 + $0x150] ss:$12 sps:$4 sm:$0xff]   ;;  %v5568_v42 = vld [vmem:[%s8891_s1 + $0x80] ss:$12 sps:$4 sm:$0xff]  }
  0x21   : > { %820 = vmatprep.subr.bf16.mxu0 %v6761_v8  ;;  %4060 = vmatpush3.bf16.msra.mxu1 %v5548_v25  ;;  %v5566_v38 = vld [vmem:[%s8891_s1 + $0x68] ss:$12 sps:$4 sm:$0xff]   ;;  %v5575_v43 = vld [vmem:[%s8891_s1 + $0x158] ss:$12 sps:$4 sm:$0xff]   ;;  %v5577_v47 = vld [vmem:[%s8891_s1 + $0x170] ss:$12 sps:$4 sm:$0xff]  }
  0x22   : > { %4061 = vmatprep.subr.bf16.mxu1 %v5555_v30  ;;  %v5509_v40 = vld [vmem:[%s8891_s1 + $0x154] ss:$12 sps:$4 sm:$0xff]   ;;  %v5512_v44 = vld [vmem:[%s8891_s1 + $0x16c] ss:$12 sps:$4 sm:$0xff]   ;;  %v5520_v49 = vld [vmem:[%s8891_s1 + $0x184] ss:$12 sps:$4 sm:$0xff]  }
  0x23   : > { %v5514_v45 = vld [vmem:[%s8891_s1 + $0x168] ss:$12 sps:$4 sm:$0xff]   ;;  %v5576_v46 = vld [vmem:[%s8891_s1 + $0x98] ss:$12 sps:$4 sm:$0xff]   ;;  %v5515_v48 = vld [vmem:[%s6703_s22] ss:$12 sps:$4 sm:$0xff]  }
  0x24   : > { %821 = vmatpush1.bf16.msra.mxu0 %v6767_v9  ;;  %v5518_v50 = vld [vmem:[%s8891_s1 + $0x180] ss:$12 sps:$4 sm:$0xff]   ;;  %v5578_v51 = vld [vmem:[%s8891_s1 + $0xb0] ss:$12 sps:$4 sm:$0xff]   ;;  %v5524_v54 = vld [vmem:[%s8891_s1 + $0x198] ss:$12 sps:$4 sm:$0xff]  }
  0x25   : > { %822 = vmatprep.subr.bf16.mxu0 %v6773_v10  ;;  %4062 = vmatpush3.bf16.msra.mxu1 %v5556_v31  ;;  %v5521_v52 = vld [vmem:[%s6703_s22 + $0x1c] ss:$12 sps:$4 sm:$0xff]   ;;  %v5523_v55 = vld [vmem:[%s6703_s22 + $0x18] ss:$12 sps:$4 sm:$0xff]   ;;  %v5532_v56 = vld [vmem:[%s8891_s1 + $0x1b4] ss:$12 sps:$4 sm:$0xff]  }
  0x26   : > { %4063 = vmatprep.subr.bf16.mxu1 %v5557_v32  ;;  %v5526_v53 = vld [vmem:[%s8891_s1 + $0x19c] ss:$12 sps:$4 sm:$0xff]   ;;  %v5527_v57 = vld [vmem:[%s6703_s22 + $0x34] ss:$12 sps:$4 sm:$0xff]   ;;  %v5538_v59 = vld [vmem:[%s8891_s1 + $0x1cc] ss:$12 sps:$4 sm:$0xff]  }
  0x27   : > { %v5530_v58 = vld [vmem:[%s8891_s1 + $0x1b0] ss:$12 sps:$4 sm:$0xff]   ;;  %v5592_v60 = vld [vmem:[%s8891_s1 + $0x188] ss:$12 sps:$4 sm:$0xff]   ;;  %v5595_v62 = vld [vmem:[%s8891_s1 + $0x1a0] ss:$12 sps:$4 sm:$0xff]  }
  0x28   : > { %823 = vmatpush1.bf16.msra.mxu0 %v6779_v11  ;;  %v5536_v61 = vld [vmem:[%s8891_s1 + $0x1c8] ss:$12 sps:$4 sm:$0xff]   ;;  %v5529_v63 = vld [vmem:[%s6703_s22 + $0x30] ss:$12 sps:$4 sm:$0xff]   ;;  %v5597_v22 = vld [vmem:[%s8891_s1 + $0x1b8] ss:$12 sps:$4 sm:$0xff]  }
  0x29   : > { %824 = vmatprep.subr.bf16.mxu0 %v6785_v12  ;;  %4064 = vmatpush3.bf16.msra.mxu1 %v5558_v33  ;;  %v5544_v13 = vld [vmem:[%s8891_s1 + $0x1e4] ss:$12 sps:$4 sm:$0xff]   ;;  %v5533_v23 = vld [vmem:[%s6703_s22 + $0x4c] ss:$12 sps:$4 sm:$0xff]   ;;  %v6982_v25 = vld [vmem:[%s8891_s1 + $0x1fc] ss:$12 sps:$4 sm:$0xff]  }
  0x2a   : > { %4065 = vmatprep.subr.bf16.mxu1 %v5565_v36  ;;  %v5542_v24 = vld [vmem:[%s8891_s1 + $0x1e0] ss:$12 sps:$4 sm:$0xff]   ;;  %v5600_v30 = vld [vmem:[%s8891_s1 + $0x1d0] ss:$12 sps:$4 sm:$0xff]   ;;  %v6990_v31 = vld [vmem:[%s8891_s1 + $0x1f8] ss:$12 sps:$4 sm:$0xff]  }
  0x2b   : > { %v5535_v32 = vld [vmem:[%s6703_s22 + $0x48] ss:$12 sps:$4 sm:$0xff]   ;;  %v5539_v36 = vld [vmem:[%s6703_s22 + $0x64] ss:$12 sps:$4 sm:$0xff]  }
  0x2c   : > { %825 = vmatpush1.bf16.msra.mxu0 %v6792_v14  ;;  %v6997_v33 = vld [vmem:[%s8891_s1 + $0x214] ss:$12 sps:$4 sm:$0xff]  }
  0x2d   : > { %826 = vmatprep.subr.bf16.mxu0 %v6798_v15  ;;  %4066 = vmatpush3.bf16.msra.mxu1 %v5566_v38  ;;  %v7013_v38 = vld [vmem:[%s8891_s1 + $0x22c] ss:$12 sps:$4 sm:$0xff]  }
  0x2e   : > { %4067 = vmatprep.subr.bf16.mxu1 %v5567_v39  ;;  %v5605_v39 = vld [vmem:[%s8891_s1 + $0x200] ss:$12 sps:$4 sm:$0xff]  }
  0x30   : > { %827 = vmatpush1.bf16.msra.mxu0 %v6804_v16 }
  0x31   : > { %828 = vmatprep.subr.bf16.mxu0 %v6810_v17  ;;  %4068 = vmatpush3.bf16.msra.mxu1 %v5568_v42  ;;  %v5607_v42 = vld [vmem:[%s8891_s1 + $0x218] ss:$12 sps:$4 sm:$0xff]  }
  0x32   : > { %4069 = vmatprep.subr.bf16.mxu1 %v5575_v43  ;;  %v5541_v43 = vld [vmem:[%s6703_s22 + $0x60] ss:$12 sps:$4 sm:$0xff]  }
  0x34   : > { %829 = vmatpush1.bf16.msra.mxu0 %v6816_v18 }
  0x35   : > { %830 = vmatprep.subr.bf16.mxu0 %v6822_v19  ;;  %4070 = vmatpush3.bf16.msra.mxu1 %v5576_v46  ;;  %v5551_v46 = vld [vmem:[%s6703_s22 + $0x78] ss:$12 sps:$4 sm:$0xff]  }
  0x36   : > { %4071 = vmatprep.subr.bf16.mxu1 %v5577_v47  ;;  %v5559_v47 = vld [vmem:[%s6703_s22 + $0x94] ss:$12 sps:$4 sm:$0xff]  }
  0x38   : > { %831 = vmatpush1.bf16.msra.mxu0 %v6827_v20 }
  0x39   : > { %832 = vmatprep.subr.bf16.mxu0 %v6832_v21  ;;  %4072 = vmatpush3.bf16.msra.mxu1 %v5578_v51  ;;  %v6651_v51 = vmov 0  }
  0x3a   : > { %4281 = vmatprep.subr.bf16.mxu1 %v5592_v60 }
  0x3c   : > { %833 = vmatpush1.bf16.msra.mxu0 %v6852_v26  ;;  %1071 = vmatmul.mubr.bf16.vlgmr.msra.gmra.mrb[0].mxu1 %v5515_v48 }
  0x3d   : > { %834 = vmatprep.subr.bf16.mxu0 %v6858_v27  ;;  %1078 = vmatprep.mubr.bf16.mxu1 %v5521_v52 }
  0x3e   : > { %4282 = vmatpush3.bf16.msra.mxu1 %v5592_v60  ;;  %v5590_v60 = vld [vmem:[%s8891_s1 + $0x50] ss:$12 sps:$4 sm:$0xff]  }
  0x3f   : > { %4283 = vmatprep.subr.bf16.mxu1 %v5595_v62 }
  0x40   : > { %835 = vmatpush1.bf16.msra.mxu0 %v6863_v28 }
  0x41   : > { %836 = vmatprep.subr.bf16.mxu0 %v6868_v29 }
  0x42   : > { %4284 = vmatpush3.bf16.msra.mxu1 %v5595_v62  ;;  %v5598_v62 = vld [vmem:[%s8891_s1 + $0x140] ss:$12 sps:$4 sm:$0xff]  }
  0x43   : > { %4285 = vmatprep.subr.bf16.mxu1 %v5597_v22 }
  0x44   : > { %837 = vmatpush1.bf16.msra.mxu0 %v6888_v34  ;;  %1079 = vmatmul.mubr.bf16.gmra.mrb[4].mxu1 %v5523_v55 }
  0x45   : > { %838 = vmatprep.subr.bf16.mxu0 %v5506_v35  ;;  %1086 = vmatprep.mubr.bf16.mxu1 %v5527_v57  ;;  %v5602_v35 = vld [vmem:[%s8891_s1 + $0x1e8] ss:$12 sps:$4 sm:$0xff]  }
  0x46   : > { %4286 = vmatpush3.bf16.msra.mxu1 %v5597_v22  ;;  %v5613_v22 = vld [vmem:[%s6703_s22 + $0xc4] ss:$12 sps:$4 sm:$0xff]  }
  0x47   : > { %4287 = vmatprep.subr.bf16.mxu1 %v5600_v30 }
  0x48   : > { %839 = vmatpush1.bf16.msra.mxu0 %v5508_v37  ;;  %v7007_v37 = vld [vmem:[%s8891_s1 + $0x210] ss:$12 sps:$4 sm:$0xff]  }
  0x49   : > { %840 = vmatprep.subr.bf16.mxu0 %v5509_v40  ;;  %v7022_v40 = vld [vmem:[%s8891_s1 + $0x228] ss:$12 sps:$4 sm:$0xff]  }
  0x4a   : > { %4288 = vmatpush3.bf16.msra.mxu1 %v5600_v30  ;;  %v5668_v30 = vld [vmem:[%s8891_s1 + $0x1b4] ss:$12 sps:$4 sm:$0xff]  }
  0x4b   : > { %4289 = vmatprep.subr.bf16.mxu1 %v5602_v35 }
  0x4c   : > { %841 = vmatpush1.bf16.msra.mxu0 %v5511_v41  ;;  %1087 = vmatmul.mubr.bf16.gmra.mrb[8].mxu1 %v5529_v63  ;;  %v5580_v41 = vld [vmem:[%s8891_s1 + $0xc8] ss:$12 sps:$4 sm:$0xff]  }
  0x4d   : > { %842 = vmatprep.subr.bf16.mxu0 %v5512_v44  ;;  %1094 = vmatprep.mubr.bf16.mxu1 %v5533_v23  ;;  %v5549_v44 = vld [vmem:[%s6703_s22 + $0x7c] ss:$12 sps:$4 sm:$0xff]  }
  0x4e   : > { %4290 = vmatpush3.bf16.msra.mxu1 %v5602_v35  ;;  %v5671_v35 = vld [vmem:[%s8891_s1 + $0x1cc] ss:$12 sps:$4 sm:$0xff]  }
  0x4f   : > { %4291 = vmatprep.subr.bf16.mxu1 %v5605_v39 }
  0x50   : > { %843 = vmatpush1.bf16.msra.mxu0 %v5514_v45  ;;  %v5610_v45 = vld [vmem:[%s8891_s1 + $0x230] ss:$12 sps:$4 sm:$0xff]  }
  0x51   : > { %925 = vmatprep.subr.bf16.mxu0 %v5520_v49  ;;  %v5569_v49 = vld [vmem:[%s6703_s22 + $0xac] ss:$12 sps:$4 sm:$0xff]  }
  0x52   : > { %4292 = vmatpush3.bf16.msra.mxu1 %v5605_v39  ;;  %v5621_v39 = vld [vmem:[%s6703_s22 + $0xf0] ss:$12 sps:$4 sm:$0xff]  }
  0x53   : > { %845 = vmatmul.mubr.bf16.vlgmr.msra.gmra.mrb[0].mxu0 %v5515_v48  ;;  %4293 = vmatprep.subr.bf16.mxu1 %v5607_v42  ;;  %v5561_v48 = vld [vmem:[%s6703_s22 + $0x90] ss:$12 sps:$4 sm:$0xff]  }
  0x54   : > { %926 = vmatpush1.bf16.msra.mxu0 %v5518_v50  ;;  %854 = vmatprep.mubr.bf16.mxu0 %v5521_v52  ;;  %v5571_v50 = vld [vmem:[%s6703_s22 + $0xa8] ss:$12 sps:$4 sm:$0xff]  }
  0x55   : > { %927 = vmatprep.subr.bf16.mxu0 %v5526_v53  ;;  %1095 = vmatmul.mubr.bf16.gmra.mrb[12].mxu1 %v5535_v32  ;;  %v5579_v52 = vld [vmem:[%s6703_s22 + $0x8] ss:$12 sps:$4 sm:$0xff]   ;;  %v5583_v53 = vld [vmem:[%s8891_s1 + $0xe0] ss:$12 sps:$4 sm:$0xff]  }
  0x56   : > { %1102 = vmatprep.mubr.bf16.mxu1 %v5539_v36  ;;  %4294 = vmatpush3.bf16.msra.mxu1 %v5607_v42  ;;  %v5623_v42 = vld [vmem:[%s6703_s22 + $0x10c] ss:$12 sps:$4 sm:$0xff]  }
  0x57   : > { %4295 = vmatprep.subr.bf16.mxu1 %v5610_v45 }
  0x58   : > { %928 = vmatpush1.bf16.msra.mxu0 %v5524_v54  ;;  %v5582_v54 = vld [vmem:[%s6703_s22 + $0x20] ss:$12 sps:$4 sm:$0xff]  }
  0x59   : > { %929 = vmatprep.subr.bf16.mxu0 %v5532_v56  ;;  %v5585_v56 = vld [vmem:[%s6703_s22 + $0x38] ss:$12 sps:$4 sm:$0xff]  }
  0x5a   : > { %4296 = vmatpush3.bf16.msra.mxu1 %v5610_v45  ;;  %v5672_v45 = vld [vmem:[%s8891_s1 + $0x1e0] ss:$12 sps:$4 sm:$0xff]  }
  0x5b   : > { %855 = vmatmul.mubr.bf16.gmra.mrb[4].mxu0 %v5523_v55  ;;  %1952 = vmatprep.subr.bf16.mxu1 %v6714_v0  ;;  %v5581_v0 = vld [vmem:[%s8891_s1 + $0x8] ss:$12 sps:$4 sm:$0xff]   ;;  %v5584_v55 = vld [vmem:[%s8891_s1 + $0x20] ss:$12 sps:$4 sm:$0xff]  }
  0x5c   : > { %864 = vmatprep.mubr.bf16.mxu0 %v5527_v57  ;;  %930 = vmatpush1.bf16.msra.mxu0 %v5530_v58  ;;  %v5586_v57 = vld [vmem:[%s8891_s1 + $0xf8] ss:$12 sps:$4 sm:$0xff]  }
  0x5d   : > { %931 = vmatprep.subr.bf16.mxu0 %v5538_v59  ;;  %1103 = vmatmul.mubr.bf16.gmra.mrb[16].mxu1 %v5541_v43  ;;  %v5587_v58 = vld [vmem:[%s8891_s1 + $0x38] ss:$12 sps:$4 sm:$0xff]   ;;  %v5589_v59 = vld [vmem:[%s8891_s1 + $0x110] ss:$12 sps:$4 sm:$0xff]  }
  0x5e   : > { %1110 = vmatprep.mubr.bf16.mxu1 %v5549_v44 }
  0x60   : > { %932 = vmatpush1.bf16.msra.mxu0 %v5536_v61  ;;  %v5591_v61 = vld [vmem:[%s6703_s22 + $0x68] ss:$12 sps:$4 sm:$0xff]  }
  0x61   : > { %933 = vmatprep.subr.bf16.mxu0 %v5544_v13  ;;  %v5608_v13 = vld [vmem:[%s8891_s1 + $0x170] ss:$12 sps:$4 sm:$0xff]  }
  0x63   : > { %865 = vmatmul.mubr.bf16.gmra.mrb[8].mxu0 %v5529_v63  ;;  %v5601_v63 = vld [vmem:[%s6703_s22 + $0x98] ss:$12 sps:$4 sm:$0xff]  }
  0x64   : > { %874 = vmatprep.mubr.bf16.mxu0 %v5533_v23  ;;  %934 = vmatpush1.bf16.msra.mxu0 %v5542_v24  ;;  %v5619_v23 = vld [vmem:[%s6703_s22 + $0xf4] ss:$12 sps:$4 sm:$0xff]   ;;  %v5626_v24 = vld [vmem:[%s8891_s1 + $0x1d0] ss:$12 sps:$4 sm:$0xff]  }
  0x65   : > { %935 = vmatprep.subr.bf16.mxu0 %v6982_v25  ;;  %1111 = vmatmul.mubr.bf16.gmra.mrb[20].mxu1 %v5551_v46 }
  0x66   : > { %1118 = vmatprep.mubr.bf16.mxu1 %v5559_v47 }
  0x68   : > { %936 = vmatpush1.bf16.msra.mxu0 %v6990_v31 }
  0x69   : > { %937 = vmatprep.subr.bf16.mxu0 %v6997_v33 }
  0x6b   : > { %875 = vmatmul.mubr.bf16.gmra.mrb[12].mxu0 %v5535_v32  ;;  %v5666_v32 = vld [vmem:[%s8891_s1 + $0x1b0] ss:$12 sps:$4 sm:$0xff]  }
  0x6c   : > { %884 = vmatprep.mubr.bf16.mxu0 %v5539_v36  ;;  %938 = vmatpush1.bf16.msra.mxu0 %v7007_v37  ;;  %v5630_v36 = vld [vmem:[%s8891_s1 + $0x1e8] ss:$12 sps:$4 sm:$0xff]  }
  0x6d   : > { %939 = vmatprep.subr.bf16.mxu0 %v7013_v38  ;;  %1119 = vmatmul.mubr.bf16.gmra.mrb[24].mxu1 %v5561_v48 }
  0x6e   : > { %1126 = vmatprep.mubr.bf16.mxu1 %v5569_v49 }
  0x70   : > { %940 = vmatpush1.bf16.msra.mxu0 %v7022_v40 }
  0x71   : > { %4137 = vmatprep.subr.bf16.mxu0 %v5580_v41  ;;  %v5669_v41 = vld [vmem:[%s8891_s1 + $0x1c8] ss:$12 sps:$4 sm:$0xff]  }
  0x73   : > { %885 = vmatmul.mubr.bf16.gmra.mrb[16].mxu0 %v5541_v43  ;;  %v5634_v43 = vld [vmem:[%s8891_s1 + $0x200] ss:$12 sps:$4 sm:$0xff]  }
  0x74   : > { %894 = vmatprep.mubr.bf16.mxu0 %v5549_v44  ;;  %v5674_v44 = vld [vmem:[%s8891_s1 + $0x1e4] ss:$12 sps:$4 sm:$0xff]  }
  0x75   : > { %1127 = vmatmul.mubr.bf16.gmra.mrb[28].mxu1 %v5571_v50 }
  0x76   : > { %4297 = vmatprep.mubr.bf16.mxu1 %v5579_v52 }
  0x7b   : > { %895 = vmatmul.mubr.bf16.gmra.mrb[20].mxu0 %v5551_v46  ;;  %v5638_v46 = vld [vmem:[%s8891_s1 + $0x218] ss:$12 sps:$4 sm:$0xff]  }
  0x7c   : > { %904 = vmatprep.mubr.bf16.mxu0 %v5559_v47  ;;  %v5625_v47 = vld [vmem:[%s6703_s22 + $0x108] ss:$12 sps:$4 sm:$0xff]  }
  0x7d   : > { %4298 = vmatmul.mubr.bf16.vlgmr.msra.gmra.mrb[32].mxu1 %v5582_v54 }
  0x7e   : > { %1953 = vmatpush1.bf16.msra.mxu1 %v6719_v1  ;;  %4301 = vmatprep.mubr.bf16.mxu1 %v5585_v56  ;;  %v5588_v1 = vld [vmem:[%s6703_s22 + $0x50] ss:$12 sps:$4 sm:$0xff]  }
  0x7f   : > { %1954 = vmatprep.subr.bf16.mxu1 %v6725_v2  ;;  %v5593_v2 = vld [vmem:[%s8891_s1 + $0x128] ss:$12 sps:$4 sm:$0xff]  }
  0x82   : > { %1955 = vmatpush1.bf16.msra.mxu1 %v6731_v3  ;;  %v5594_v3 = vld [vmem:[%s8891_s1 + $0x68] ss:$12 sps:$4 sm:$0xff]  }
  0x83   : > { %905 = vmatmul.mubr.bf16.gmra.mrb[24].mxu0 %v5561_v48  ;;  %1956 = vmatprep.subr.bf16.mxu1 %v6737_v4  ;;  %v5596_v4 = vld [vmem:[%s6703_s22 + $0x80] ss:$12 sps:$4 sm:$0xff]   ;;  %v5627_v48 = vld [vmem:[%s6703_s22 + $0x124] ss:$12 sps:$4 sm:$0xff]  }
  0x84   : > { %914 = vmatprep.mubr.bf16.mxu0 %v5569_v49  ;;  %v5642_v49 = vld [vmem:[%s8891_s1 + $0x230] ss:$12 sps:$4 sm:$0xff]  }
  0x85   : > { %4302 = vmatmul.mubr.bf16.gmra.mrb[36].mxu1 %v5588_v1 }
  0x86   : > { %1957 = vmatpush1.bf16.msra.mxu1 %v6743_v5  ;;  %4305 = vmatprep.mubr.bf16.mxu1 %v5591_v61  ;;  %v5599_v5 = vld [vmem:[%s8891_s1 + $0x80] ss:$12 sps:$4 sm:$0xff]  }
  0x87   : > { %1958 = vmatprep.subr.bf16.mxu1 %v6749_v6  ;;  %v5603_v6 = vld [vmem:[%s8891_s1 + $0x158] ss:$12 sps:$4 sm:$0xff]  }
  0x8a   : > { %1959 = vmatpush1.bf16.msra.mxu1 %v6755_v7  ;;  %v5604_v7 = vld [vmem:[%s8891_s1 + $0x98] ss:$12 sps:$4 sm:$0xff]  }
  0x8b   : > { %915 = vmatmul.mubr.bf16.gmra.mrb[28].mxu0 %v5571_v50  ;;  %1960 = vmatprep.subr.bf16.mxu1 %v6761_v8  ;;  %v5606_v8 = vld [vmem:[%s6703_s22 + $0xb0] ss:$12 sps:$4 sm:$0xff]   ;;  %v5629_v50 = vld [vmem:[%s6703_s22 + $0x120] ss:$12 sps:$4 sm:$0xff]  }
  0x8c   : > { %957 = vmatprep.mubr.bf16.mxu0 %v6651_v51 }
  0x8d   : > { %4306 = vmatmul.mubr.bf16.gmra.mrb[40].mxu1 %v5596_v4 }
  0x8e   : > { %1961 = vmatpush1.bf16.msra.mxu1 %v6767_v9  ;;  %4309 = vmatprep.mubr.bf16.mxu1 %v5601_v63  ;;  %v5609_v9 = vld [vmem:[%s8891_s1 + $0xb0] ss:$12 sps:$4 sm:$0xff]  }
  0x8f   : > { %1962 = vmatprep.subr.bf16.mxu1 %v6773_v10  ;;  %v5614_v10 = vld [vmem:[%s8891_s1 + $0x188] ss:$12 sps:$4 sm:$0xff]  }
  0x92   : > { %1963 = vmatpush1.bf16.msra.mxu1 %v6779_v11  ;;  %v5645_v11 = vld [vmem:[%s8891_s1 + $0x13c] ss:$12 sps:$4 sm:$0xff]  }
  0x93   : > { %958 = vmatmul.mubr.bf16.vlgmr.msra.gmra.mrb[0].mxu0 %v5579_v52  ;;  %1964 = vmatprep.subr.bf16.mxu1 %v6785_v12  ;;  %v5643_v12 = vld [vmem:[%s8891_s1 + $0x138] ss:$12 sps:$4 sm:$0xff]  }
  0x94   : > { %4138 = vmatpush3.bf16.msra.mxu0 %v5581_v0  ;;  %967 = vmatprep.mubr.bf16.mxu0 %v6651_v51  ;;  %v5639_v52 = vld [vmem:[%s6703_s22 + $0x16c] ss:$12 sps:$4 sm:$0xff]  }
  0x95   : > { %4139 = vmatprep.subr.bf16.mxu0 %v5583_v53  ;;  %4310 = vmatmul.mubr.bf16.gmra.mrb[44].mxu1 %v5606_v8  ;;  %v5650_v0 = vld [vmem:[%s6703_s22 + $0xe0] ss:$12 sps:$4 sm:$0xff]   ;;  %v5654_v53 = vld [vmem:[%s6703_s22 + $0xf8] ss:$12 sps:$4 sm:$0xff]  }
  0x96   : > { %1965 = vmatpush1.bf16.msra.mxu1 %v6792_v14  ;;  %1984 = vmatprep.mubr.bf16.mxu1 %v5613_v22  ;;  %v5648_v14 = vld [vmem:[%s8891_s1 + $0x154] ss:$12 sps:$4 sm:$0xff]  }
  0x97   : > { %1966 = vmatprep.subr.bf16.mxu1 %v6798_v15  ;;  %v5646_v15 = vld [vmem:[%s8891_s1 + $0x150] ss:$12 sps:$4 sm:$0xff]  }
  0x98   : > { %4140 = vmatpush3.bf16.msra.mxu0 %v5584_v55  ;;  %v5656_v55 = vld [vmem:[%s6703_s22 + $0x128] ss:$12 sps:$4 sm:$0xff]  }
  0x99   : > { %4141 = vmatprep.subr.bf16.mxu0 %v5586_v57  ;;  %v5658_v57 = vld [vmem:[%s6703_s22 + $0x158] ss:$12 sps:$4 sm:$0xff]  }
  0x9a   : > { %1967 = vmatpush1.bf16.msra.mxu1 %v6804_v16  ;;  %v5653_v16 = vld [vmem:[%s8891_s1 + $0x16c] ss:$12 sps:$4 sm:$0xff]  }
  0x9b   : > { %968 = vmatmul.mubr.bf16.gmra.mrb[4].mxu0 %v5582_v54  ;;  %1968 = vmatprep.subr.bf16.mxu1 %v6810_v17  ;;  %v5611_v17 = vld [vmem:[%s6703_s22 + $0xc0] ss:$12 sps:$4 sm:$0xff]   ;;  %v5655_v54 = vld [vmem:[%s6703_s22 + $0x110] ss:$12 sps:$4 sm:$0xff]  }
  0x9c   : > { %977 = vmatprep.mubr.bf16.mxu0 %v6651_v51  ;;  %4142 = vmatpush3.bf16.msra.mxu0 %v5587_v58  ;;  %v5659_v58 = vld [vmem:[%s6703_s22 + $0x170] ss:$12 sps:$4 sm:$0xff]  }
  0x9d   : > { %4143 = vmatprep.subr.bf16.mxu0 %v5589_v59 }
  0x9e   : > { %1969 = vmatpush1.bf16.msra.mxu1 %v6816_v18  ;;  %v5651_v18 = vld [vmem:[%s8891_s1 + $0x168] ss:$12 sps:$4 sm:$0xff]  }
  0x9f   : > { %1970 = vmatprep.subr.bf16.mxu1 %v6822_v19  ;;  %v5615_v19 = vld [vmem:[%s6703_s22 + $0xdc] ss:$12 sps:$4 sm:$0xff]  }
  0xa0   : > { %4144 = vmatpush3.bf16.msra.mxu0 %v5590_v60 }
  0xa1   : > { %4145 = vmatprep.subr.bf16.mxu0 %v5593_v2 }
  0xa2   : > { %1971 = vmatpush1.bf16.msra.mxu1 %v6827_v20  ;;  %v5618_v20 = vld [vmem:[%s8891_s1 + $0x1a0] ss:$12 sps:$4 sm:$0xff]  }
  0xa3   : > { %978 = vmatmul.mubr.bf16.gmra.mrb[8].mxu0 %v5585_v56  ;;  %1972 = vmatprep.subr.bf16.mxu1 %v6832_v21  ;;  %v5662_v21 = vld [vmem:[%s8891_s1 + $0x184] ss:$12 sps:$4 sm:$0xff]   ;;  %v5657_v56 = vld [vmem:[%s6703_s22 + $0x140] ss:$12 sps:$4 sm:$0xff]  }
  0xa4   : > { %987 = vmatprep.mubr.bf16.mxu0 %v6651_v51  ;;  %4146 = vmatpush3.bf16.msra.mxu0 %v5594_v3 }
  0xa5   : > { %4147 = vmatprep.subr.bf16.mxu0 %v5598_v62 }
  0xa6   : > { %1973 = vmatpush1.bf16.msra.mxu1 %v6852_v26  ;;  %v5660_v26 = vld [vmem:[%s8891_s1 + $0x180] ss:$12 sps:$4 sm:$0xff]  }
  0xa7   : > { %1974 = vmatprep.subr.bf16.mxu1 %v6858_v27  ;;  %v5665_v27 = vld [vmem:[%s8891_s1 + $0x19c] ss:$12 sps:$4 sm:$0xff]  }
  0xa8   : > { %4148 = vmatpush3.bf16.msra.mxu0 %v5599_v5 }
  0xa9   : > { %4149 = vmatprep.subr.bf16.mxu0 %v5603_v6 }
  0xaa   : > { %1975 = vmatpush1.bf16.msra.mxu1 %v6863_v28  ;;  %v5622_v28 = vld [vmem:[%s8891_s1 + $0x1b8] ss:$12 sps:$4 sm:$0xff]  }
  0xab   : > { %988 = vmatmul.mubr.bf16.gmra.mrb[12].mxu0 %v5588_v1  ;;  %1976 = vmatprep.subr.bf16.mxu1 %v6868_v29  ;;  %v5617_v29 = vld [vmem:[%s6703_s22 + $0xd8] ss:$12 sps:$4 sm:$0xff]  }
  0xac   : > { %997 = vmatprep.mubr.bf16.mxu0 %v6651_v51  ;;  %4150 = vmatpush3.bf16.msra.mxu0 %v5604_v7 }
  0xad   : > { %4151 = vmatprep.subr.bf16.mxu0 %v5608_v13 }
  0xae   : > { %1977 = vmatpush1.bf16.msra.mxu1 %v6888_v34  ;;  %v5663_v34 = vld [vmem:[%s8891_s1 + $0x198] ss:$12 sps:$4 sm:$0xff]  }
  0xaf   : > { %1978 = vmatprep.subr.bf16.mxu1 %v5645_v11 }
  0xb0   : > { %4152 = vmatpush3.bf16.msra.mxu0 %v5609_v9 }
  0xb1   : > { %4313 = vmatprep.subr.bf16.mxu0 %v5614_v10 }
  0xb2   : > { %1979 = vmatpush1.bf16.msra.mxu1 %v5643_v12 }
  0xb3   : > { %998 = vmatmul.mubr.bf16.gmra.mrb[16].mxu0 %v5591_v61  ;;  %1980 = vmatprep.subr.bf16.mxu1 %v5648_v14 }
  0xb4   : > { %1007 = vmatprep.mubr.bf16.mxu0 %v6651_v51 }
  0xb6   : > { %1981 = vmatpush1.bf16.msra.mxu1 %v5646_v15 }
  0xb7   : > { %1982 = vmatprep.subr.bf16.mxu1 %v5653_v16 }
  0xba   : > { %1983 = vmatpush1.bf16.msra.mxu1 %v5651_v18 }
  0xbb   : > { %1008 = vmatmul.mubr.bf16.gmra.mrb[20].mxu0 %v5596_v4  ;;  %2065 = vmatprep.subr.bf16.mxu1 %v5662_v21 }
  0xbc   : > { %1017 = vmatprep.mubr.bf16.mxu0 %v6651_v51 }
  0xbd   : > { %1985 = vmatmul.mubr.bf16.vlgmr.msra.gmra.mrb[48].mxu1 %v5611_v17 }
  0xbe   : > { %1994 = vmatprep.mubr.bf16.mxu1 %v5615_v19  ;;  %2066 = vmatpush1.bf16.msra.mxu1 %v5660_v26 }
  0xbf   : > { %2067 = vmatprep.subr.bf16.mxu1 %v5665_v27 }
  0xc2   : > { %2068 = vmatpush1.bf16.msra.mxu1 %v5663_v34 }
  0xc3   : > { %1018 = vmatmul.mubr.bf16.gmra.mrb[24].mxu0 %v5601_v63  ;;  %2069 = vmatprep.subr.bf16.mxu1 %v5668_v30 }
  0xc4   : > { %1027 = vmatprep.mubr.bf16.mxu0 %v6651_v51 }
  0xc5   : > { %1995 = vmatmul.mubr.bf16.gmra.mrb[52].mxu1 %v5617_v29 }
  0xc6   : > { %2004 = vmatprep.mubr.bf16.mxu1 %v5619_v23  ;;  %2070 = vmatpush1.bf16.msra.mxu1 %v5666_v32 }
  0xc7   : > { %2071 = vmatprep.subr.bf16.mxu1 %v5671_v35 }
  0xca   : > { %2072 = vmatpush1.bf16.msra.mxu1 %v5669_v41 }
  0xcb   : > { %1028 = vmatmul.mubr.bf16.gmra.mrb[28].mxu0 %v5606_v8  ;;  %2073 = vmatprep.subr.bf16.mxu1 %v5674_v44 }
  0xcc   : > { %2210 = vmatprep.mubr.bf16.mxu0 %v5613_v22 }
  0xcd   : > { %2005 = vmatmul.mubr.bf16.gmra.mrb[56].mxu1 %v5621_v39 }
  0xce   : > { %2014 = vmatprep.mubr.bf16.mxu1 %v5623_v42  ;;  %2074 = vmatpush1.bf16.msra.mxu1 %v5672_v45 }
  0xcf   : > { %2075 = vmatprep.subr.bf16.mxu1 %v6982_v25  ;;  %v5631_v25 = vld [vmem:[%s6703_s22 + $0x13c] ss:$12 sps:$4 sm:$0xff]  }
  0xd2   : > { %2076 = vmatpush1.bf16.msra.mxu1 %v6990_v31  ;;  %v5633_v31 = vld [vmem:[%s6703_s22 + $0x138] ss:$12 sps:$4 sm:$0xff]  }
  0xd3   : > { %2211 = vmatmul.mubr.bf16.vlgmr.msra.gmra.mrb[32].mxu0 %v5611_v17  ;;  %2077 = vmatprep.subr.bf16.mxu1 %v6997_v33  ;;  %v5635_v33 = vld [vmem:[%s6703_s22 + $0x154] ss:$12 sps:$4 sm:$0xff]  }
  0xd4   : > { %4314 = vmatpush3.bf16.msra.mxu0 %v5614_v10  ;;  %2218 = vmatprep.mubr.bf16.mxu0 %v5615_v19 }
  0xd5   : > { %4315 = vmatprep.subr.bf16.mxu0 %v5618_v20  ;;  %2015 = vmatmul.mubr.bf16.gmra.mrb[60].mxu1 %v5625_v47 }
  0xd6   : > { %2024 = vmatprep.mubr.bf16.mxu1 %v5627_v48  ;;  %2078 = vmatpush1.bf16.msra.mxu1 %v7007_v37  ;;  %v5637_v37 = vld [vmem:[%s6703_s22 + $0x150] ss:$12 sps:$4 sm:$0xff]  }
  0xd7   : > { %2079 = vmatprep.subr.bf16.mxu1 %v7013_v38  ;;  %v5641_v38 = vld [vmem:[%s6703_s22 + $0x168] ss:$12 sps:$4 sm:$0xff]  }
  0xd8   : > { %4316 = vmatpush3.bf16.msra.mxu0 %v5618_v20 }
  0xd9   : > { %4317 = vmatprep.subr.bf16.mxu0 %v5622_v28 }
  0xda   : > { %2080 = vmatpush1.bf16.msra.mxu1 %v7022_v40  ;;  %v5649_v40 = vld [vmem:[%s6703_s22 + $0xc8] ss:$12 sps:$4 sm:$0xff]  }
  0xdb   : > { %2219 = vmatmul.mubr.bf16.gmra.mrb[36].mxu0 %v5617_v29 }
  0xdc   : > { %2226 = vmatprep.mubr.bf16.mxu0 %v5619_v23  ;;  %4318 = vmatpush3.bf16.msra.mxu0 %v5622_v28 }
  0xdd   : > { %4319 = vmatprep.subr.bf16.mxu0 %v5626_v24  ;;  %2025 = vmatmul.mubr.bf16.gmra.mrb[64].mxu1 %v5629_v50 }
  0xde   : > { %2034 = vmatprep.mubr.bf16.mxu1 %v5631_v25 }
  0xe0   : > { %4320 = vmatpush3.bf16.msra.mxu0 %v5626_v24 }
  0xe1   : > { %4321 = vmatprep.subr.bf16.mxu0 %v5630_v36 }
  0xe3   : > { %2227 = vmatmul.mubr.bf16.gmra.mrb[40].mxu0 %v5621_v39 }
  0xe4   : > { %2234 = vmatprep.mubr.bf16.mxu0 %v5623_v42  ;;  %4322 = vmatpush3.bf16.msra.mxu0 %v5630_v36 }
  0xe5   : > { %4323 = vmatprep.subr.bf16.mxu0 %v5634_v43  ;;  %2035 = vmatmul.mubr.bf16.gmra.mrb[68].mxu1 %v5633_v31 }
  0xe6   : > { %2044 = vmatprep.mubr.bf16.mxu1 %v5635_v33 }
  0xe8   : > { %4324 = vmatpush3.bf16.msra.mxu0 %v5634_v43 }
  0xe9   : > { %4325 = vmatprep.subr.bf16.mxu0 %v5638_v46 }
  0xeb   : > { %2235 = vmatmul.mubr.bf16.gmra.mrb[44].mxu0 %v5625_v47 }
  0xec   : > { %2242 = vmatprep.mubr.bf16.mxu0 %v5627_v48  ;;  %4326 = vmatpush3.bf16.msra.mxu0 %v5638_v46 }
  0xed   : > { %4327 = vmatprep.subr.bf16.mxu0 %v5642_v49  ;;  %2045 = vmatmul.mubr.bf16.gmra.mrb[72].mxu1 %v5637_v37 }
  0xee   : > { %2054 = vmatprep.mubr.bf16.mxu1 %v5639_v52 }
  0xf0   : > { %4328 = vmatpush3.bf16.msra.mxu0 %v5642_v49 }
  0xf3   : > { %2243 = vmatmul.mubr.bf16.gmra.mrb[48].mxu0 %v5629_v50 }
  0xf4   : > { %2250 = vmatprep.mubr.bf16.mxu0 %v5631_v25 }
  0xf5   : > { %2055 = vmatmul.mubr.bf16.gmra.mrb[76].mxu1 %v5641_v38 }
  0xf6   : > { %2097 = vmatprep.mubr.bf16.mxu1 %v6651_v51 }
  0xfb   : > { %2251 = vmatmul.mubr.bf16.gmra.mrb[52].mxu0 %v5633_v31 }
  0xfc   : > { %2258 = vmatprep.mubr.bf16.mxu0 %v5635_v33 }
  0xfd   : > { %2098 = vmatmul.mubr.bf16.vlgmr.msra.gmra.mrb[48].mxu1 %v5649_v40 }
  0xfe   : > { %2107 = vmatprep.mubr.bf16.mxu1 %v6651_v51 }
 0x103   : > { %2259 = vmatmul.mubr.bf16.gmra.mrb[56].mxu0 %v5637_v37 }
 0x104   : > { %2266 = vmatprep.mubr.bf16.mxu0 %v5639_v52 }
 0x105   : > { %2108 = vmatmul.mubr.bf16.gmra.mrb[52].mxu1 %v5650_v0 }
 0x106   : > { %2117 = vmatprep.mubr.bf16.mxu1 %v6651_v51 }
 0x10b   : > { %2267 = vmatmul.mubr.bf16.gmra.mrb[60].mxu0 %v5641_v38 }
 0x10c   : > { %4329 = vmatprep.mubr.bf16.mxu0 %v5649_v40 }
 0x10d   : > { %2118 = vmatmul.mubr.bf16.gmra.mrb[56].mxu1 %v5654_v53 }
 0x10e   : > { %2127 = vmatprep.mubr.bf16.mxu1 %v6651_v51 }
 0x10f   : > { %v4073_v59 = vpop.f32.mrb[0].mxu1 }
 0x110   : > { %v4074_v1 = vpop.f32.mrb[1].mxu1 }
 0x111   : > { %v7235_v60 = vadd.f32 %v4074_v1, %v4073_v59  ;;  %v4076_v61 = vpop.f32.mrb[2].mxu1 }
 0x112   : > { %v4077_v2 = vpop.f32.mrb[3].mxu1 }
 0x113   : > { %4330 = vmatmul.mubr.bf16.vlgmr.msra.gmra.mrb[64].mxu0 %v5650_v0  ;;  %v7237_v3 = vadd.f32 %v4077_v2, %v4076_v61 }
 0x114   : > { %4333 = vmatprep.mubr.bf16.mxu0 %v5654_v53 }
 0x115   : > { %2128 = vmatmul.mubr.bf16.gmra.mrb[60].mxu1 %v5655_v54 }
 0x116   : > { %2137 = vmatprep.mubr.bf16.mxu1 %v6651_v51 }
 0x117   : > { %v4079_v62 = vpop.f32.mrb[4].mxu1 }
 0x118   : > { %v4080_v4 = vpop.f32.mrb[5].mxu1 }
 0x119   : > { %v4081_v5 = vadd.f32 %v4080_v4, %v4079_v62  ;;  %v4082_v63 = vpop.f32.mrb[6].mxu1 }
 0x11a   : > { %v4083_v6 = vpop.f32.mrb[7].mxu1 }
 0x11b   : > { %4334 = vmatmul.mubr.bf16.gmra.mrb[68].mxu0 %v5655_v54  ;;  %v4084_v7 = vadd.f32 %v4083_v6, %v4082_v63 }
 0x11c   : > { %4337 = vmatprep.mubr.bf16.mxu0 %v5656_v55 }
 0x11d   : > { %2138 = vmatmul.mubr.bf16.gmra.mrb[64].mxu1 %v5656_v55 }
 0x11e   : > { %2147 = vmatprep.mubr.bf16.mxu1 %v6651_v51 }
 0x11f   : > { %v4085_v13 = vpop.f32.mrb[8].mxu1 }
 0x120   : > { %v4086_v8 = vpop.f32.mrb[9].mxu1 }
 0x121   : > { %v7241_v9 = vadd.f32 %v4086_v8, %v4085_v13  ;;  %v4088_v22 = vpop.f32.mrb[10].mxu1 }
 0x122   : > { %v4089_v10 = vpop.f32.mrb[11].mxu1 }
 0x123   : > { %4338 = vmatmul.mubr.bf16.gmra.mrb[72].mxu0 %v5657_v56  ;;  %v7243_v11 = vadd.f32 %v4089_v10, %v4088_v22 }
 0x124   : > { %4341 = vmatprep.mubr.bf16.mxu0 %v5658_v57 }
 0x125   : > { %2148 = vmatmul.mubr.bf16.gmra.mrb[68].mxu1 %v5657_v56 }
 0x126   : > { %2157 = vmatprep.mubr.bf16.mxu1 %v6651_v51 }
 0x128   : > { %v4091_v12 = vpop.f32.mrb[12].mxu1 }
 0x129   : > { %v4092_v14 = vpop.f32.mrb[13].mxu1 }
 0x12a   : > { %v4093_v15 = vadd.f32 %v4092_v14, %v4091_v12  ;;  %v4094_v16 = vpop.f32.mrb[14].mxu1 }
 0x12b   : > { %4342 = vmatmul.mubr.bf16.gmra.mrb[76].mxu0 %v5659_v58  ;;  %v4095_v17 = vpop.f32.mrb[15].mxu1 }
 0x12c   : > { %v4096_v18 = vadd.f32 %v4095_v17, %v4094_v16 }
 0x12d   : > { %2158 = vmatmul.mubr.bf16.gmra.mrb[72].mxu1 %v5658_v57 }
 0x12e   : > { %2167 = vmatprep.mubr.bf16.mxu1 %v6651_v51 }
 0x130   : > { %v4097_v19 = vpop.f32.mrb[16].mxu1 }
 0x131   : > { %v4098_v20 = vpop.f32.mrb[17].mxu1 }
 0x132   : > { %v7247_v21 = vadd.f32 %v4098_v20, %v4097_v19  ;;  %v4100_v26 = vpop.f32.mrb[18].mxu1 }
 0x133   : > { %v4101_v27 = vpop.f32.mrb[19].mxu1 }
 0x134   : > { %v7249_v28 = vadd.f32 %v4101_v27, %v4100_v26 }
 0x135   : > { %2168 = vmatmul.mubr.bf16.gmra.mrb[76].mxu1 %v5659_v58 }
 0x138   : > { %v4103_v29 = vpop.f32.mrb[20].mxu1 }
 0x139   : > { %v4104_v34 = vpop.f32.mrb[21].mxu1 }
 0x13a   : > { %v4105_v23 = vadd.f32 %v4104_v34, %v4103_v29  ;;  %v4106_v24 = vpop.f32.mrb[22].mxu1 }
 0x13b   : > { %v4107_v30 = vpop.f32.mrb[23].mxu1 }
 0x13c   : > { %v4108_v32 = vadd.f32 %v4107_v30, %v4106_v24 }
 0x140   : > { %v4109_v35 = vpop.f32.mrb[24].mxu1 }
 0x141   : > { %v4110_v36 = vpop.f32.mrb[25].mxu1 }
 0x142   : > { %v7251_v39 = vadd.f32 %v4110_v36, %v4109_v35  ;;  %v4112_v51 = vpop.f32.mrb[26].mxu1 }
 0x143   : > { %v4113_v41 = vpop.f32.mrb[27].mxu1 }
 0x144   : > { %v7253_v42 = vadd.f32 %v4113_v41, %v4112_v51 }
 0x148   : > { %v4115_v43 = vpop.f32.mrb[28].mxu1 }
 0x149   : > { %v4116_v44 = vpop.f32.mrb[29].mxu1 }
 0x14a   : > { %v4117_v45 = vadd.f32 %v4116_v44, %v4115_v43  ;;  %v4118_v46 = vpop.f32.mrb[30].mxu1 }
 0x14b   : > { %v4119_v47 = vpop.f32.mrb[31].mxu1 }
 0x14c   : > { %v4120_v48 = vadd.f32 %v4119_v47, %v4118_v46 }
 0x150   : > { %v4299_v37 = vpop.f32.mrb[32].mxu1 }
 0x151   : > { %v7255_v38 = vadd.f32 %v4299_v37, %v4081_v5  ;;  %v1169_v40 = vpop.f32.mrb[33].mxu1 }
 0x152   : > { %v7258_v0 = vadd.f32 %v7235_v60, %v1169_v40  ;;  %v4300_v53 = vpop.f32.mrb[34].mxu1 }
 0x153   : > { %v7260_v54 = vadd.f32 %v4300_v53, %v4084_v7  ;;  %v1172_v55 = vpop.f32.mrb[35].mxu1 }
 0x154   : > { %v7263_v56 = vadd.f32 %v7237_v3, %v1172_v55 }
 0x158   : > { %v4303_v2 = vpop.f32.mrb[36].mxu1 }
 0x159   : > { %v7265_v4 = vadd.f32 %v4303_v2, %v4093_v15  ;;  %v1185_v5 = vpop.f32.mrb[37].mxu1 }
 0x15a   : > { %v7268_v60 = vadd.f32 %v7241_v9, %v1185_v5  ;;  %v4304_v63 = vpop.f32.mrb[38].mxu1 }
 0x15b   : > { %v7270_v6 = vadd.f32 %v4304_v63, %v4096_v18  ;;  %v1188_v3 = vpop.f32.mrb[39].mxu1 }
 0x15c   : > { %v7273_v7 = vadd.f32 %v7243_v11, %v1188_v3 }
 0x160   : > { %v4307_v14 = vpop.f32.mrb[40].mxu1 }
 0x161   : > { %v7275_v16 = vadd.f32 %v4307_v14, %v4105_v23  ;;  %v1201_v17 = vpop.f32.mrb[41].mxu1 }
 0x162   : > { %v7278_v9 = vadd.f32 %v7247_v21, %v1201_v17  ;;  %v4308_v18 = vpop.f32.mrb[42].mxu1 }
 0x163   : > { %v7280_v19 = vadd.f32 %v4308_v18, %v4108_v32  ;;  %v1204_v11 = vpop.f32.mrb[43].mxu1 }
 0x164   : > { %v7283_v20 = vadd.f32 %v7249_v28, %v1204_v11 }
 0x166   : > { %v959_v49 = vpop.f32.mrb[0].mxu0 }
 0x167   : > { %v961_v50 = vpop.f32.mrb[1].mxu0 }
 0x168   : > { %v963_v25 = vpop.f32.mrb[2].mxu0  ;;  %v4311_v23 = vpop.f32.mrb[44].mxu1 }
 0x169   : > { %v1232_v31 = vpack.c.bf16 %v963_v25, %v959_v49  ;;  %v965_v33 = vpop.f32.mrb[3].mxu0  ;;  %v7285_v35 = vadd.f32 %v4311_v23, %v4117_v45  ;;  %v1217_v36 = vpop.f32.mrb[45].mxu1 }
 0x16a   : > { %v1233_v52 = vpack.c.bf16 %v965_v33, %v961_v50  ;;  %v7288_v21 = vadd.f32 %v7251_v39, %v1217_v36  ;;  %v4312_v32 = vpop.f32.mrb[46].mxu1 }
 0x16b   : > { %1248 = vst [vmem:[#allocation2] sm:$0xff] %v1232_v31  ;;  %v7290_v51 = vadd.f32 %v4312_v32, %v4120_v48  ;;  %v1220_v28 = vpop.f32.mrb[47].mxu1 }
 0x16c   : > { %1249 = vst [vmem:[#allocation2 + $0x8] sm:$0xff] %v1233_v52  ;;  %v7293_v41 = vadd.f32 %v7253_v42, %v1220_v28 }
 0x16e   : > { %v969_v57 = vpop.f32.mrb[4].mxu0 }
 0x16f   : > { %v971_v58 = vpop.f32.mrb[5].mxu0 }
 0x170   : > { %v973_v59 = vpop.f32.mrb[6].mxu0 }
 0x171   : > { %v1234_v1 = vpack.c.bf16 %v973_v59, %v969_v57  ;;  %v975_v61 = vpop.f32.mrb[7].mxu0 }
 0x172   : > { %v1235_v62 = vpack.c.bf16 %v975_v61, %v971_v58 }
 0x173   : > { %1250 = vst [vmem:[#allocation2 + $0x10] sm:$0xff] %v1234_v1 }
 0x174   : > { %1251 = vst [vmem:[#allocation2 + $0x18] sm:$0xff] %v1235_v62 }
 0x176   : > { %v979_v13 = vpop.f32.mrb[8].mxu0 }
 0x177   : > { %v981_v8 = vpop.f32.mrb[9].mxu0 }
 0x178   : > { %v983_v22 = vpop.f32.mrb[10].mxu0 }
 0x179   : > { %v1236_v10 = vpack.c.bf16 %v983_v22, %v979_v13  ;;  %v985_v12 = vpop.f32.mrb[11].mxu0 }
 0x17a   : > { %v1237_v15 = vpack.c.bf16 %v985_v12, %v981_v8 }
 0x17b   : > { %1252 = vst [vmem:[#allocation2 + $0x20] sm:$0xff] %v1236_v10 }
 0x17c   : > { %1253 = vst [vmem:[#allocation2 + $0x28] sm:$0xff] %v1237_v15 }
 0x17e   : > { %v989_v26 = vpop.f32.mrb[12].mxu0 }
 0x17f   : > { %v991_v27 = vpop.f32.mrb[13].mxu0 }
 0x180   : > { %v993_v29 = vpop.f32.mrb[14].mxu0 }
 0x181   : > { %v1238_v34 = vpack.c.bf16 %v993_v29, %v989_v26  ;;  %v995_v24 = vpop.f32.mrb[15].mxu0 }
 0x182   : > { %v1239_v30 = vpack.c.bf16 %v995_v24, %v991_v27 }
 0x183   : > { %1254 = vst [vmem:[#allocation2 + $0x30] sm:$0xff] %v1238_v34 }
 0x184   : > { %1255 = vst [vmem:[#allocation2 + $0x38] sm:$0xff] %v1239_v30 }
 0x186   : > { %v999_v43 = vpop.f32.mrb[16].mxu0 }
 0x187   : > { %v1001_v44 = vpop.f32.mrb[17].mxu0 }
 0x188   : > { %v1003_v46 = vpop.f32.mrb[18].mxu0 }
 0x189   : > { %v1240_v47 = vpack.c.bf16 %v1003_v46, %v999_v43  ;;  %v1005_v49 = vpop.f32.mrb[19].mxu0 }
 0x18a   : > { %v1241_v45 = vpack.c.bf16 %v1005_v49, %v1001_v44 }
 0x18b   : > { %1256 = vst [vmem:[#allocation2 + $0x40] sm:$0xff] %v1240_v47 }
 0x18c   : > { %1257 = vst [vmem:[#allocation2 + $0x48] sm:$0xff] %v1241_v45 }
 0x18e   : > { %v1009_v50 = vpop.f32.mrb[20].mxu0 }
 0x18f   : > { %v1011_v25 = vpop.f32.mrb[21].mxu0 }
 0x190   : > { %v1013_v39 = vpop.f32.mrb[22].mxu0 }
 0x191   : > { %v1242_v31 = vpack.c.bf16 %v1013_v39, %v1009_v50  ;;  %v1015_v33 = vpop.f32.mrb[23].mxu0 }
 0x192   : > { %v1243_v37 = vpack.c.bf16 %v1015_v33, %v1011_v25 }
 0x193   : > { %1258 = vst [vmem:[#allocation2 + $0x50] sm:$0xff] %v1242_v31 }
 0x194   : > { %1259 = vst [vmem:[#allocation2 + $0x58] sm:$0xff] %v1243_v37 }
 0x196   : > { %v1019_v48 = vpop.f32.mrb[24].mxu0 }
 0x197   : > { %v1021_v52 = vpop.f32.mrb[25].mxu0 }
 0x198   : > { %v1023_v42 = vpop.f32.mrb[26].mxu0 }
 0x199   : > { %v1244_v40 = vpack.c.bf16 %v1023_v42, %v1019_v48  ;;  %v1025_v53 = vpop.f32.mrb[27].mxu0 }
 0x19a   : > { %v1245_v55 = vpack.c.bf16 %v1025_v53, %v1021_v52 }
 0x19b   : > { %1260 = vst [vmem:[#allocation2 + $0x60] sm:$0xff] %v1244_v40 }
 0x19c   : > { %1261 = vst [vmem:[#allocation2 + $0x68] sm:$0xff] %v1245_v55 }
 0x19e   : > { %v1029_v57 = vpop.f32.mrb[28].mxu0 }
 0x19f   : > { %v1031_v58 = vpop.f32.mrb[29].mxu0 }
 0x1a0   : > { %v1033_v59 = vpop.f32.mrb[30].mxu0 }
 0x1a1   : > { %v1246_v1 = vpack.c.bf16 %v1033_v59, %v1029_v57  ;;  %v1035_v61 = vpop.f32.mrb[31].mxu0 }
 0x1a2   : > { %v1247_v2 = vpack.c.bf16 %v1035_v61, %v1031_v58 }
 0x1a3   : > { %1262 = vst [vmem:[#allocation2 + $0x70] sm:$0xff] %v1246_v1 }
 0x1a4   : > { %1263 = vst [vmem:[#allocation2 + $0x78] sm:$0xff] %v1247_v2 }
 0x1a6   : > { %v4153_v62 = vpop.f32.mrb[32].mxu0 }
 0x1a7   : > { %v4154_v5 = vpop.f32.mrb[33].mxu0 }
 0x1a8   : > { %v4155_v63 = vadd.f32 %v4154_v5, %v4153_v62  ;;  %v4156_v3 = vpop.f32.mrb[34].mxu0 }
 0x1a9   : > { %v4157_v13 = vpop.f32.mrb[35].mxu0 }
 0x1aa   : > { %v4158_v8 = vadd.f32 %v4157_v13, %v4156_v3 }
 0x1ae   : > { %v4159_v22 = vpop.f32.mrb[36].mxu0 }
 0x1af   : > { %v4160_v10 = vpop.f32.mrb[37].mxu0 }
 0x1b0   : > { %v4161_v12 = vadd.f32 %v4160_v10, %v4159_v22  ;;  %v4162_v14 = vpop.f32.mrb[38].mxu0 }
 0x1b1   : > { %v4163_v15 = vpop.f32.mrb[39].mxu0 }
 0x1b2   : > { %v4164_v17 = vadd.f32 %v4163_v15, %v4162_v14 }
 0x1b6   : > { %v4165_v18 = vpop.f32.mrb[40].mxu0 }
 0x1b7   : > { %v4166_v11 = vpop.f32.mrb[41].mxu0 }
 0x1b8   : > { %v4167_v26 = vadd.f32 %v4166_v11, %v4165_v18  ;;  %v4168_v27 = vpop.f32.mrb[42].mxu0 }
 0x1b9   : > { %v4169_v29 = vpop.f32.mrb[43].mxu0 }
 0x1ba   : > { %v4170_v34 = vadd.f32 %v4169_v29, %v4168_v27 }
 0x1be   : > { %v4171_v24 = vpop.f32.mrb[44].mxu0 }
 0x1bf   : > { %v4172_v23 = vpop.f32.mrb[45].mxu0 }
 0x1c0   : > { %v4173_v30 = vadd.f32 %v4172_v23, %v4171_v24  ;;  %v4174_v36 = vpop.f32.mrb[46].mxu0 }
 0x1c1   : > { %v4175_v32 = vpop.f32.mrb[47].mxu0 }
 0x1c2   : > { %v4176_v28 = vadd.f32 %v4175_v32, %v4174_v36 }
 0x1c6   : > { %v4177_v43 = vpop.f32.mrb[48].mxu0 }
 0x1c7   : > { %v4178_v44 = vpop.f32.mrb[49].mxu0 }
 0x1c8   : > { %v7295_v46 = vadd.f32 %v4178_v44, %v4177_v43  ;;  %v4180_v47 = vpop.f32.mrb[50].mxu0 }
 0x1c9   : > { %v4181_v49 = vpop.f32.mrb[51].mxu0 }
 0x1ca   : > { %v7297_v45 = vadd.f32 %v4181_v49, %v4180_v47 }
 0x1ce   : > { %v4183_v50 = vpop.f32.mrb[52].mxu0 }
 0x1cf   : > { %v4184_v25 = vpop.f32.mrb[53].mxu0 }
 0x1d0   : > { %v4185_v39 = vadd.f32 %v4184_v25, %v4183_v50  ;;  %v4186_v31 = vpop.f32.mrb[54].mxu0  ;;  %v2099_v18 = vpop.f32.mrb[48].mxu1 }
 0x1d1   : > { %v4187_v33 = vpop.f32.mrb[55].mxu0  ;;  %v2101_v29 = vpop.f32.mrb[49].mxu1 }
 0x1d2   : > { %v4188_v37 = vadd.f32 %v4187_v33, %v4186_v31  ;;  %v2103_v23 = vpop.f32.mrb[50].mxu1 }
 0x1d3   : > { %v2372_v32 = vpack.c.bf16 %v2103_v23, %v2099_v18 }
 0x1d5   : > { %2388 = vst [vmem:[#allocation2 + $0x80] sm:$0xff] %v2372_v32 }
 0x1d6   : > { %v4189_v48 = vpop.f32.mrb[56].mxu0 }
 0x1d7   : > { %v4190_v52 = vpop.f32.mrb[57].mxu0 }
 0x1d8   : > { %v7299_v42 = vadd.f32 %v4190_v52, %v4189_v48  ;;  %v4192_v40 = vpop.f32.mrb[58].mxu0 }
 0x1d9   : > { %v4193_v53 = vpop.f32.mrb[59].mxu0 }
 0x1da   : > { %v7301_v55 = vadd.f32 %v4193_v53, %v4192_v40 }
 0x1de   : > { %v4195_v57 = vpop.f32.mrb[60].mxu0 }
 0x1df   : > { %v4196_v58 = vpop.f32.mrb[61].mxu0 }
 0x1e0   : > { %v7303_v59 = vadd.f32 %v4196_v58, %v4195_v57  ;;  %v4198_v1 = vpop.f32.mrb[62].mxu0 }
 0x1e1   : > { %v4199_v61 = vpop.f32.mrb[63].mxu0 }
 0x1e2   : > { %v7305_v2 = vadd.f32 %v4199_v61, %v4198_v1 }
 0x1e6   : > { %v4331_v62 = vpop.f32.mrb[64].mxu0 }
 0x1e7   : > { %v2318_v5 = vadd.f32 %v4331_v62, %v4161_v12  ;;  %v2309_v3 = vpop.f32.mrb[65].mxu0  ;;  %v2105_v12 = vpop.f32.mrb[51].mxu1 }
 0x1e8   : > { %v2310_v13 = vadd.f32 %v4155_v63, %v2309_v3  ;;  %v4332_v22 = vpop.f32.mrb[66].mxu0  ;;  %v2373_v43 = vpack.c.bf16 %v2105_v12, %v2101_v29 }
 0x1e9   : > { %v2321_v10 = vadd.f32 %v4332_v22, %v4164_v17  ;;  %v2312_v14 = vpop.f32.mrb[67].mxu0  ;;  %v5359_v15 = vpack.i.bf16 %v2318_v5, %v7255_v38 }
 0x1ea   : > { %v2313_v11 = vadd.f32 %v4158_v8, %v2312_v14  ;;  %v5355_v27 = vpack.i.bf16 %v2310_v13, %v7258_v0  ;;  %2389 = vst [vmem:[#allocation2 + $0x88] sm:$0xff] %v2373_v43 }
 0x1eb   : > { %v5361_v24 = vpack.i.bf16 %v2321_v10, %v7260_v54  ;;  %v2109_v54 = vpop.f32.mrb[52].mxu1 }
 0x1ec   : > { %5356 = vxpose.xlu0.b32.start [1/16] %v5355_v27, 128  ;;  %v5357_v36 = vpack.i.bf16 %v2313_v11, %v7263_v56  ;;  %v2111_v56 = vpop.f32.mrb[53].mxu1 }
 0x1ed   : > { %v2113_v33 = vpop.f32.mrb[54].mxu1 }
 0x1ee   : > { %v4335_v63 = vpop.f32.mrb[68].mxu0  ;;  %v2374_v48 = vpack.c.bf16 %v2113_v33, %v2109_v54  ;;  %v2115_v52 = vpop.f32.mrb[55].mxu1 }
 0x1ef   : > { %v2334_v17 = vadd.f32 %v4335_v63, %v4173_v30  ;;  %v2325_v44 = vpop.f32.mrb[69].mxu0  ;;  %v2119_v58 = vpop.f32.mrb[56].mxu1 }
 0x1f0   : > { %v2326_v38 = vadd.f32 %v4167_v26, %v2325_v44  ;;  %v4336_v47 = vpop.f32.mrb[70].mxu0  ;;  %5358 = vxpose.xlu0.b32.cont [2/16] %v5357_v36, 128  ;;  %v2375_v26 = vpack.c.bf16 %v2115_v52, %v2111_v56  ;;  %2390 = vst [vmem:[#allocation2 + $0x90] sm:$0xff] %v2374_v48  ;;  %v2121_v61 = vpop.f32.mrb[57].mxu1 }
 0x1f1   : > { %v2337_v8 = vadd.f32 %v4336_v47, %v4176_v28  ;;  %v2328_v0 = vpop.f32.mrb[71].mxu0  ;;  %v5367_v49 = vpack.i.bf16 %v2334_v17, %v7265_v4  ;;  %v2123_v5 = vpop.f32.mrb[58].mxu1 }
 0x1f2   : > { %v2329_v50 = vadd.f32 %v4170_v34, %v2328_v0  ;;  %v5363_v25 = vpack.i.bf16 %v2326_v38, %v7268_v60  ;;  %2391 = vst [vmem:[#allocation2 + $0x98] sm:$0xff] %v2375_v26  ;;  %v2376_v3 = vpack.c.bf16 %v2123_v5, %v2119_v58 }
 0x1f3   : > { %v5369_v31 = vpack.i.bf16 %v2337_v8, %v7270_v6 }
 0x1f4   : > { %5360 = vxpose.xlu0.b32.cont [3/16] %v5359_v15, 128  ;;  %v5365_v30 = vpack.i.bf16 %v2329_v50, %v7273_v7  ;;  %2392 = vst [vmem:[#allocation2 + $0xa0] sm:$0xff] %v2376_v3 }
 0x1f6   : > { %v4339_v40 = vpop.f32.mrb[72].mxu0 }
 0x1f7   : > { %v2350_v28 = vadd.f32 %v4339_v40, %v4185_v39  ;;  %v2341_v53 = vpop.f32.mrb[73].mxu0 }
 0x1f8   : > { %v2342_v4 = vadd.f32 %v7295_v46, %v2341_v53  ;;  %v4340_v34 = vpop.f32.mrb[74].mxu0  ;;  %5362 = vxpose.xlu0.b32.cont [4/16] %v5361_v24, 128  ;;  %v2125_v46 = vpop.f32.mrb[59].mxu1 }
 0x1f9   : > { %v2353_v60 = vadd.f32 %v4340_v34, %v4188_v37  ;;  %v2344_v57 = vpop.f32.mrb[75].mxu0  ;;  %v5375_v6 = vpack.i.bf16 %v2350_v28, %v7275_v16  ;;  %v2377_v13 = vpack.c.bf16 %v2125_v46, %v2121_v61  ;;  %v2129_v15 = vpop.f32.mrb[60].mxu1 }
 0x1fa   : > { %v2345_v1 = vadd.f32 %v7297_v45, %v2344_v57  ;;  %v5371_v7 = vpack.i.bf16 %v2342_v4, %v7278_v9  ;;  %v2131_v11 = vpop.f32.mrb[61].mxu1 }
 0x1fb   : > { %v5377_v62 = vpack.i.bf16 %v2353_v60, %v7280_v19  ;;  %2393 = vst [vmem:[#allocation2 + $0xa8] sm:$0xff] %v2377_v13 }
 0x1fc   : > { %5364 = vxpose.xlu0.b32.cont [5/16] %v5363_v25, 128  ;;  %v5373_v39 = vpack.i.bf16 %v2345_v1, %v7283_v20 }
 0x1fe   : > { %v4343_v22 = vpop.f32.mrb[76].mxu0 }
 0x1ff   : > { %v2366_v37 = vadd.f32 %v4343_v22, %v7303_v59  ;;  %v2357_v16 = vpop.f32.mrb[77].mxu0  ;;  %v2133_v59 = vpop.f32.mrb[62].mxu1 }
 0x200   : > { %v2358_v45 = vadd.f32 %v7299_v42, %v2357_v16  ;;  %v4344_v10 = vpop.f32.mrb[78].mxu0  ;;  %5366 = vxpose.xlu0.b32.cont [6/16] %v5365_v30, 128  ;;  %v2378_v42 = vpack.c.bf16 %v2133_v59, %v2129_v15  ;;  %v2135_v24 = vpop.f32.mrb[63].mxu1 }
 0x201   : > { %v2369_v9 = vadd.f32 %v4344_v10, %v7305_v2  ;;  %v2360_v19 = vpop.f32.mrb[79].mxu0  ;;  %v5383_v14 = vpack.i.bf16 %v2366_v37, %v7285_v35  ;;  %v2379_v23 = vpack.c.bf16 %v2135_v24, %v2131_v11  ;;  %v2139_v2 = vpop.f32.mrb[64].mxu1 }
 0x202   : > { %v2361_v20 = vadd.f32 %v7301_v55, %v2360_v19  ;;  %v5379_v18 = vpack.i.bf16 %v2358_v45, %v7288_v21  ;;  %2394 = vst [vmem:[#allocation2 + $0xb0] sm:$0xff] %v2378_v42  ;;  %v2141_v35 = vpop.f32.mrb[65].mxu1 }
 0x203   : > { %v5385_v27 = vpack.i.bf16 %v2369_v9, %v7290_v51  ;;  %2395 = vst [vmem:[#allocation2 + $0xb8] sm:$0xff] %v2379_v23  ;;  %v2143_v36 = vpop.f32.mrb[66].mxu1 }
 0x204   : > { %5368 = vxpose.xlu0.b32.cont [7/16] %v5367_v49, 128  ;;  %v5381_v29 = vpack.i.bf16 %v2361_v20, %v7293_v41  ;;  %v2380_v55 = vpack.c.bf16 %v2143_v36, %v2139_v2  ;;  %v2145_v32 = vpop.f32.mrb[67].mxu1 }
 0x205   : > { %v2381_v21 = vpack.c.bf16 %v2145_v32, %v2141_v35  ;;  %v2149_v51 = vpop.f32.mrb[68].mxu1 }
 0x206   : > { %2396 = vst [vmem:[#allocation2 + $0xc0] sm:$0xff] %v2380_v55  ;;  %v2151_v12 = vpop.f32.mrb[69].mxu1 }
 0x207   : > { %2397 = vst [vmem:[#allocation2 + $0xc8] sm:$0xff] %v2381_v21  ;;  %v2153_v43 = vpop.f32.mrb[70].mxu1 }
 0x208   : > { %5370 = vxpose.xlu0.b32.cont [8/16] %v5369_v31, 128  ;;  %v2382_v41 = vpack.c.bf16 %v2153_v43, %v2149_v51  ;;  %v2155_v63 = vpop.f32.mrb[71].mxu1 }
 0x209   : > { %v2383_v17 = vpack.c.bf16 %v2155_v63, %v2151_v12  ;;  %v2159_v44 = vpop.f32.mrb[72].mxu1 }
 0x20a   : > { %2398 = vst [vmem:[#allocation2 + $0xd0] sm:$0xff] %v2382_v41  ;;  %v2161_v38 = vpop.f32.mrb[73].mxu1 }
 0x20b   : > { %2399 = vst [vmem:[#allocation2 + $0xd8] sm:$0xff] %v2383_v17  ;;  %v2163_v47 = vpop.f32.mrb[74].mxu1 }
 0x20c   : > { %5372 = vxpose.xlu0.b32.cont [9/16] %v5371_v7, 128  ;;  %v2384_v8 = vpack.c.bf16 %v2163_v47, %v2159_v44  ;;  %v2165_v0 = vpop.f32.mrb[75].mxu1 }
 0x20d   : > { %v2385_v49 = vpack.c.bf16 %v2165_v0, %v2161_v38  ;;  %v2169_v54 = vpop.f32.mrb[76].mxu1 }
 0x20e   : > { %2400 = vst [vmem:[#allocation2 + $0xe0] sm:$0xff] %v2384_v8  ;;  %v2171_v50 = vpop.f32.mrb[77].mxu1 }
 0x20f   : > { %2401 = vst [vmem:[#allocation2 + $0xe8] sm:$0xff] %v2385_v49  ;;  %v2173_v25 = vpop.f32.mrb[78].mxu1 }
 0x210   : > { %5374 = vxpose.xlu0.b32.cont [10/16] %v5373_v39, 128  ;;  %v2386_v56 = vpack.c.bf16 %v2173_v25, %v2169_v54  ;;  %v2175_v31 = vpop.f32.mrb[79].mxu1 }
 0x211   : > { %v2387_v33 = vpack.c.bf16 %v2175_v31, %v2171_v50 }
 0x212   : > { %2402 = vst [vmem:[#allocation2 + $0xf0] sm:$0xff] %v2386_v56 }
 0x213   : > { %2403 = vst [vmem:[#allocation2 + $0xf8] sm:$0xff] %v2387_v33 }
 0x214   : > { %5376 = vxpose.xlu0.b32.cont [11/16] %v5375_v6, 128 }
 0x218   : > { %5378 = vxpose.xlu0.b32.cont [12/16] %v5377_v62, 128 }
 0x21c   : > { %5380 = vxpose.xlu0.b32.cont [13/16] %v5379_v18, 128 }
 0x220   : > { %5382 = vxpose.xlu0.b32.cont [14/16] %v5381_v29, 128 }
 0x224   : > { %5384 = vxpose.xlu0.b32.cont [15/16] %v5383_v14, 128 }
 0x228   : > { %5386 = vxpose.xlu0.b32.end [16/16] %v5385_v27, 128 }
 0x26c   : > { %v5387_v30 = vpop.trf.xlu0 }
 0x26d   : > { %v5391_v48 = vunpack.i.h.bf16 %v5387_v30  ;;  %v5388_v52 = vunpack.i.l.bf16 %v5387_v30 }
 0x270   : > { %v5392_v26 = vpop.trf.xlu0 }
 0x271   : > { %v5396_v40 = vunpack.i.h.bf16 %v5392_v26  ;;  %v5393_v28 = vunpack.i.l.bf16 %v5392_v26 }
 0x273   : > { %v1296_v53 = vpack.c.bf16 %v5393_v28, %v5388_v52  ;;  %v2436_v4 = vpack.c.bf16 %v5396_v40, %v5391_v48 }
 0x274   : > { %v5397_v34 = vpop.trf.xlu0 }
 0x275   : > { %1304 = vst [vmem:[#allocation3] sm:$0xff] %v1296_v53  ;;  %2445 = vst [vmem:[#allocation3 + $0x40] sm:$0xff] %v2436_v4  ;;  %v5401_v60 = vunpack.i.h.bf16 %v5397_v34  ;;  %v5398_v57 = vunpack.i.l.bf16 %v5397_v34 }
 0x278   : > { %v5402_v6 = vpop.trf.xlu0 }
 0x279   : > { %v5406_v58 = vunpack.i.h.bf16 %v5402_v6  ;;  %v5403_v1 = vunpack.i.l.bf16 %v5402_v6 }
 0x27b   : > { %v1297_v7 = vpack.c.bf16 %v5403_v1, %v5398_v57  ;;  %v2437_v61 = vpack.c.bf16 %v5406_v58, %v5401_v60 }
 0x27c   : > { %v5407_v62 = vpop.trf.xlu0 }
 0x27d   : > { %1305 = vst [vmem:[#allocation3 + $0x8] sm:$0xff] %v1297_v7  ;;  %2446 = vst [vmem:[#allocation3 + $0x48] sm:$0xff] %v2437_v61  ;;  %v5411_v5 = vunpack.i.h.bf16 %v5407_v62  ;;  %v5408_v39 = vunpack.i.l.bf16 %v5407_v62 }
 0x280   : > { %v5412_v3 = vpop.trf.xlu0 }
 0x281   : > { %v5416_v46 = vunpack.i.h.bf16 %v5412_v3  ;;  %v5413_v13 = vunpack.i.l.bf16 %v5412_v3 }
 0x283   : > { %v1298_v22 = vpack.c.bf16 %v5413_v13, %v5408_v39  ;;  %v2438_v37 = vpack.c.bf16 %v5416_v46, %v5411_v5 }
 0x284   : > { %v5417_v16 = vpop.trf.xlu0 }
 0x285   : > { %1306 = vst [vmem:[#allocation3 + $0x10] sm:$0xff] %v1298_v22  ;;  %2447 = vst [vmem:[#allocation3 + $0x50] sm:$0xff] %v2438_v37  ;;  %v5421_v45 = vunpack.i.h.bf16 %v5417_v16  ;;  %v5418_v10 = vunpack.i.l.bf16 %v5417_v16 }
 0x288   : > { %v5422_v9 = vpop.trf.xlu0 }
 0x289   : > { %v5426_v19 = vunpack.i.h.bf16 %v5422_v9  ;;  %v5423_v14 = vunpack.i.l.bf16 %v5422_v9 }
 0x28b   : > { %v1299_v15 = vpack.c.bf16 %v5423_v14, %v5418_v10  ;;  %v2439_v20 = vpack.c.bf16 %v5426_v19, %v5421_v45 }
 0x28c   : > { %v5427_v18 = vpop.trf.xlu0 }
 0x28d   : > { %1307 = vst [vmem:[#allocation3 + $0x18] sm:$0xff] %v1299_v15  ;;  %2448 = vst [vmem:[#allocation3 + $0x58] sm:$0xff] %v2439_v20  ;;  %v5431_v11 = vunpack.i.h.bf16 %v5427_v18  ;;  %v5428_v27 = vunpack.i.l.bf16 %v5427_v18 }
 0x290   : > { %v5432_v59 = vpop.trf.xlu0 }
 0x291   : > { %v5436_v29 = vunpack.i.h.bf16 %v5432_v59  ;;  %v5433_v42 = vunpack.i.l.bf16 %v5432_v59 }
 0x293   : > { %v1300_v24 = vpack.c.bf16 %v5433_v42, %v5428_v27  ;;  %v2440_v23 = vpack.c.bf16 %v5436_v29, %v5431_v11 }
 0x294   : > { %v5437_v2 = vpop.trf.xlu0 }
 0x295   : > { %1308 = vst [vmem:[#allocation3 + $0x20] sm:$0xff] %v1300_v24  ;;  %2449 = vst [vmem:[#allocation3 + $0x60] sm:$0xff] %v2440_v23  ;;  %v5441_v35 = vunpack.i.h.bf16 %v5437_v2  ;;  %v5438_v36 = vunpack.i.l.bf16 %v5437_v2 }
 0x298   : > { %v5442_v55 = vpop.trf.xlu0 }
 0x299   : > { %v5446_v32 = vunpack.i.h.bf16 %v5442_v55  ;;  %v5443_v21 = vunpack.i.l.bf16 %v5442_v55 }
 0x29b   : > { %v1301_v51 = vpack.c.bf16 %v5443_v21, %v5438_v36  ;;  %v2441_v12 = vpack.c.bf16 %v5446_v32, %v5441_v35 }
 0x29c   : > { %v5447_v43 = vpop.trf.xlu0 }
 0x29d   : > { %1309 = vst [vmem:[#allocation3 + $0x28] sm:$0xff] %v1301_v51  ;;  %2450 = vst [vmem:[#allocation3 + $0x68] sm:$0xff] %v2441_v12  ;;  %v5451_v41 = vunpack.i.h.bf16 %v5447_v43  ;;  %v5448_v63 = vunpack.i.l.bf16 %v5447_v43 }
 0x2a0   : > { %v5452_v17 = vpop.trf.xlu0 }
 0x2a1   : > { %v5456_v44 = vunpack.i.h.bf16 %v5452_v17  ;;  %v5453_v38 = vunpack.i.l.bf16 %v5452_v17 }
 0x2a3   : > { %v1302_v47 = vpack.c.bf16 %v5453_v38, %v5448_v63  ;;  %v2442_v8 = vpack.c.bf16 %v5456_v44, %v5451_v41 }
 0x2a4   : > { %v5457_v0 = vpop.trf.xlu0 }
 0x2a5   : > { %1310 = vst [vmem:[#allocation3 + $0x30] sm:$0xff] %v1302_v47  ;;  %2451 = vst [vmem:[#allocation3 + $0x70] sm:$0xff] %v2442_v8  ;;  %v5461_v49 = vunpack.i.h.bf16 %v5457_v0  ;;  %v5458_v54 = vunpack.i.l.bf16 %v5457_v0 }
 0x2a8   : > { %v5462_v50 = vpop.trf.xlu0 }
 0x2a9   : > { %v5466_v25 = vunpack.i.h.bf16 %v5462_v50  ;;  %v5463_v56 = vunpack.i.l.bf16 %v5462_v50 }
 0x2ab   : > { %v1303_v31 = vpack.c.bf16 %v5463_v56, %v5458_v54  ;;  %v2443_v33 = vpack.c.bf16 %v5466_v25, %v5461_v49 }
 0x2ad   : > { %1311 = vst [vmem:[#allocation3 + $0x38] sm:$0xff] %v1303_v31  ;;  %2452 = vst [vmem:[#allocation3 + $0x78] sm:$0xff] %v2443_v33 }
 0x2ae PF: > { %s4040_s22 = sshll.u32 %s6245_s9, 7  ;;  %p4043_p8 = scmp.le.s32.totalorder %s6245_s9, 0  ;;  %v7357_v34 = vmov 0.0   ;;  %v7359_v60 = vmov 0.0   ;;  %v7361_v57 = vmov 0.0   ;;  %v7363_v6 = vmov 0.0  }
 0x2af   : > { %s7330_s3 = scalar_lea.vmem [#allocation2], %s4040_s22  ;;  %v7365_v58 = vmov 0.0   ;;  %v7367_v1 = vmov 0.0   ;;  %v7369_v7 = vmov 0.0   ;;  %v7371_v61 = vmov 0.0  }
 0x2b0   : > { %v7333_v30 = vld [vmem:[%s7330_s3] sm:$0xff]  ;;  %v7336_v48 = vld [vmem:[%s7330_s3 + $0x10] sm:$0xff]  ;;  %v7373_v62 = vmov 0.0   ;;  %v7375_v5 = vmov 0.0   ;;  %v7377_v39 = vmov 0.0   ;;  %v7379_v3 = vmov 0.0  }
 0x2b1   : > { %8913 = vst [vmem:[#allocation4_spill] sm:$0xff] %v7333_v30  ;;  %8914 = vst [vmem:[#allocation5_spill] sm:$0xff] %v7336_v48  ;;  %v7339_v52 = vld [vmem:[%s7330_s3 + $0x20] sm:$0xff]  ;;  %v7342_v26 = vld [vmem:[%s7330_s3 + $0x30] sm:$0xff]  ;;  %v7381_v46 = vmov 0.0   ;;  %v7383_v13 = vmov 0.0  }
 0x2b2   : > { %8915 = vst [vmem:[#allocation6_spill] sm:$0xff] %v7339_v52  ;;  %8916 = vst [vmem:[#allocation7_spill] sm:$0xff] %v7342_v26  ;;  %v7345_v40 = vld [vmem:[%s7330_s3 + $0x40] sm:$0xff]  ;;  %v7348_v28 = vld [vmem:[%s7330_s3 + $0x50] sm:$0xff]  ;;  %v7385_v22 = vmov 0.0   ;;  %v7387_v37 = vmov 0.0  }
 0x2b3   : > { %8917 = vst [vmem:[#allocation8_spill] sm:$0xff] %v7345_v40  ;;  %8918 = vst [vmem:[#allocation9_spill] sm:$0xff] %v7348_v28  ;;  %v7351_v53 = vld [vmem:[%s7330_s3 + $0x60] sm:$0xff]  ;;  %v7354_v4 = vld [vmem:[%s7330_s3 + $0x70] sm:$0xff]  ;;  %v7389_v16 = vmov 0.0   ;;  %v7391_v45 = vmov 0.0  }
 0x2b4   : > { %8919 = vst [vmem:[#allocation10_spill] sm:$0xff] %v7351_v53  ;;  %8920 = vst [vmem:[#allocation11_spill] sm:$0xff] %v7354_v4  ;;  %v7393_v10 = vmov 0.0   ;;  %v7395_v9 = vmov 0.0   ;;  %v7397_v19 = vmov 0.0   ;;  %v7399_v14 = vmov 0.0  }
 0x2b5   : > { %v7401_v15 = vmov 0.0   ;;  %v7403_v20 = vmov 0.0   ;;  %v7405_v18 = vmov 0.0   ;;  %v7407_v11 = vmov 0.0   ;;  %3707 = sbr.rel (%p4043_p8) target bundleno = 1374 (0x55e), region = 68 }
 0x2b6   : > { %v7409_v27 = vmov 0.0   ;;  %v7411_v59 = vmov 0.0   ;;  %v7413_v29 = vmov 0.0   ;;  %v7415_v42 = vmov 0.0  }
 0x2b7   : > { %v7417_v24 = vmov 0.0   ;;  %v7419_v23 = vmov 0.0   ;;  %v7421_v2 = vmov -inf   ;;  %v7423_v35 = vmov -inf  }
 0x2b8   : > { %v7425_v36 = vmov -inf   ;;  %v7427_v55 = vmov -inf   ;;  %v7429_v32 = vmov -inf   ;;  %v7431_v21 = vmov -inf  }
 0x2b9   : > { %v7433_v51 = vmov -inf   ;;  %v7435_v12 = vmov -inf   ;;  %v7437_v43 = vmov -inf   ;;  %v7439_v41 = vmov -inf  }
 0x2ba   : > { %v7441_v63 = vmov -inf   ;;  %v7443_v17 = vmov -inf   ;;  %v7445_v44 = vmov -inf   ;;  %v7447_v38 = vmov -inf  }
 0x2bb   : > { %v7449_v47 = vmov -inf   ;;  %v7451_v8 = vmov -inf  }
 0x2bc   : > { %v7455_v0 = vmov 0.0   ;;  %v7457_v49 = vmov 0.0   ;;  %v7459_v54 = vmov 0.0   ;;  %v7461_v50 = vmov 0.0   ;;  %s7551_s4 = smov 0  }
 0x2bd   : > { %8921 = vst [vmem:[#allocation12_spill] sm:$0xff] %v7459_v54  ;;  %v7463_v25 = vmov 0.0   ;;  %v7465_v56 = vmov 0.0   ;;  %v7467_v31 = vmov 0.0   ;;  %v7469_v33 = vmov 0.0  }
 0x2be   : > { %8922 = vst [vmem:[#allocation13_spill] sm:$0xff] %v7463_v25  ;;  %8923 = vst [vmem:[#allocation14_spill] sm:$0xff] %v7465_v56  ;;  %v7471_v4 = vmov 0.0   ;;  %v7473_v53 = vmov 0.0   ;;  %v7475_v34 = vmov 0.0   ;;  %v7477_v60 = vmov 0.0  }
 0x2bf   : > { %8924 = vst [vmem:[#allocation15_spill] sm:$0xff] %v7467_v31  ;;  %v7479_v57 = vmov 0.0   ;;  %v7481_v6 = vmov 0.0   ;;  %v7483_v58 = vmov 0.0   ;;  %v7485_v1 = vmov 0.0  }
 0x2c0   : > { %v7487_v7 = vmov 0.0   ;;  %v7489_v61 = vmov 0.0   ;;  %v7491_v62 = vmov 0.0   ;;  %v7493_v5 = vmov 0.0  }
 0x2c1   : > { %v7495_v39 = vmov 0.0   ;;  %v7497_v3 = vmov 0.0   ;;  %v7499_v46 = vmov 0.0   ;;  %v7501_v13 = vmov 0.0  }
 0x2c2   : > { %v7503_v22 = vmov 0.0   ;;  %v7505_v37 = vmov 0.0   ;;  %v7507_v16 = vmov 0.0   ;;  %v7509_v45 = vmov 0.0  }
 0x2c3   : > { %v7511_v10 = vmov 0.0   ;;  %v7513_v9 = vmov 0.0   ;;  %v7515_v19 = vmov 0.0   ;;  %v7517_v14 = vmov 0.0  }
 0x2c4   : > { %v7519_v15 = vmov -inf   ;;  %v7521_v20 = vmov -inf   ;;  %v7523_v18 = vmov -inf   ;;  %v7525_v11 = vmov -inf  }
 0x2c5   : > { %v7527_v27 = vmov -inf   ;;  %v7529_v59 = vmov -inf   ;;  %v7531_v29 = vmov -inf   ;;  %v7533_v42 = vmov -inf  }
 0x2c6   : > { %v7535_v24 = vmov -inf   ;;  %v7537_v23 = vmov -inf   ;;  %v7539_v2 = vmov -inf   ;;  %v7541_v35 = vmov -inf  }
 0x2c7   : > { %v7543_v36 = vmov -inf   ;;  %v7545_v55 = vmov -inf   ;;  %v7547_v32 = vmov -inf   ;;  %v7549_v21 = vmov -inf  }
 0x2c8 LB: >> { %8929 = vst [vmem:[#allocation16_spill] sm:$0xff] %v6265_v0  ;;  %8930 = vst [vmem:[#allocation17_spill] sm:$0xff] %v6269_v49  ;;  %v8931_v54 = vld [vmem:[#allocation12_spill] sm:$0xff]  ;;  %v8934_v25 = vld [vmem:[#allocation13_spill] sm:$0xff]  ;;  %s4054_s5 = sshll.u32 %s6457_s4, 6  ;;  %s4044_s7 = sshll.u32 %s6457_s4, 7  ;;  %s6457_s4 = sphi %s7551_s4, %s9105_s4   ;;  %v6453_v21 = vphi %v7549_v21, %v9104_v21   ;;  %v6449_v32 = vphi %v7547_v32, %v9103_v32   ;;  %v6445_v55 = vphi %v7545_v55, %v9102_v55   ;;  %v6441_v36 = vphi %v7543_v36, %v9101_v36   ;;  %v6437_v35 = vphi %v7541_v35, %v9100_v35   ;;  %v6433_v2 = vphi %v7539_v2, %v9099_v2   ;;  %v6429_v23 = vphi %v7537_v23, %v9098_v23   ;;  %v6425_v24 = vphi %v7535_v24, %v9097_v24   ;;  %v6421_v42 = vphi %v7533_v42, %v9096_v42   ;;  %v6417_v29 = vphi %v7531_v29, %v9095_v29   ;;  %v6413_v59 = vphi %v7529_v59, %v9094_v59   ;;  %v6409_v27 = vphi %v7527_v27, %v9093_v27   ;;  %v6405_v11 = vphi %v7525_v11, %v9092_v11   ;;  %v6401_v18 = vphi %v7523_v18, %v9091_v18   ;;  %v6397_v20 = vphi %v7521_v20, %v9090_v20   ;;  %v6393_v15 = vphi %v7519_v15, %v9089_v15   ;;  %v6389_v14 = vphi %v7517_v14, %v9088_v14   ;;  %v6385_v19 = vphi %v7515_v19, %v9087_v19   ;;  %v6381_v9 = vphi %v7513_v9, %v9086_v9   ;;  %v6377_v10 = vphi %v7511_v10, %v9085_v10   ;;  %v6373_v45 = vphi %v7509_v45, %v9084_v45   ;;  %v6369_v16 = vphi %v7507_v16, %v9083_v16   ;;  %v6365_v37 = vphi %v7505_v37, %v9082_v37   ;;  %v6361_v22 = vphi %v7503_v22, %v9081_v22   ;;  %v6357_v13 = vphi %v7501_v13, %v9080_v13   ;;  %v6353_v46 = vphi %v7499_v46, %v9079_v46   ;;  %v6349_v3 = vphi %v7497_v3, %v9078_v3   ;;  %v6345_v39 = vphi %v7495_v39, %v9077_v39   ;;  %v6341_v5 = vphi %v7493_v5, %v9076_v5   ;;  %v6337_v62 = vphi %v7491_v62, %v9075_v62   ;;  %v6333_v61 = vphi %v7489_v61, %v9074_v61   ;;  %v6329_v7 = vphi %v7487_v7, %v9073_v7   ;;  %v6325_v1 = vphi %v7485_v1, %v9072_v1   ;;  %v6321_v58 = vphi %v7483_v58, %v9071_v58   ;;  %v6317_v6 = vphi %v7481_v6, %v9070_v6   ;;  %v6313_v57 = vphi %v7479_v57, %v9069_v57   ;;  %v6309_v60 = vphi %v7477_v60, %v9068_v60   ;;  %v6305_v34 = vphi %v7475_v34, %v9067_v34   ;;  %v6301_v53 = vphi %v7473_v53, %v9066_v53   ;;  %v6297_v4 = vphi %v7471_v4, %v9065_v4   ;;  %v6293_v33 = vphi %v7469_v33, %v9064_v33   ;;  %v6277_v50 = vphi %v7461_v50, %v9060_v50   ;;  %v6269_v49 = vphi %v7457_v49, %v9058_v49   ;;  %v6265_v0 = vphi %v7455_v0, %v9057_v0  }
 0x2c9   : >> { %8932 = vst [vmem:[#allocation12_spill] sm:$0xff] %v8931_v54  ;;  %8933 = vst [vmem:[#allocation18_spill] sm:$0xff] %v6277_v50  ;;  %v8936_v56 = vld [vmem:[#allocation14_spill] sm:$0xff]  ;;  %v8938_v31 = vld [vmem:[#allocation15_spill] sm:$0xff]  ;;  %s2524_s6 = scalar_lea.vmem [#allocation3], %s4054_s5  ;;  %s7710_s8 = scalar_lea.vmem [#allocation2], %s4044_s7 }
 0x2ca   : >> { %8935 = vst [vmem:[#allocation13_spill] sm:$0xff] %v8934_v25  ;;  %8937 = vst [vmem:[#allocation14_spill] sm:$0xff] %v8936_v56  ;;  %v8951_v30 = vld [vmem:[#allocation4_spill] sm:$0xff]  ;;  %v2526_v12 = vld [vmem:[%s2524_s6 + $0x8] sm:$0xff]  ;;  %s2470_s10 = sadd.s32 1, %s6457_s4  }
 0x2cb   : >> { %8939 = vst [vmem:[#allocation15_spill] sm:$0xff] %v8938_v31  ;;  %8940 = vst [vmem:[#allocation19_spill] sm:$0xff] %v6293_v33  ;;  %4361 = vmatprep.mubr.bf16.mxu0 %v8951_v30  ;;  %v2525_v51 = vld [vmem:[%s2524_s6] sm:$0xff]  ;;  %v2527_v43 = vld [vmem:[%s2524_s6 + $0x10] sm:$0xff]  ;;  %p8052_p9 = scmp.ge.s32.totalorder %s2470_s10, %s6245_s9  ;;  %s9105_s4 = smov %s2470_s10 }
 0x2cc   : >> { %8941 = vst [vmem:[#allocation20_spill] sm:$0xff] %v6297_v4  ;;  %8942 = vst [vmem:[#allocation21_spill] sm:$0xff] %v6301_v53  ;;  %4345 = vmatprep.subr.bf16.mxu0 %v2525_v51  ;;  %v2528_v41 = vld [vmem:[%s2524_s6 + $0x18] sm:$0xff]  ;;  %v2529_v63 = vld [vmem:[%s2524_s6 + $0x20] sm:$0xff] }
 0x2cd   : >> { %8943 = vst [vmem:[#allocation22_spill] sm:$0xff] %v6305_v34  ;;  %8944 = vst [vmem:[#allocation23_spill] sm:$0xff] %v6309_v60  ;;  %4346 = vmatpush3.bf16.msra.mxu0 %v2525_v51  ;;  %v2530_v17 = vld [vmem:[%s2524_s6 + $0x28] sm:$0xff]  ;;  %v2531_v44 = vld [vmem:[%s2524_s6 + $0x30] sm:$0xff] }
 0x2ce   : >> { %8945 = vst [vmem:[#allocation24_spill] sm:$0xff] %v6313_v57  ;;  %8946 = vst [vmem:[#allocation25_spill] sm:$0xff] %v6317_v6  ;;  %4347 = vmatprep.subr.bf16.mxu0 %v2526_v12  ;;  %v2532_v38 = vld [vmem:[%s2524_s6 + $0x38] sm:$0xff]  ;;  %v8952_v48 = vld [vmem:[#allocation5_spill] sm:$0xff] }
 0x2cf   : >> { %8947 = vst [vmem:[#allocation26_spill] sm:$0xff] %v6321_v58  ;;  %8948 = vst [vmem:[#allocation27_spill] sm:$0xff] %v6325_v1  ;;  %v8953_v52 = vld [vmem:[#allocation6_spill] sm:$0xff]  ;;  %v8954_v26 = vld [vmem:[#allocation7_spill] sm:$0xff] }
 0x2d0   : >> { %8949 = vst [vmem:[#allocation28_spill] sm:$0xff] %v6329_v7  ;;  %8950 = vst [vmem:[#allocation29_spill] sm:$0xff] %v6333_v61  ;;  %v8955_v40 = vld [vmem:[#allocation8_spill] sm:$0xff]  ;;  %v8956_v28 = vld [vmem:[#allocation9_spill] sm:$0xff] }
 0x2d1   : >> { %4348 = vmatpush3.bf16.msra.mxu0 %v2526_v12  ;;  %v8957_v47 = vld [vmem:[#allocation10_spill] sm:$0xff]  ;;  %v8958_v8 = vld [vmem:[#allocation11_spill] sm:$0xff]  ;;  %v2843_v51 = vld [vmem:[%s7710_s8 + $0x8] sm:$0xff] }
 0x2d2   : >> { %4349 = vmatprep.subr.bf16.mxu0 %v2527_v43  ;;  %v2844_v12 = vld [vmem:[%s7710_s8 + $0x18] sm:$0xff]  ;;  %4377 = vmatprep.subr.bf16.mxu1 %v2843_v51  ;;  %v2847_v54 = vld [vmem:[%s7710_s8 + $0x48] sm:$0xff] }
 0x2d3   : >> { %4378 = vmatpush3.bf16.msra.mxu1 %v2843_v51  ;;  %v2849_v50 = vld [vmem:[%s7710_s8 + $0x68] sm:$0xff]  ;;  %v2850_v49 = vld [vmem:[%s7710_s8 + $0x78] sm:$0xff] }
 0x2d4   : >> { %4379 = vmatprep.subr.bf16.mxu1 %v2844_v12 }
 0x2d5   : >> { %4350 = vmatpush3.bf16.msra.mxu0 %v2527_v43 }
 0x2d6   : >> { %4351 = vmatprep.subr.bf16.mxu0 %v2528_v41 }
 0x2d7   : >> { %4380 = vmatpush3.bf16.msra.mxu1 %v2844_v12 }
 0x2d9   : >> { %4352 = vmatpush3.bf16.msra.mxu0 %v2528_v41 }
 0x2da   : >> { %4353 = vmatprep.subr.bf16.mxu0 %v2529_v63 }
 0x2dd   : >> { %4354 = vmatpush3.bf16.msra.mxu0 %v2529_v63 }
 0x2de   : >> { %4355 = vmatprep.subr.bf16.mxu0 %v2530_v17 }
 0x2e1   : >> { %4356 = vmatpush3.bf16.msra.mxu0 %v2530_v17 }
 0x2e2   : >> { %4357 = vmatprep.subr.bf16.mxu0 %v2531_v44 }
 0x2e5   : >> { %4358 = vmatpush3.bf16.msra.mxu0 %v2531_v44 }
 0x2e6   : >> { %4359 = vmatprep.subr.bf16.mxu0 %v2532_v38 }
 0x2e9   : >> { %4360 = vmatpush3.bf16.msra.mxu0 %v2532_v38 }
 0x2ec   : >> { %4362 = vmatmul.mubr.bf16.vlgmr.msra.gmra.mrb[0].mxu0 %v8952_v48 }
 0x2ed   : >> { %4365 = vmatprep.mubr.bf16.mxu0 %v8953_v52  ;;  %v2846_v52 = vld [vmem:[%s7710_s8 + $0x38] sm:$0xff] }
 0x2f4   : >> { %4366 = vmatmul.mubr.bf16.gmra.mrb[4].mxu0 %v8954_v26 }
 0x2f5   : >> { %4369 = vmatprep.mubr.bf16.mxu0 %v8955_v40 }
 0x2fc   : >> { %4370 = vmatmul.mubr.bf16.gmra.mrb[8].mxu0 %v8956_v28  ;;  %v2845_v28 = vld [vmem:[%s7710_s8 + $0x28] sm:$0xff] }
 0x2fd   : >> { %4373 = vmatprep.mubr.bf16.mxu0 %v8957_v47  ;;  %4381 = vmatprep.subr.bf16.mxu1 %v2845_v28 }
 0x2fe   : >> { %4382 = vmatpush3.bf16.msra.mxu1 %v2845_v28 }
 0x2ff   : >> { %4383 = vmatprep.subr.bf16.mxu1 %v2846_v52 }
 0x302   : >> { %4384 = vmatpush3.bf16.msra.mxu1 %v2846_v52  ;;  %v2848_v52 = vld [vmem:[%s7710_s8 + $0x58] sm:$0xff] }
 0x303   : >> { %4385 = vmatprep.subr.bf16.mxu1 %v2847_v54 }
 0x304   : >> { %4374 = vmatmul.mubr.bf16.gmra.mrb[12].mxu0 %v8958_v8 }
 0x306   : >> { %4386 = vmatpush3.bf16.msra.mxu1 %v2847_v54 }
 0x307   : >> { %4387 = vmatprep.subr.bf16.mxu1 %v2848_v52 }
 0x30a   : >> { %4388 = vmatpush3.bf16.msra.mxu1 %v2848_v52 }
 0x30b   : >> { %4389 = vmatprep.subr.bf16.mxu1 %v2849_v50 }
 0x30e   : >> { %4390 = vmatpush3.bf16.msra.mxu1 %v2849_v50 }
 0x30f   : >> { %4391 = vmatprep.subr.bf16.mxu1 %v2850_v49 }
 0x312   : >> { %4392 = vmatpush3.bf16.msra.mxu1 %v2850_v49 }
 0x3bf   : >> { %v4363_v43 = vpop.f32.mrb[0].mxu0 }
 0x3c0   : >> { %2634 = vmax.xlane.f32.xlu1 %v4363_v43  ;;  %v2567_v41 = vpop.f32.mrb[1].mxu0 }
 0x3c1   : >> { %2630 = vmax.xlane.f32.xlu0 %v2567_v41  ;;  %v7714_v63 = vpop.f32.mrb[2].mxu0 }
 0x3c2   : >> { %v7716_v17 = vpop.f32.mrb[3].mxu0 }
 0x3c4   : >> { %2636 = vmax.xlane.f32.xlu1 %v7714_v63 }
 0x3c5   : >> { %2632 = vmax.xlane.f32.xlu0 %v7716_v17 }
 0x3c7   : >> { %v7720_v44 = vpop.f32.mrb[4].mxu0 }
 0x3c8   : >> { %v7722_v38 = vpop.f32.mrb[5].mxu0 }
 0x3c9   : >> { %2638 = vmax.xlane.f32.xlu0 %v7722_v38  ;;  %v7725_v47 = vpop.f32.mrb[6].mxu0 }
 0x3ca   : >> { %v7727_v8 = vpop.f32.mrb[7].mxu0 }
 0x3cb   : >> { %2640 = vmax.xlane.f32.xlu1 %v7727_v8 }
 0x3cd   : >> { %2642 = vmax.xlane.f32.xlu0 %v7720_v44 }
 0x3cf   : >> { %2644 = vmax.xlane.f32.xlu1 %v7725_v47  ;;  %v7732_v51 = vpop.f32.mrb[8].mxu0 }
 0x3d0   : >> { %v7734_v12 = vpop.f32.mrb[9].mxu0 }
 0x3d1   : >> { %2646 = vmax.xlane.f32.xlu0 %v7734_v12  ;;  %v7738_v40 = vpop.f32.mrb[10].mxu0 }
 0x3d2   : >> { %8959 = vst [vmem:[#allocation30_spill] sm:$0xff] %v7738_v40  ;;  %v7740_v26 = vpop.f32.mrb[11].mxu0 }
 0x3d3   : >> { %2648 = vmax.xlane.f32.xlu1 %v7740_v26 }
 0x3d5   : >> { %2650 = vmax.xlane.f32.xlu0 %v7732_v51 }
 0x3d7   : >> { %2652 = vmax.xlane.f32.xlu1 %v7738_v40  ;;  %v7746_v48 = vpop.f32.mrb[12].mxu0 }
 0x3d8   : >> { %8960 = vst [vmem:[#allocation31_spill] sm:$0xff] %v7746_v48  ;;  %v7748_v30 = vpop.f32.mrb[13].mxu0 }
 0x3d9   : >> { %8961 = vst [vmem:[#allocation32_spill] sm:$0xff] %v7748_v30  ;;  %2654 = vmax.xlane.f32.xlu0 %v7748_v30  ;;  %v7752_v28 = vpop.f32.mrb[14].mxu0 }
 0x3da   : >> { %8962 = vst [vmem:[#allocation33_spill] sm:$0xff] %v7752_v28  ;;  %v7754_v0 = vpop.f32.mrb[15].mxu0 }
 0x3db   : >> { %2656 = vmax.xlane.f32.xlu1 %v7754_v0 }
 0x3dd   : >> { %2658 = vmax.xlane.f32.xlu0 %v7746_v48 }
 0x3df   : >> { %2660 = vmax.xlane.f32.xlu1 %v7752_v28 }
 0x44d   : >> { %v2635_v31 = vpop.xlane.xlu1 %2634 }
 0x44e   : >> { %v7763_v25 = vmax.f32 %v6445_v55, %v2635_v31   ;;  %v2631_v54 = vpop.xlane.xlu0 %2630 }
 0x44f   : >> { %v7766_v33 = vmax.f32 %v6453_v21, %v2631_v54  }
 0x450   : >> { %8963 = vst [vmem:[#allocation34_spill] sm:$0xff] %v7763_v25  ;;  %v8964_v30 = vmov %v7763_v25 }
 0x451   : >> { %8965 = vst [vmem:[#allocation35_spill] sm:$0xff] %v7766_v33  ;;  %v8966_v40 = vmov %v7766_v33  ;;  %v2728_v52 = vsub.f32 %v4363_v43, %v8964_v30  ;;  %v2637_v4 = vpop.xlane.xlu1 %2636 }
 0x452   : >> { %v2726_v50 = vsub.f32 %v2567_v41, %v8966_v40  ;;  %v7775_v60 = vmax.f32 %v6441_v36, %v2637_v4   ;;  %v2633_v25 = vpop.xlane.xlu0 %2632 }
 0x453   : >> { %v2746_v49 = vmul.f32 1.442695, %v2728_v52  ;;  %v7778_v31 = vmax.f32 %v6449_v32, %v2633_v25  }
 0x454   : >> { %8967 = vst [vmem:[#allocation36_spill] sm:$0xff] %v7775_v60  ;;  %v8968_v28 = vmov %v7775_v60  ;;  %v2742_v33 = vmul.f32 1.442695, %v2726_v50 }
 0x455   : >> { %8969 = vst [vmem:[#allocation37_spill] sm:$0xff] %v7778_v31  ;;  %v8970_v48 = vmov %v7778_v31  ;;  %v2729_v43 = vsub.f32 %v7714_v63, %v8968_v28  ;;  %5675 = vpow2.f32 %v2746_v49 }
 0x456   : >> { %v2727_v52 = vsub.f32 %v7716_v17, %v8970_v48  ;;  %v2639_v60 = vpop.xlane.xlu0 %2638  ;;  %5677 = vpow2.f32 %v2742_v33 }
 0x457   : >> { %v2748_v4 = vmul.f32 1.442695, %v2729_v43  ;;  %v7789_v25 = vmax.f32 %v6437_v35, %v2639_v60  }
 0x458   : >> { %v2744_v34 = vmul.f32 1.442695, %v2727_v52  ;;  %v2641_v50 = vpop.xlane.xlu1 %2640 }
 0x459   : >> { %8971 = vst [vmem:[#allocation38_spill] sm:$0xff] %v7789_v25  ;;  %v8972_v56 = vmov %v7789_v25  ;;  %5679 = vpow2.f32 %v2748_v4  ;;  %v7796_v49 = vmax.f32 %v6433_v2, %v2641_v50  }
 0x45a   : >> { %v2730_v63 = vsub.f32 %v7722_v38, %v8972_v56  ;;  %v2643_v41 = vpop.xlane.xlu0 %2642  ;;  %5681 = vpow2.f32 %v2744_v34 }
 0x45b   : >> { %8973 = vst [vmem:[#allocation39_spill] sm:$0xff] %v7796_v49  ;;  %v8974_v54 = vmov %v7796_v49  ;;  %v7803_v33 = vmax.f32 %v6429_v23, %v2643_v41  }
 0x45c   : >> { %v2731_v43 = vsub.f32 %v7727_v8, %v8974_v54  ;;  %v2645_v4 = vpop.xlane.xlu1 %2644  ;;  %v2750_v60 = vmul.f32 1.442695, %v2730_v63 }
 0x45d   : >> { %8975 = vst [vmem:[#allocation40_spill] sm:$0xff] %v7803_v33  ;;  %v8976_v52 = vmov %v7803_v33  ;;  %v7806_v25 = vmax.f32 %v6425_v24, %v2645_v4  }
 0x45e   : >> { %v2752_v38 = vmul.f32 1.442695, %v2731_v43  ;;  %v2732_v34 = vsub.f32 %v7720_v44, %v8976_v52  ;;  %v2647_v49 = vpop.xlane.xlu0 %2646 }
 0x45f   : >> { %8977 = vst [vmem:[#allocation41_spill] sm:$0xff] %v7806_v25  ;;  %v8978_v31 = vmov %v7806_v25  ;;  %v5676_v17 = vpop.eup %5675  ;;  %v7817_v63 = vmax.f32 %v6421_v42, %v2647_v49  }
 0x460   : >> { %v2733_v41 = vsub.f32 %v7725_v47, %v8978_v31  ;;  %5683 = vpow2.f32 %v2752_v38  ;;  %v2754_v33 = vmul.f32 1.442695, %v2732_v34  ;;  %2794 = vadd.xlane.f32.xlu0 %v5676_v17  ;;  %v2649_v43 = vpop.xlane.xlu1 %2648  ;;  %v5678_v50 = vpop.eup %5677 }
 0x461   : >> { %8979 = vst [vmem:[#allocation42_spill] sm:$0xff] %v7817_v63  ;;  %5685 = vpow2.f32 %v2750_v60  ;;  %v2734_v25 = vsub.f32 %v7734_v12, %v7817_v63  ;;  %v7824_v8 = vmax.f32 %v6417_v29, %v2649_v43  }
 0x462   : >> { %v2756_v4 = vmul.f32 1.442695, %v2733_v41  ;;  %v2651_v47 = vpop.xlane.xlu0 %2650  ;;  %5687 = vpow2.f32 %v2754_v33 }
 0x463   : >> { %8980 = vst [vmem:[#allocation43_spill] sm:$0xff] %v7824_v8  ;;  %v5680_v53 = vpop.eup %5679  ;;  %v7827_v38 = vmax.f32 %v6413_v59, %v2651_v47   ;;  %v2758_v34 = vmul.f32 1.442695, %v2734_v25  ;;  %v2735_v49 = vsub.f32 %v7740_v26, %v7824_v8 }
 0x464   : >> { %2790 = vadd.xlane.f32.xlu0 %v5678_v50  ;;  %2796 = vadd.xlane.f32.xlu1 %v5680_v53  ;;  %v2653_v12 = vpop.xlane.xlu1 %2652  ;;  %v2868_v41 = vpack.c.bf16 %v5680_v53, %v5676_v17  ;;  %v5682_v44 = vpop.eup %5681  ;;  %5689 = vpow2.f32 %v2756_v4  ;;  %v8984_v53 = vld [vmem:[#allocation30_spill] sm:$0xff] }
 0x465   : >> { %8981 = vst [vmem:[#allocation44_spill] sm:$0xff] %v7827_v38  ;;  %v2736_v33 = vsub.f32 %v7732_v51, %v7827_v38  ;;  %v7838_v25 = vmax.f32 %v6409_v27, %v2653_v12   ;;  %v2760_v58 = vmul.f32 1.442695, %v2735_v49  ;;  %v2867_v57 = vpack.c.bf16 %v5682_v44, %v5678_v50 }
 0x466   : >> { %v2655_v60 = vpop.xlane.xlu0 %2654  ;;  %5691 = vpow2.f32 %v2758_v34  ;;  %v8989_v34 = vld [vmem:[#allocation32_spill] sm:$0xff] }
 0x467   : >> { %8982 = vst [vmem:[#allocation45_spill] sm:$0xff] %v7838_v25  ;;  %v8983_v47 = vmov %v7838_v25  ;;  %v2762_v1 = vmul.f32 1.442695, %v2736_v33  ;;  %v7845_v4 = vmax.f32 %v6405_v11, %v2655_v60   ;;  %4393 = vmatprep.mubr.bf16.mxu1 %v2867_v57  ;;  %5693 = vpow2.f32 %v2760_v58 }
 0x468   : >> { %v2737_v17 = vsub.f32 %v8984_v53, %v8983_v47  ;;  %2792 = vadd.xlane.f32.xlu1 %v5682_v44  ;;  %v2657_v51 = vpop.xlane.xlu1 %2656  ;;  %4394 = vmatmul.mubr.bf16.vlgmr.msra.gmra.mrb[0].mxu1 %v2868_v41 }
 0x469   : >> { %8985 = vst [vmem:[#allocation46_spill] sm:$0xff] %v7845_v4  ;;  %v8986_v43 = vmov %v7845_v4  ;;  %v7848_v49 = vmax.f32 %v6401_v18, %v2657_v51   ;;  %5695 = vpow2.f32 %v2762_v1  ;;  %v8991_v1 = vld [vmem:[#allocation31_spill] sm:$0xff] }
 0x46a   : >> { %v5684_v50 = vpop.eup %5683  ;;  %v2764_v33 = vmul.f32 1.442695, %v2737_v17  ;;  %v2738_v26 = vsub.f32 %v8989_v34, %v8986_v43  ;;  %v2659_v53 = vpop.xlane.xlu0 %2658 }
 0x46b   : >> { %8987 = vst [vmem:[#allocation47_spill] sm:$0xff] %v7848_v49  ;;  %v8988_v12 = vmov %v7848_v49  ;;  %v5686_v6 = vpop.eup %5685  ;;  %v7859_v44 = vmax.f32 %v6397_v20, %v2659_v53  }
 0x46c   : >> { %v2739_v58 = vsub.f32 %v7754_v0, %v8988_v12  ;;  %v2766_v60 = vmul.f32 1.442695, %v2738_v26  ;;  %v2661_v41 = vpop.xlane.xlu1 %2660  ;;  %v2869_v17 = vpack.c.bf16 %v5684_v50, %v5686_v6  ;;  %v5688_v4 = vpop.eup %5687  ;;  %5697 = vpow2.f32 %v2764_v33  ;;  %v8994_v33 = vld [vmem:[#allocation33_spill] sm:$0xff] }
 0x46d   : >> { %8990 = vst [vmem:[#allocation48_spill] sm:$0xff] %v7859_v44  ;;  %v2740_v34 = vsub.f32 %v8991_v1, %v7859_v44  ;;  %v7866_v57 = vmax.f32 %v6393_v15, %v2661_v41   ;;  %2802 = vadd.xlane.f32.xlu0 %v5688_v4 }
 0x46e   : >> { %v2768_v51 = vmul.f32 1.442695, %v2739_v58  ;;  %4397 = vmatprep.mubr.bf16.mxu1 %v2869_v17  ;;  %v5690_v0 = vpop.eup %5689  ;;  %5699 = vpow2.f32 %v2766_v60 }
 0x46f   : >> { %8992 = vst [vmem:[#allocation49_spill] sm:$0xff] %v7866_v57  ;;  %v8993_v25 = vmov %v7866_v57  ;;  %v2770_v53 = vmul.f32 1.442695, %v2740_v34  ;;  %2804 = vadd.xlane.f32.xlu1 %v5690_v0  ;;  %v2870_v49 = vpack.c.bf16 %v5690_v0, %v5688_v4 }
 0x470   : >> { %v2741_v58 = vsub.f32 %v8994_v33, %v8993_v25  ;;  %5701 = vpow2.f32 %v2768_v51  ;;  %v5692_v7 = vpop.eup %5691 }
 0x471   : >> { %2798 = vadd.xlane.f32.xlu0 %v5686_v6  ;;  %v5694_v1 = vpop.eup %5693  ;;  %4398 = vmatmul.mubr.bf16.gmra.mrb[4].mxu1 %v2870_v49  ;;  %5703 = vpow2.f32 %v2770_v53  ;;  %v8997_v53 = vsub.f32 %v6441_v36, %v8968_v28 }
 0x472   : >> { %v2772_v61 = vmul.f32 1.442695, %v2741_v58  ;;  %v2871_v57 = vpack.c.bf16 %v5694_v1, %v5692_v7 }
 0x473   : >> { %2800 = vadd.xlane.f32.xlu1 %v5684_v50  ;;  %v5696_v41 = vpop.eup %5695  ;;  %v2700_v58 = vmul.f32 1.442695, %v8997_v53 }
 0x474   : >> { %5705 = vpow2.f32 %v2772_v61  ;;  %4401 = vmatprep.mubr.bf16.mxu1 %v2871_v57  ;;  %v8995_v61 = vsub.f32 %v6445_v55, %v8964_v30  ;;  %v8999_v55 = vsub.f32 %v6429_v23, %v8976_v52  ;;  %v9003_v23 = vsub.f32 %v6433_v2, %v8974_v54 }
 0x475   : >> { %2810 = vadd.xlane.f32.xlu0 %v5696_v41  ;;  %v9007_v2 = vsub.f32 %v6409_v27, %v8983_v47 }
 0x476   : >> { %v5698_v60 = vpop.eup %5697  ;;  %v2698_v49 = vmul.f32 1.442695, %v8995_v61 }
 0x477   : >> { %2812 = vadd.xlane.f32.xlu1 %v5698_v60  ;;  %v2872_v17 = vpack.c.bf16 %v5698_v60, %v5696_v41  ;;  %v2706_v60 = vmul.f32 1.442695, %v8999_v55  ;;  %v9011_v55 = vsub.f32 %v6405_v11, %v8986_v43  ;;  %v9014_v11 = vsub.f32 %v6397_v20, %v7859_v44 }
 0x478   : >> { %v5700_v34 = vpop.eup %5699  ;;  %5707 = vpow2.f32 %v2698_v49 }
 0x479   : >> { %2806 = vadd.xlane.f32.xlu0 %v5692_v7  ;;  %4402 = vmatmul.mubr.bf16.gmra.mrb[8].mxu1 %v2872_v17  ;;  %v8996_v7 = vsub.f32 %v6453_v21, %v8966_v40  ;;  %v9000_v21 = vsub.f32 %v6425_v24, %v8978_v31  ;;  %v2704_v24 = vmul.f32 1.442695, %v9003_v23  ;;  %v2722_v23 = vmul.f32 1.442695, %v9014_v11 }
 0x47a   : >> { %v5702_v33 = vpop.eup %5701 }
 0x47b   : >> { %2808 = vadd.xlane.f32.xlu1 %v5694_v1  ;;  %v2873_v4 = vpack.c.bf16 %v5702_v33, %v5700_v34  ;;  %v5704_v51 = vpop.eup %5703  ;;  %v2694_v0 = vmul.f32 1.442695, %v8996_v7  ;;  %v8998_v1 = vsub.f32 %v6449_v32, %v8970_v48  ;;  %v2708_v17 = vmul.f32 1.442695, %v9000_v21 }
 0x47c   : >> { %v9001_v32 = vsub.f32 %v6437_v35, %v8972_v56  ;;  %v9004_v35 = vsub.f32 %v6413_v59, %v7827_v38 }
 0x47d   : >> { %2814 = vadd.xlane.f32.xlu0 %v5700_v34  ;;  %4405 = vmatprep.mubr.bf16.mxu1 %v2873_v4  ;;  %5709 = vpow2.f32 %v2694_v0  ;;  %v2696_v57 = vmul.f32 1.442695, %v8998_v1  ;;  %v2716_v0 = vmul.f32 1.442695, %v9007_v2 }
 0x47e   : >> { %v5706_v6 = vpop.eup %5705  ;;  %5711 = vpow2.f32 %v2700_v58  ;;  %v2702_v4 = vmul.f32 1.442695, %v9001_v32  ;;  %v2714_v49 = vmul.f32 1.442695, %v9004_v35  ;;  %v9008_v58 = vsub.f32 %v6421_v42, %v7817_v63 }
 0x47f   : >> { %2816 = vadd.xlane.f32.xlu1 %v5702_v33  ;;  %v2874_v50 = vpack.c.bf16 %v5706_v6, %v5704_v51  ;;  %5713 = vpow2.f32 %v2696_v57 }
 0x480   : >> { %5715 = vpow2.f32 %v2706_v60  ;;  %v2710_v1 = vmul.f32 1.442695, %v9008_v58  ;;  %v2718_v60 = vmul.f32 1.442695, %v9011_v55 }
 0x481   : >> { %2818 = vadd.xlane.f32.xlu0 %v5704_v51  ;;  %4406 = vmatmul.mubr.bf16.gmra.mrb[12].mxu1 %v2874_v50  ;;  %5717 = vpow2.f32 %v2708_v17 }
 0x482   : >> { %v7884_v41 = vpop.eup %5707  ;;  %5719 = vpow2.f32 %v2702_v4 }
 0x483   : >> { %2820 = vadd.xlane.f32.xlu1 %v5706_v6  ;;  %v2776_v36 = vmul.f32 %v6381_v9, %v7884_v41  ;;  %5721 = vpow2.f32 %v2704_v24 }
 0x484   : >> { %5723 = vpow2.f32 %v2714_v49 }
 0x485   : >> { %5725 = vpow2.f32 %v2716_v0 }
 0x486   : >> { %5727 = vpow2.f32 %v2710_v1 }
 0x487   : >> { %v7892_v34 = vpop.eup %5709 }
 0x488   : >> { %v7896_v33 = vpop.eup %5711  ;;  %v2774_v6 = vmul.f32 %v6389_v14, %v7892_v34 }
 0x489   : >> { %v2777_v50 = vmul.f32 %v6377_v10, %v7896_v33  ;;  %v7910_v61 = vpop.eup %5713 }
 0x48a   : >> { %v2775_v53 = vmul.f32 %v6385_v19, %v7910_v61  ;;  %v7929_v57 = vpop.eup %5715 }
 0x48b   : >> { %v7934_v27 = vpop.eup %5717  ;;  %v2780_v42 = vmul.f32 %v6365_v37, %v7929_v57 }
 0x48c   : >> { %v7941_v21 = vpop.eup %5719  ;;  %v2781_v32 = vmul.f32 %v6361_v22, %v7934_v27 }
 0x48d   : >> { %v7950_v4 = vpop.eup %5721 }
 0x48e   : >> { %v2779_v20 = vmul.f32 %v6369_v16, %v7950_v4 }
 0x4ed   : >> { %v2795_v51 = vpop.xlane.xlu0 %2794 }
 0x4ee   : >> { %v7901_v9 = vadd.f32 %v2795_v51, %v2776_v36  }
 0x4f0   : >> { %9002 = vst [vmem:[#allocation50_spill] sm:$0xff] %v7901_v9 }
 0x4f1   : >> { %v2791_v7 = vpop.xlane.xlu0 %2790  ;;  %v2797_v9 = vpop.xlane.xlu1 %2796 }
 0x4f2   : >> { %v7915_v14 = vadd.f32 %v2791_v7, %v2774_v6   ;;  %v7917_v10 = vadd.f32 %v2797_v9, %v2777_v50   ;;  %v7959_v6 = vpop.eup %5723 }
 0x4f3   : >> { %v7968_v49 = vpop.eup %5725  ;;  %v2784_v7 = vmul.f32 %v6349_v3, %v7959_v6 }
 0x4f4   : >> { %9005 = vst [vmem:[#allocation51_spill] sm:$0xff] %v7915_v14  ;;  %9006 = vst [vmem:[#allocation52_spill] sm:$0xff] %v7917_v10  ;;  %v9010_v10 = vsub.f32 %v6417_v29, %v7824_v8  ;;  %v5728_v9 = vpop.eup %5727 }
 0x4f5   : >> { %v2793_v59 = vpop.xlane.xlu1 %2792 }
 0x4f6   : >> { %v7927_v19 = vadd.f32 %v2793_v59, %v2775_v53   ;;  %v2712_v14 = vmul.f32 1.442695, %v9010_v10  ;;  %v2782_v53 = vmul.f32 %v6357_v13, %v5728_v9 }
 0x4f8   : >> { %9009 = vst [vmem:[#allocation53_spill] sm:$0xff] %v7927_v19  ;;  %5729 = vpow2.f32 %v2712_v14  ;;  %v9012_v19 = vsub.f32 %v6401_v18, %v8988_v12  ;;  %v2778_v18 = vmul.f32 %v6373_v45, %v7941_v21 }
 0x4f9   : >> { %5731 = vpow2.f32 %v2718_v60 }
 0x4fa   : >> { %v2720_v36 = vmul.f32 1.442695, %v9012_v19  ;;  %v2803_v29 = vpop.xlane.xlu0 %2802  ;;  %v9025_v19 = vld [vmem:[#allocation29_spill] sm:$0xff] }
 0x4fb   : >> { %v7946_v37 = vadd.f32 %v2803_v29, %v2780_v42  }
 0x4fc   : >> { %v2805_v24 = vpop.xlane.xlu1 %2804  ;;  %5733 = vpow2.f32 %v2720_v36 }
 0x4fd   : >> { %9013 = vst [vmem:[#allocation54_spill] sm:$0xff] %v7946_v37  ;;  %v7955_v22 = vadd.f32 %v2805_v24, %v2781_v32   ;;  %v9016_v37 = vsub.f32 %v6393_v15, %v8993_v25  ;;  %5735 = vpow2.f32 %v2722_v23  ;;  %v9027_v32 = vld [vmem:[#allocation28_spill] sm:$0xff]  ;;  %v9029_v23 = vld [vmem:[#allocation25_spill] sm:$0xff] }
 0x4fe   : >> { %v2799_v35 = vpop.xlane.xlu0 %2798  ;;  %v2853_v24 = vmul.f32 %v9029_v23, %v7884_v41 }
 0x4ff   : >> { %9015 = vst [vmem:[#allocation55_spill] sm:$0xff] %v7955_v22  ;;  %v2724_v50 = vmul.f32 1.442695, %v9016_v37  ;;  %v7964_v45 = vadd.f32 %v2799_v35, %v2778_v18   ;;  %v9030_v18 = vld [vmem:[#allocation27_spill] sm:$0xff]  ;;  %v9032_v35 = vld [vmem:[#allocation24_spill] sm:$0xff] }
 0x500   : >> { %v2801_v22 = vpop.xlane.xlu1 %2800  ;;  %v2851_v37 = vmul.f32 %v9030_v18, %v7892_v34 }
 0x501   : >> { %9017 = vst [vmem:[#allocation56_spill] sm:$0xff] %v7964_v45  ;;  %v7970_v16 = vadd.f32 %v2801_v22, %v2779_v20   ;;  %5737 = vpow2.f32 %v2724_v50  ;;  %v2785_v45 = vmul.f32 %v6345_v39, %v7968_v49  ;;  %v2854_v20 = vmul.f32 %v9032_v35, %v7896_v33 }
 0x502   : >> { %v2811_v2 = vpop.xlane.xlu0 %2810  ;;  %v5730_v15 = vpop.eup %5729 }
 0x503   : >> { %9018 = vst [vmem:[#allocation57_spill] sm:$0xff] %v7970_v16  ;;  %v7974_v3 = vadd.f32 %v2811_v2, %v2784_v7   ;;  %v5732_v58 = vpop.eup %5731  ;;  %v2783_v16 = vmul.f32 %v6353_v46, %v5730_v15  ;;  %v9034_v2 = vld [vmem:[#allocation26_spill] sm:$0xff] }
 0x504   : >> { %v2813_v0 = vpop.xlane.xlu1 %2812 }
 0x505   : >> { %9019 = vst [vmem:[#allocation58_spill] sm:$0xff] %v7974_v3  ;;  %v7978_v39 = vadd.f32 %v2813_v0, %v2785_v45   ;;  %v2786_v3 = vmul.f32 %v6341_v5, %v5732_v58  ;;  %v2852_v45 = vmul.f32 %v9034_v2, %v7910_v61  ;;  %v9055_v2 = vld [vmem:[#allocation12_spill] sm:$0xff] }
 0x506   : >> { %v2807_v1 = vpop.xlane.xlu0 %2806  ;;  %v5734_v59 = vpop.eup %5733 }
 0x507   : >> { %9020 = vst [vmem:[#allocation59_spill] sm:$0xff] %v7978_v39  ;;  %v7981_v13 = vadd.f32 %v2807_v1, %v2782_v53   ;;  %v5736_v14 = vpop.eup %5735  ;;  %v2787_v39 = vmul.f32 %v6337_v62, %v5734_v59  ;;  %v9036_v53 = vld [vmem:[#allocation21_spill] sm:$0xff] }
 0x508   : >> { %v2809_v10 = vpop.xlane.xlu1 %2808  ;;  %v2857_v34 = vmul.f32 %v9036_v53, %v7929_v57  ;;  %v9044_v57 = vld [vmem:[#allocation14_spill] sm:$0xff] }
 0x509   : >> { %9021 = vst [vmem:[#allocation60_spill] sm:$0xff] %v7981_v13  ;;  %v7984_v46 = vadd.f32 %v2809_v10, %v2783_v16   ;;  %v2788_v13 = vmul.f32 %v9025_v19, %v5736_v14  ;;  %v9037_v10 = vld [vmem:[#allocation23_spill] sm:$0xff] }
 0x50a   : >> { %v2815_v55 = vpop.xlane.xlu0 %2814 }
 0x50b   : >> { %9022 = vst [vmem:[#allocation61_spill] sm:$0xff] %v7984_v46  ;;  %v7987_v5 = vadd.f32 %v2815_v55, %v2786_v3   ;;  %v5738_v60 = vpop.eup %5737  ;;  %v2855_v3 = vmul.f32 %v9037_v10, %v7941_v21  ;;  %v2861_v21 = vmul.f32 %v9044_v57, %v7959_v6  ;;  %v9052_v6 = vld [vmem:[#allocation17_spill] sm:$0xff]  ;;  %v9085_v10 = vld [vmem:[#allocation52_spill] sm:$0xff] }
 0x50c   : >> { %v2817_v42 = vpop.xlane.xlu1 %2816  ;;  %v2789_v11 = vmul.f32 %v9027_v32, %v5738_v60 }
 0x50d   : >> { %v9023_v8 = vmov %v7987_v5  ;;  %v7990_v62 = vadd.f32 %v2817_v42, %v2787_v39   ;;  %v9041_v42 = vld [vmem:[#allocation22_spill] sm:$0xff] }
 0x50e   : >> { %v2819_v36 = vpop.xlane.xlu0 %2818  ;;  %v2856_v19 = vmul.f32 %v9041_v42, %v7950_v4  ;;  %v9096_v42 = vld [vmem:[#allocation42_spill] sm:$0xff] }
 0x50f   : >> { %v9024_v38 = vmov %v7990_v62  ;;  %v7993_v29 = vadd.f32 %v2819_v36, %v2788_v13   ;;  %v9135_v42 = vld [vmem:[#allocation50_spill] sm:$0xff] (%p8052_p9) }
 0x510   : >> { %v2821_v46 = vpop.xlane.xlu1 %2820  ;;  %v9124_v10 = vmov (%p8052_p9), %v9024_v38 }
 0x511   : >> { %v9026_v47 = vmov %v7993_v29  ;;  %v7996_v7 = vadd.f32 %v2821_v46, %v2789_v11   ;;  %v9045_v29 = vld [vmem:[#allocation19_spill] sm:$0xff]  ;;  %v9047_v11 = vld [vmem:[#allocation13_spill] sm:$0xff] }
 0x512   : >> { %v2859_v32 = vmul.f32 %v9045_v29, %v5728_v9  ;;  %v2862_v46 = vmul.f32 %v9047_v11, %v7968_v49  ;;  %v9053_v9 = vld [vmem:[#allocation18_spill] sm:$0xff]  ;;  %v9092_v11 = vld [vmem:[#allocation46_spill] sm:$0xff]  ;;  %v9095_v29 = vld [vmem:[#allocation43_spill] sm:$0xff] }
 0x513   : >> { %v9028_v43 = vmov %v7996_v7  ;;  %v9131_v11 = vld [vmem:[#allocation54_spill] sm:$0xff] (%p8052_p9)  ;;  %v9134_v29 = vld [vmem:[#allocation52_spill] sm:$0xff] (%p8052_p9) }
 0x53b   : >> { %v4395_v5 = vpop.f32.mrb[0].mxu1 }
 0x53c   : >> { %v8002_v50 = vadd.f32 %v4395_v5, %v2853_v24   ;;  %v2909_v62 = vpop.f32.mrb[1].mxu1  ;;  %v9049_v24 = vld [vmem:[#allocation15_spill] sm:$0xff] }
 0x53d   : >> { %v8006_v1 = vadd.f32 %v2909_v62, %v2851_v37   ;;  %v4396_v22 = vpop.f32.mrb[2].mxu1  ;;  %v2865_v37 = vmul.f32 %v9052_v6, %v5736_v14  ;;  %v2863_v62 = vmul.f32 %v9053_v9, %v5732_v58  ;;  %v9086_v9 = vld [vmem:[#allocation50_spill] sm:$0xff]  ;;  %v9088_v14 = vld [vmem:[#allocation51_spill] sm:$0xff] }
 0x53e   : >> { %v9031_v12 = vmov %v8002_v50  ;;  %v8010_v7 = vadd.f32 %v4396_v22, %v2854_v20   ;;  %v2912_v0 = vpop.f32.mrb[3].mxu1  ;;  %v9054_v20 = vld [vmem:[#allocation16_spill] sm:$0xff]  ;;  %v9125_v9 = vmov (%p8052_p9), %v9023_v8 }
 0x53f   : >> { %v9033_v44 = vmov %v8006_v1  ;;  %v8012_v41 = vadd.f32 %v2912_v0, %v2852_v45   ;;  %v9039_v1 = vld [vmem:[#allocation20_spill] sm:$0xff]  ;;  %v2866_v22 = vmul.f32 %v9054_v20, %v5738_v60  ;;  %v2864_v45 = vmul.f32 %v9055_v2, %v5734_v59  ;;  %v9090_v20 = vld [vmem:[#allocation48_spill] sm:$0xff]  ;;  %v9099_v2 = vld [vmem:[#allocation39_spill] sm:$0xff] }
 0x540   : >> { %v9035_v25 = vmov %v8010_v7  ;;  %v2858_v55 = vmul.f32 %v9039_v1, %v7934_v27  ;;  %v9070_v6 = vmov %v9031_v12  ;;  %v9094_v59 = vld [vmem:[#allocation44_spill] sm:$0xff]  ;;  %v9127_v14 = vld [vmem:[#allocation58_spill] sm:$0xff] (%p8052_p9)  ;;  %v9138_v2 = vld [vmem:[#allocation49_spill] sm:$0xff] (%p8052_p9) }
 0x541   : >> { %v9069_v57 = vmov %v9035_v25  ;;  %v9071_v58 = vmov %v8012_v41  ;;  %v9129_v20 = vld [vmem:[#allocation60_spill] sm:$0xff] (%p8052_p9) }
 0x542   : > { %v9133_v59 = vld [vmem:[#allocation56_spill] sm:$0xff] (%p8052_p9) }
 0x544   : >> { %v4399_v16 = vpop.f32.mrb[4].mxu1 }
 0x545   : >> { %v8018_v53 = vadd.f32 %v4399_v16, %v2857_v34   ;;  %v2925_v33 = vpop.f32.mrb[5].mxu1  ;;  %v9083_v16 = vld [vmem:[#allocation57_spill] sm:$0xff] }
 0x546   : >> { %v8022_v39 = vadd.f32 %v2925_v33, %v2855_v3   ;;  %v4400_v61 = vpop.f32.mrb[6].mxu1  ;;  %v9078_v3 = vld [vmem:[#allocation58_spill] sm:$0xff]  ;;  %v9122_v16 = vmov (%p8052_p9), %v9028_v43 }
 0x547   : >> { %v9038_v51 = vmov %v8018_v53  ;;  %v8026_v4 = vadd.f32 %v4400_v61, %v2858_v55   ;;  %v2928_v13 = vpop.f32.mrb[7].mxu1  ;;  %v9074_v61 = vmov %v9026_v47  ;;  %v9102_v55 = vld [vmem:[#allocation34_spill] sm:$0xff] }
 0x548   : >> { %v9040_v17 = vmov %v8022_v39  ;;  %v8028_v34 = vadd.f32 %v2928_v13, %v2856_v19   ;;  %v9066_v53 = vmov %v9038_v51  ;;  %v9077_v39 = vld [vmem:[#allocation59_spill] sm:$0xff]  ;;  %v9080_v13 = vld [vmem:[#allocation60_spill] sm:$0xff]  ;;  %v9087_v19 = vld [vmem:[#allocation53_spill] sm:$0xff] }
 0x549   : >> { %v9042_v26 = vmov %v8026_v4  ;;  %v2860_v4 = vmul.f32 %v9049_v24, %v5730_v15  ;;  %v9068_v60 = vmov %v9040_v17  ;;  %v9097_v24 = vld [vmem:[#allocation41_spill] sm:$0xff]  ;;  %v9117_v3 = vmov (%p8052_p9), %v9040_v17  ;;  %v9126_v19 = vld [vmem:[#allocation59_spill] sm:$0xff] (%p8052_p9)  ;;  %v9141_v55 = vld [vmem:[#allocation46_spill] sm:$0xff] (%p8052_p9) }
 0x54a   : >> { %v9043_v40 = vmov %v8028_v34  ;;  %v9119_v13 = vmov (%p8052_p9), %v9031_v12  ;;  %v9136_v24 = vld [vmem:[#allocation53_spill] sm:$0xff] (%p8052_p9)  ;;  %v9145_v12 = vld [vmem:[#allocation42_spill] sm:$0xff] (%p8052_p9) }
 0x54b   : >> { %v9067_v34 = vmov %v9043_v40  ;;  %v9116_v39 = vmov (%p8052_p9), %v9043_v40  ;;  %v9149_v17 = vld [vmem:[#allocation38_spill] sm:$0xff] (%p8052_p9) }
 0x54c   : >> { %v4403_v36 = vpop.f32.mrb[8].mxu1 }
 0x54d   : >> { %v8033_v1 = vadd.f32 %v4403_v36, %v2861_v21   ;;  %v2941_v27 = vpop.f32.mrb[9].mxu1  ;;  %v9101_v36 = vld [vmem:[#allocation36_spill] sm:$0xff]  ;;  %v9104_v21 = vld [vmem:[#allocation35_spill] sm:$0xff] }
 0x54e   : >> { %v8037_v33 = vadd.f32 %v2941_v27, %v2859_v32   ;;  %v4404_v23 = vpop.f32.mrb[10].mxu1  ;;  %v9093_v27 = vld [vmem:[#allocation45_spill] sm:$0xff]  ;;  %v9140_v36 = vld [vmem:[#allocation47_spill] sm:$0xff] (%p8052_p9)  ;;  %v9143_v21 = vld [vmem:[#allocation44_spill] sm:$0xff] (%p8052_p9) }
 0x54f   : >> { %v9046_v28 = vmov %v8033_v1  ;;  %v8040_v5 = vadd.f32 %v4404_v23, %v2862_v46   ;;  %v2944_v18 = vpop.f32.mrb[11].mxu1  ;;  %v9072_v1 = vmov %v9033_v44  ;;  %v9079_v46 = vld [vmem:[#allocation61_spill] sm:$0xff]  ;;  %v9098_v23 = vld [vmem:[#allocation40_spill] sm:$0xff] }
 0x550   : >> { %v9048_v56 = vmov %v8037_v33  ;;  %v8042_v7 = vadd.f32 %v2944_v18, %v2860_v4   ;;  %9062 = vst [vmem:[#allocation14_spill] sm:$0xff] %v9046_v28  ;;  %v9065_v4 = vmov %v9042_v26  ;;  %v9091_v18 = vld [vmem:[#allocation47_spill] sm:$0xff]  ;;  %v9103_v32 = vld [vmem:[#allocation37_spill] sm:$0xff]  ;;  %v9111_v1 = vmov (%p8052_p9), %v9046_v28 }
 0x551   : >> { %v9050_v48 = vmov %v8040_v5  ;;  %v9064_v33 = vmov %v9048_v56  ;;  %v9076_v5 = vmov %v9023_v8  ;;  %v9113_v61 = vmov (%p8052_p9), %v9048_v56  ;;  %v9130_v18 = vld [vmem:[#allocation55_spill] sm:$0xff] (%p8052_p9)  ;;  %v9132_v27 = vld [vmem:[#allocation57_spill] sm:$0xff] (%p8052_p9) }
 0x552   : >> { %v9051_v30 = vmov %v8042_v7  ;;  %9061 = vst [vmem:[#allocation13_spill] sm:$0xff] %v9050_v48  ;;  %v9073_v7 = vmov %v9028_v43  ;;  %v9110_v58 = vmov (%p8052_p9), %v9050_v48  ;;  %v9115_v5 = vmov (%p8052_p9), %v9038_v51  ;;  %v9137_v23 = vld [vmem:[#allocation51_spill] sm:$0xff] (%p8052_p9)  ;;  %v9142_v32 = vld [vmem:[#allocation45_spill] sm:$0xff] (%p8052_p9) }
 0x553   : >> { %9063 = vst [vmem:[#allocation15_spill] sm:$0xff] %v9051_v30  ;;  %v9112_v7 = vmov (%p8052_p9), %v9051_v30  ;;  %v9118_v46 = vmov (%p8052_p9), %v9035_v25  ;;  %v9144_v51 = vld [vmem:[#allocation43_spill] sm:$0xff] (%p8052_p9)  ;;  %v9146_v43 = vld [vmem:[#allocation41_spill] sm:$0xff] (%p8052_p9) }
 0x554   : >> { %v4407_v50 = vpop.f32.mrb[12].mxu1  ;;  %v9153_v8 = vld [vmem:[#allocation35_spill] sm:$0xff] (%p8052_p9) }
 0x555   : >> { %v2986_v31 = vadd.f32 %v4407_v50, %v2865_v37   ;;  %v2957_v35 = vpop.f32.mrb[13].mxu1  ;;  %v9082_v37 = vld [vmem:[#allocation54_spill] sm:$0xff] }
 0x556   : >> { %v2984_v63 = vadd.f32 %v2957_v35, %v2863_v62   ;;  %v4408_v49 = vpop.f32.mrb[14].mxu1  ;;  %v9075_v62 = vmov %v9024_v38  ;;  %v9100_v35 = vld [vmem:[#allocation38_spill] sm:$0xff]  ;;  %v9121_v37 = vmov (%p8052_p9), %v9033_v44  ;;  %v9150_v44 = vld [vmem:[#allocation36_spill] sm:$0xff] (%p8052_p9) }
 0x557   : >> { %v2987_v54 = vadd.f32 %v4408_v49, %v2866_v22   ;;  %v2960_v15 = vpop.f32.mrb[15].mxu1  ;;  %v9058_v49 = vmov %v2986_v31  ;;  %v9081_v22 = vld [vmem:[#allocation55_spill] sm:$0xff]  ;;  %2472 = sbr.rel (!%p8052_p9) target bundleno = 712 (0x2c8), region = 74  ;;  %v9107_v60 = vmov (%p8052_p9), %v2986_v31  ;;  %v9114_v62 = vmov (%p8052_p9), %v9042_v26  ;;  %v9139_v35 = vld [vmem:[#allocation48_spill] sm:$0xff] (%p8052_p9)  ;;  %v9151_v38 = vld [vmem:[#allocation34_spill] sm:$0xff] (%p8052_p9) }
 0x558   : >> { %v2985_v52 = vadd.f32 %v2960_v15, %v2864_v45   ;;  %v9060_v50 = vmov %v2984_v63  ;;  %v9084_v45 = vld [vmem:[#allocation56_spill] sm:$0xff]  ;;  %v9089_v15 = vld [vmem:[#allocation49_spill] sm:$0xff]  ;;  %v9109_v6 = vmov (%p8052_p9), %v2984_v63  ;;  %v9120_v22 = vmov (%p8052_p9), %v8012_v41  ;;  %v9148_v63 = vld [vmem:[#allocation39_spill] sm:$0xff] (%p8052_p9) }
 0x559   : >> { %v9057_v0 = vmov %v2987_v54  ;;  %v9106_v34 = vmov (%p8052_p9), %v2987_v54  ;;  %v9123_v45 = vmov (%p8052_p9), %v9026_v47  ;;  %v9128_v15 = vld [vmem:[#allocation61_spill] sm:$0xff] (%p8052_p9)  ;;  %v9147_v41 = vld [vmem:[#allocation40_spill] sm:$0xff] (%p8052_p9) }
 0x55a   : >> { %9059 = vst [vmem:[#allocation12_spill] sm:$0xff] %v2985_v52  ;;  %v9108_v57 = vmov (%p8052_p9), %v2985_v52  ;;  %v9152_v47 = vld [vmem:[#allocation37_spill] sm:$0xff] (%p8052_p9) }
 0x55e PF: > { %9154 = vst [vmem:[#allocation62_spill] sm:$0xff] %v6461_v34  ;;  %9155 = vst [vmem:[#allocation63_spill] sm:$0xff] %v6465_v60  ;;  %s4056_s17 = sshll.u32 %s6245_s9, 6  ;;  %v9172_v30 = vld [vmem:[#allocation4_spill] sm:$0xff]  ;;  %v9173_v26 = vld [vmem:[#allocation5_spill] sm:$0xff]  ;;  %v6649_v8 = vphi %v7451_v8, %v9153_v8   ;;  %v6645_v47 = vphi %v7449_v47, %v9152_v47   ;;  %v6641_v38 = vphi %v7447_v38, %v9151_v38   ;;  %v6637_v44 = vphi %v7445_v44, %v9150_v44   ;;  %v6633_v17 = vphi %v7443_v17, %v9149_v17   ;;  %v6629_v63 = vphi %v7441_v63, %v9148_v63   ;;  %v6625_v41 = vphi %v7439_v41, %v9147_v41   ;;  %v6621_v43 = vphi %v7437_v43, %v9146_v43   ;;  %v6617_v12 = vphi %v7435_v12, %v9145_v12   ;;  %v6613_v51 = vphi %v7433_v51, %v9144_v51   ;;  %v6609_v21 = vphi %v7431_v21, %v9143_v21   ;;  %v6605_v32 = vphi %v7429_v32, %v9142_v32   ;;  %v6601_v55 = vphi %v7427_v55, %v9141_v55   ;;  %v6597_v36 = vphi %v7425_v36, %v9140_v36   ;;  %v6593_v35 = vphi %v7423_v35, %v9139_v35   ;;  %v6589_v2 = vphi %v7421_v2, %v9138_v2   ;;  %v6585_v23 = vphi %v7419_v23, %v9137_v23   ;;  %v6581_v24 = vphi %v7417_v24, %v9136_v24   ;;  %v6577_v42 = vphi %v7415_v42, %v9135_v42   ;;  %v6573_v29 = vphi %v7413_v29, %v9134_v29   ;;  %v6569_v59 = vphi %v7411_v59, %v9133_v59   ;;  %v6565_v27 = vphi %v7409_v27, %v9132_v27   ;;  %v6561_v11 = vphi %v7407_v11, %v9131_v11   ;;  %v6557_v18 = vphi %v7405_v18, %v9130_v18   ;;  %v6553_v20 = vphi %v7403_v20, %v9129_v20   ;;  %v6549_v15 = vphi %v7401_v15, %v9128_v15   ;;  %v6545_v14 = vphi %v7399_v14, %v9127_v14   ;;  %v6541_v19 = vphi %v7397_v19, %v9126_v19   ;;  %v6537_v9 = vphi %v7395_v9, %v9125_v9   ;;  %v6533_v10 = vphi %v7393_v10, %v9124_v10   ;;  %v6529_v45 = vphi %v7391_v45, %v9123_v45   ;;  %v6525_v16 = vphi %v7389_v16, %v9122_v16   ;;  %v6521_v37 = vphi %v7387_v37, %v9121_v37   ;;  %v6517_v22 = vphi %v7385_v22, %v9120_v22   ;;  %v6513_v13 = vphi %v7383_v13, %v9119_v13   ;;  %v6509_v46 = vphi %v7381_v46, %v9118_v46   ;;  %v6505_v3 = vphi %v7379_v3, %v9117_v3   ;;  %v6501_v39 = vphi %v7377_v39, %v9116_v39   ;;  %v6497_v5 = vphi %v7375_v5, %v9115_v5   ;;  %v6493_v62 = vphi %v7373_v62, %v9114_v62   ;;  %v6489_v61 = vphi %v7371_v61, %v9113_v61   ;;  %v6485_v7 = vphi %v7369_v7, %v9112_v7   ;;  %v6481_v1 = vphi %v7367_v1, %v9111_v1   ;;  %v6477_v58 = vphi %v7365_v58, %v9110_v58   ;;  %v6473_v6 = vphi %v7363_v6, %v9109_v6   ;;  %v6469_v57 = vphi %v7361_v57, %v9108_v57   ;;  %v6465_v60 = vphi %v7359_v60, %v9107_v60   ;;  %v6461_v34 = vphi %v7357_v34, %v9106_v34  }
 0x55f   : > { %9156 = vst [vmem:[#allocation64_spill] sm:$0xff] %v6469_v57  ;;  %9157 = vst [vmem:[#allocation65_spill] sm:$0xff] %v6473_v6  ;;  %4425 = vmatprep.mubr.bf16.mxu0 %v9172_v30  ;;  %s2990_s18 = scalar_lea.vmem [#allocation3], %s4056_s17  ;;  %v9174_v0 = vld [vmem:[#allocation6_spill] sm:$0xff]  ;;  %v9175_v53 = vld [vmem:[#allocation7_spill] sm:$0xff] }
 0x560   : > { %9158 = vst [vmem:[#allocation66_spill] sm:$0xff] %v6477_v58  ;;  %9159 = vst [vmem:[#allocation67_spill] sm:$0xff] %v6481_v1  ;;  %v2991_v48 = vld [vmem:[%s2990_s18] sm:$0xff]  ;;  %v2992_v40 = vld [vmem:[%s2990_s18 + $0x8] sm:$0xff] }
 0x561   : > { %9160 = vst [vmem:[#allocation68_spill] sm:$0xff] %v6485_v7  ;;  %9161 = vst [vmem:[#allocation69_spill] sm:$0xff] %v6489_v61  ;;  %4409 = vmatprep.subr.bf16.mxu0 %v2991_v48  ;;  %v2993_v56 = vld [vmem:[%s2990_s18 + $0x10] sm:$0xff]  ;;  %v2994_v28 = vld [vmem:[%s2990_s18 + $0x18] sm:$0xff] }
 0x562   : > { %9162 = vst [vmem:[#allocation70_spill] sm:$0xff] %v6493_v62  ;;  %9163 = vst [vmem:[#allocation71_spill] sm:$0xff] %v6497_v5  ;;  %4410 = vmatpush3.bf16.msra.mxu0 %v2991_v48  ;;  %v2995_v54 = vld [vmem:[%s2990_s18 + $0x20] sm:$0xff]  ;;  %v2996_v31 = vld [vmem:[%s2990_s18 + $0x28] sm:$0xff] }
 0x563   : > { %9164 = vst [vmem:[#allocation72_spill] sm:$0xff] %v6501_v39  ;;  %9165 = vst [vmem:[#allocation73_spill] sm:$0xff] %v6505_v3  ;;  %4411 = vmatprep.subr.bf16.mxu0 %v2992_v40  ;;  %v2997_v52 = vld [vmem:[%s2990_s18 + $0x30] sm:$0xff]  ;;  %v2998_v25 = vld [vmem:[%s2990_s18 + $0x38] sm:$0xff] }
 0x564   : > { %9166 = vst [vmem:[#allocation74_spill] sm:$0xff] %v6509_v46  ;;  %9167 = vst [vmem:[#allocation75_spill] sm:$0xff] %v6517_v22  ;;  %v9176_v33 = vld [vmem:[#allocation8_spill] sm:$0xff]  ;;  %v9177_v4 = vld [vmem:[#allocation9_spill] sm:$0xff] }
 0x565   : > { %9168 = vst [vmem:[#allocation76_spill] sm:$0xff] %v6525_v16  ;;  %9169 = vst [vmem:[#allocation77_spill] sm:$0xff] %v6529_v45  ;;  %v9178_v50 = vld [vmem:[#allocation10_spill] sm:$0xff]  ;;  %v9179_v49 = vld [vmem:[#allocation11_spill] sm:$0xff] }
 0x566   : > { %9170 = vst [vmem:[#allocation78_spill] sm:$0xff] %v6533_v10  ;;  %9171 = vst [vmem:[#allocation79_spill] sm:$0xff] %v6537_v9  ;;  %4412 = vmatpush3.bf16.msra.mxu0 %v2992_v40  ;;  %v3355_v30 = vld [vmem:[%s7330_s3 + $0x8] sm:$0xff]  ;;  %v3356_v48 = vld [vmem:[%s7330_s3 + $0x18] sm:$0xff]  ;;  %v3096_v40 = vlaneseq }
 0x567   : > { %4413 = vmatprep.subr.bf16.mxu0 %v2993_v56  ;;  %4441 = vmatprep.subr.bf16.mxu1 %v3355_v30  ;;  %v3357_v60 = vld [vmem:[%s7330_s3 + $0x28] sm:$0xff]  ;;  %v3358_v58 = vld [vmem:[%s7330_s3 + $0x38] sm:$0xff] }
 0x568   : > { %4442 = vmatpush3.bf16.msra.mxu1 %v3355_v30  ;;  %v3359_v39 = vld [vmem:[%s7330_s3 + $0x48] sm:$0xff] }
 0x569   : > { %4443 = vmatprep.subr.bf16.mxu1 %v3356_v48 }
 0x56a   : > { %4414 = vmatpush3.bf16.msra.mxu0 %v2993_v56  ;;  %v8497_v56 = vshrl.u32 %v3096_v40, 7 }
 0x56b   : > { %4415 = vmatprep.subr.bf16.mxu0 %v2994_v28 }
 0x56c   : > { %4444 = vmatpush3.bf16.msra.mxu1 %v3356_v48  ;;  %v3104_v30 = vadd.s32 40, %v8497_v56 }
 0x56d   : > { %4445 = vmatprep.subr.bf16.mxu1 %v3357_v60 }
 0x56e   : > { %4416 = vmatpush3.bf16.msra.mxu0 %v2994_v28  ;;  %v8499_v28 = vand.u32 127, %v3096_v40  ;;  %v3105_v40 = vadd.s32 48, %v8497_v56 }
 0x56f   : > { %4417 = vmatprep.subr.bf16.mxu0 %v2995_v54 }
 0x570   : > { %vm3115_vm1 = vcmp.le.s32.totalorder %v8499_v28, %v8497_v56  ;;  %vm3120_vm5 = vcmp.le.s32.totalorder %v8499_v28, %v3104_v30  ;;  %vm3121_vm6 = vcmp.le.s32.totalorder %v8499_v28, %v3105_v40  ;;  %4446 = vmatpush3.bf16.msra.mxu1 %v3357_v60 }
 0x571   : > { %4447 = vmatprep.subr.bf16.mxu1 %v3358_v58 }
 0x572   : > { %4418 = vmatpush3.bf16.msra.mxu0 %v2995_v54  ;;  %v3101_v54 = vadd.s32 16, %v8497_v56 }
 0x573   : > { %4419 = vmatprep.subr.bf16.mxu0 %v2996_v31 }
 0x574   : > { %vm3117_vm0 = vcmp.le.s32.totalorder %v8499_v28, %v3101_v54  ;;  %4448 = vmatpush3.bf16.msra.mxu1 %v3358_v58 }
 0x575   : > { %4449 = vmatprep.subr.bf16.mxu1 %v3359_v39 }
 0x576   : > { %4420 = vmatpush3.bf16.msra.mxu0 %v2996_v31  ;;  %v3102_v31 = vadd.s32 24, %v8497_v56 }
 0x577   : > { %4421 = vmatprep.subr.bf16.mxu0 %v2997_v52 }
 0x578   : > { %vm3118_vm2 = vcmp.le.s32.totalorder %v8499_v28, %v3102_v31  ;;  %4450 = vmatpush3.bf16.msra.mxu1 %v3359_v39 }
 0x57a   : > { %4422 = vmatpush3.bf16.msra.mxu0 %v2997_v52  ;;  %v3100_v52 = vadd.s32 8, %v8497_v56 }
 0x57b   : > { %4423 = vmatprep.subr.bf16.mxu0 %v2998_v25 }
 0x57c   : > { %vm3116_vm3 = vcmp.le.s32.totalorder %v8499_v28, %v3100_v52  ;;  %v3106_v52 = vadd.s32 56, %v8497_v56 }
 0x57e   : > { %4424 = vmatpush3.bf16.msra.mxu0 %v2998_v25  ;;  %vm3122_vm7 = vcmp.le.s32.totalorder %v8499_v28, %v3106_v52  ;;  %v3110_v52 = vadd.s32 88, %v8497_v56 }
 0x580   : > { %vm3126_vm11 = vcmp.le.s32.totalorder %v8499_v28, %v3110_v52 }
 0x581   : > { %4426 = vmatmul.mubr.bf16.vlgmr.msra.gmra.mrb[0].mxu0 %v9173_v26 }
 0x582   : > { %4429 = vmatprep.mubr.bf16.mxu0 %v9174_v0 }
 0x589   : > { %4430 = vmatmul.mubr.bf16.gmra.mrb[4].mxu0 %v9175_v53 }
 0x58a   : > { %4433 = vmatprep.mubr.bf16.mxu0 %v9176_v33 }
 0x591   : > { %4434 = vmatmul.mubr.bf16.gmra.mrb[8].mxu0 %v9177_v4 }
 0x592   : > { %4437 = vmatprep.mubr.bf16.mxu0 %v9178_v50  ;;  %v3103_v50 = vadd.s32 32, %v8497_v56 }
 0x594   : > { %vm3119_vm4 = vcmp.le.s32.totalorder %v8499_v28, %v3103_v50  ;;  %v3108_v50 = vadd.s32 72, %v8497_v56 }
 0x596   : > { %vm3124_vm9 = vcmp.le.s32.totalorder %v8499_v28, %v3108_v50  ;;  %v3112_v50 = vadd.s32 104, %v8497_v56 }
 0x598   : > { %vm3128_vm13 = vcmp.le.s32.totalorder %v8499_v28, %v3112_v50 }
 0x599   : > { %4438 = vmatmul.mubr.bf16.gmra.mrb[12].mxu0 %v9179_v49 }
 0x654   : > { %v4427_v25 = vpop.f32.mrb[0].mxu0 }
 0x655   : > { %v3033_v26 = vpop.f32.mrb[1].mxu0  ;;  %v8507_v0 = vsel %vm3117_vm0, %v4427_v25, -inf  ;;  %vm3580_vm0 = vcmask 523264  }
 0x656   : > { %3151 = vmax.xlane.f32.xlu1 %v8507_v0  ;;  %v4428_v53 = vpop.f32.mrb[2].mxu0  ;;  %v8510_v33 = vsel %vm3115_vm1, %v3033_v26, -inf }
 0x657   : > { %3147 = vmax.xlane.f32.xlu0 %v8510_v33  ;;  %v3036_v4 = vpop.f32.mrb[3].mxu0  ;;  %v8516_v49 = vsel %vm3118_vm2, %v4428_v53, -inf }
 0x658   : > { %v8520_v48 = vsel %vm3116_vm3, %v3036_v4, -inf  ;;  %v3107_v4 = vadd.s32 64, %v8497_v56 }
 0x65a   : > { %3153 = vmax.xlane.f32.xlu1 %v8516_v49  ;;  %vm3123_vm8 = vcmp.le.s32.totalorder %v8499_v28, %v3107_v4 }
 0x65b   : > { %3149 = vmax.xlane.f32.xlu0 %v8520_v48 }
 0x65c   : > { %v4431_v54 = vpop.f32.mrb[4].mxu0 }
 0x65d   : > { %v3049_v31 = vpop.f32.mrb[5].mxu0  ;;  %v8537_v30 = vsel %vm3121_vm6, %v4431_v54, -inf }
 0x65e   : > { %v4432_v25 = vpop.f32.mrb[6].mxu0  ;;  %v8527_v26 = vsel %vm3119_vm4, %v3049_v31, -inf  ;;  %v3109_v31 = vadd.s32 80, %v8497_v56 }
 0x65f   : > { %3155 = vmax.xlane.f32.xlu0 %v8527_v26  ;;  %v3052_v53 = vpop.f32.mrb[7].mxu0  ;;  %v8542_v34 = vsel %vm3122_vm7, %v4432_v25, -inf  ;;  %v3111_v25 = vadd.s32 96, %v8497_v56 }
 0x660   : > { %v8532_v57 = vsel %vm3120_vm5, %v3052_v53, -inf  ;;  %vm3125_vm10 = vcmp.le.s32.totalorder %v8499_v28, %v3109_v31  ;;  %v3113_v31 = vadd.s32 112, %v8497_v56 }
 0x661   : > { %3157 = vmax.xlane.f32.xlu1 %v8532_v57  ;;  %vm3127_vm12 = vcmp.le.s32.totalorder %v8499_v28, %v3111_v25 }
 0x662   : > { %vm3129_vm14 = vcmp.le.s32.totalorder %v8499_v28, %v3113_v31  ;;  %v3361_v31 = vld [vmem:[%s7330_s3 + $0x68] sm:$0xff] }
 0x663   : > { %3159 = vmax.xlane.f32.xlu0 %v8537_v30 }
 0x664   : > { %v4435_v40 = vpop.f32.mrb[8].mxu0 }
 0x665   : > { %3161 = vmax.xlane.f32.xlu1 %v8542_v34  ;;  %v3065_v53 = vpop.f32.mrb[9].mxu0 }
 0x666   : > { %v4436_v6 = vpop.f32.mrb[10].mxu0  ;;  %v8547_v54 = vsel %vm3123_vm8, %v3065_v53, -inf  ;;  %v8558_v53 = vsel %vm3125_vm10, %v4435_v40, -inf  ;;  %v3114_v40 = vadd.s32 120, %v8497_v56  ;;  %v3360_v56 = vld [vmem:[%s7330_s3 + $0x58] sm:$0xff] }
 0x667   : > { %3163 = vmax.xlane.f32.xlu0 %v8547_v54  ;;  %v3068_v4 = vpop.f32.mrb[11].mxu0  ;;  %v8564_v61 = vsel %vm3126_vm11, %v4436_v6, -inf  ;;  %4451 = vmatprep.subr.bf16.mxu1 %v3360_v56 }
 0x668   : > { %v8553_v7 = vsel %vm3124_vm9, %v3068_v4, -inf  ;;  %vm3130_vm15 = vcmp.le.s32.totalorder %v8499_v28, %v3114_v40  ;;  %4452 = vmatpush3.bf16.msra.mxu1 %v3360_v56 }
 0x669   : > { %3165 = vmax.xlane.f32.xlu1 %v8553_v7  ;;  %4453 = vmatprep.subr.bf16.mxu1 %v3361_v31 }
 0x66b   : > { %3167 = vmax.xlane.f32.xlu0 %v8558_v53 }
 0x66c   : > { %v4439_v4 = vpop.f32.mrb[12].mxu0  ;;  %4454 = vmatpush3.bf16.msra.mxu1 %v3361_v31 }
 0x66d   : > { %3169 = vmax.xlane.f32.xlu1 %v8564_v61  ;;  %v3081_v60 = vpop.f32.mrb[13].mxu0  ;;  %v8578_v6 = vsel %vm3129_vm14, %v4439_v4, -inf }
 0x66e   : > { %v4440_v52 = vpop.f32.mrb[14].mxu0  ;;  %v8569_v1 = vsel %vm3127_vm12, %v3081_v60, -inf  ;;  %v3362_v60 = vld [vmem:[%s7330_s3 + $0x78] sm:$0xff] }
 0x66f   : > { %3171 = vmax.xlane.f32.xlu0 %v8569_v1  ;;  %v3084_v25 = vpop.f32.mrb[15].mxu0  ;;  %v8582_v50 = vsel %vm3130_vm15, %v4440_v52, -inf  ;;  %4455 = vmatprep.subr.bf16.mxu1 %v3362_v60 }
 0x670   : > { %v8574_v58 = vsel %vm3128_vm13, %v3084_v25, -inf  ;;  %4456 = vmatpush3.bf16.msra.mxu1 %v3362_v60 }
 0x671   : > { %3173 = vmax.xlane.f32.xlu1 %v8574_v58 }
 0x673   : > { %3175 = vmax.xlane.f32.xlu0 %v8578_v6 }
 0x675   : > { %3177 = vmax.xlane.f32.xlu1 %v8582_v50 }
 0x6e3   : > { %v3152_v39 = vpop.xlane.xlu1 %3151 }
 0x6e4   : > { %v8588_v28 = vmax.f32 %v6641_v38, %v3152_v39  ;;  %v3148_v4 = vpop.xlane.xlu0 %3147 }
 0x6e5   : > { %v8591_v40 = vmax.f32 %v6649_v8, %v3148_v4 }
 0x6e6   : > { %v3245_v52 = vsub.f32 %v8507_v0, %v8588_v28 }
 0x6e7   : > { %v3243_v25 = vsub.f32 %v8510_v33, %v8591_v40  ;;  %v3154_v56 = vpop.xlane.xlu1 %3153 }
 0x6e8   : > { %v3263_v62 = vmul.f32 1.442695, %v3245_v52  ;;  %v8598_v31 = vmax.f32 %v6637_v44, %v3154_v56  ;;  %v3150_v60 = vpop.xlane.xlu0 %3149 }
 0x6e9   : > { %v8601_v3 = vmax.f32 %v6645_v47, %v3150_v60  ;;  %v3259_v39 = vmul.f32 1.442695, %v3243_v25 }
 0x6ea   : > { %v3246_v4 = vsub.f32 %v8516_v49, %v8598_v31  ;;  %5739 = vpow2.f32 %v3263_v62 }
 0x6eb   : > { %v3244_v0 = vsub.f32 %v8520_v48, %v8601_v3  ;;  %5741 = vpow2.f32 %v3259_v39 }
 0x6ec   : > { %v3265_v5 = vmul.f32 1.442695, %v3246_v4  ;;  %v3156_v16 = vpop.xlane.xlu0 %3155 }
 0x6ed   : > { %v3261_v33 = vmul.f32 1.442695, %v3244_v0  ;;  %v8608_v52 = vmax.f32 %v6633_v17, %v3156_v16 }
 0x6ee   : > { %v3158_v56 = vpop.xlane.xlu1 %3157  ;;  %5743 = vpow2.f32 %v3265_v5 }
 0x6ef   : > { %v3247_v60 = vsub.f32 %v8527_v26, %v8608_v52  ;;  %v8613_v25 = vmax.f32 %v6629_v63, %v3158_v56  ;;  %5745 = vpow2.f32 %v3261_v33 }
 0x6f0   : > { %v3160_v49 = vpop.xlane.xlu0 %3159 }
 0x6f1   : > { %v3248_v62 = vsub.f32 %v8532_v57, %v8613_v25  ;;  %v8618_v48 = vmax.f32 %v6625_v41, %v3160_v49  ;;  %v3267_v16 = vmul.f32 1.442695, %v3247_v60 }
 0x6f2   : > { %v3162_v4 = vpop.xlane.xlu1 %3161 }
 0x6f3   : > { %v8621_v39 = vmax.f32 %v6621_v43, %v3162_v4  ;;  %v3269_v5 = vmul.f32 1.442695, %v3248_v62  ;;  %v3249_v26 = vsub.f32 %v8537_v30, %v8618_v48 }
 0x6f4   : > { %v3164_v0 = vpop.xlane.xlu0 %3163  ;;  %v5740_v56 = vpop.eup %5739 }
 0x6f5   : > { %v3250_v33 = vsub.f32 %v8542_v34, %v8621_v39  ;;  %v8628_v45 = vmax.f32 %v6617_v12, %v3164_v0  ;;  %5747 = vpow2.f32 %v3269_v5  ;;  %v3271_v57 = vmul.f32 1.442695, %v3249_v26  ;;  %3311 = vadd.xlane.f32.xlu0 %v5740_v56  ;;  %v5742_v4 = vpop.eup %5741 }
 0x6f6   : > { %v3166_v49 = vpop.xlane.xlu1 %3165  ;;  %5749 = vpow2.f32 %v3267_v16 }
 0x6f7   : > { %v3273_v60 = vmul.f32 1.442695, %v3250_v33  ;;  %v3251_v62 = vsub.f32 %v8547_v54, %v8628_v45  ;;  %v8633_v30 = vmax.f32 %v6613_v51, %v3166_v49  ;;  %5751 = vpow2.f32 %v3271_v57 }
 0x6f8   : > { %v3168_v22 = vpop.xlane.xlu0 %3167  ;;  %v5744_v10 = vpop.eup %5743 }
 0x6f9   : > { %v8636_v34 = vmax.f32 %v6609_v21, %v3168_v22  ;;  %v3275_v0 = vmul.f32 1.442695, %v3251_v62  ;;  %v3252_v5 = vsub.f32 %v8553_v7, %v8633_v30  ;;  %3307 = vadd.xlane.f32.xlu0 %v5742_v4  ;;  %3313 = vadd.xlane.f32.xlu1 %v5744_v10  ;;  %v5746_v26 = vpop.eup %5745  ;;  %5753 = vpow2.f32 %v3273_v60 }
 0x6fa   : > { %v3170_v16 = vpop.xlane.xlu1 %3169  ;;  %v3379_v57 = vpack.c.bf16 %v5746_v26, %v5742_v4  ;;  %v3380_v46 = vpack.c.bf16 %v5744_v10, %v5740_v56 }
 0x6fb   : > { %v3253_v54 = vsub.f32 %v8558_v53, %v8636_v34  ;;  %v8643_v33 = vmax.f32 %v6605_v32, %v3170_v16  ;;  %v3277_v49 = vmul.f32 1.442695, %v3252_v5  ;;  %5755 = vpow2.f32 %v3275_v0 }
 0x6fc   : > { %v3172_v9 = vpop.xlane.xlu0 %3171  ;;  %4457 = vmatprep.mubr.bf16.mxu1 %v3379_v57 }
 0x6fd   : > { %v3279_v22 = vmul.f32 1.442695, %v3253_v54  ;;  %v3254_v7 = vsub.f32 %v8564_v61, %v8643_v33  ;;  %v8648_v62 = vmax.f32 %v6601_v55, %v3172_v9  ;;  %3309 = vadd.xlane.f32.xlu1 %v5746_v26  ;;  %5757 = vpow2.f32 %v3277_v49  ;;  %4458 = vmatmul.mubr.bf16.vlgmr.msra.gmra.mrb[0].mxu1 %v3380_v46 }
 0x6fe   : > { %v3174_v60 = vpop.xlane.xlu1 %3173 }
 0x6ff   : > { %v8651_v53 = vmax.f32 %v6597_v36, %v3174_v60  ;;  %v5748_v5 = vpop.eup %5747  ;;  %v3281_v4 = vmul.f32 1.442695, %v3254_v7  ;;  %v3255_v10 = vsub.f32 %v8569_v1, %v8648_v62  ;;  %5759 = vpow2.f32 %v3279_v22 }
 0x700   : > { %v3176_v56 = vpop.xlane.xlu0 %3175  ;;  %v5750_v0 = vpop.eup %5749 }
 0x701   : > { %v3256_v61 = vsub.f32 %v8574_v58, %v8651_v53  ;;  %v8658_v9 = vmax.f32 %v6593_v35, %v3176_v56  ;;  %v3283_v16 = vmul.f32 1.442695, %v3255_v10  ;;  %v3381_v26 = vpack.c.bf16 %v5748_v5, %v5750_v0  ;;  %v5752_v54 = vpop.eup %5751 }
 0x702   : > { %v3178_v46 = vpop.xlane.xlu1 %3177  ;;  %5761 = vpow2.f32 %v3281_v4  ;;  %3319 = vadd.xlane.f32.xlu0 %v5752_v54 }
 0x703   : > { %v3285_v49 = vmul.f32 1.442695, %v3256_v61  ;;  %v3257_v57 = vsub.f32 %v8578_v6, %v8658_v9  ;;  %4461 = vmatprep.mubr.bf16.mxu1 %v3381_v26  ;;  %v8663_v1 = vmax.f32 %v6589_v2, %v3178_v46  ;;  %v5754_v22 = vpop.eup %5753  ;;  %5763 = vpow2.f32 %v3283_v16 }
 0x704   : > { %3321 = vadd.xlane.f32.xlu1 %v5754_v22  ;;  %v3382_v60 = vpack.c.bf16 %v5754_v22, %v5752_v54  ;;  %v3195_v22 = vsub.f32 %v6649_v8, %v8591_v40  ;;  %v3199_v8 = vsub.f32 %v6633_v17, %v8608_v52  ;;  %v3203_v40 = vsub.f32 %v6617_v12, %v8628_v45 }
 0x705   : > { %v3287_v58 = vmul.f32 1.442695, %v3257_v57  ;;  %v3258_v7 = vsub.f32 %v8582_v50, %v8663_v1  ;;  %5765 = vpow2.f32 %v3285_v49  ;;  %v5756_v10 = vpop.eup %5755  ;;  %v3197_v57 = vsub.f32 %v6641_v38, %v8588_v28 }
 0x706   : > { %3315 = vadd.xlane.f32.xlu0 %v5750_v0  ;;  %4462 = vmatmul.mubr.bf16.gmra.mrb[4].mxu1 %v3382_v60  ;;  %v3201_v38 = vsub.f32 %v6625_v41, %v8618_v48  ;;  %v3206_v17 = vsub.f32 %v6605_v32, %v8643_v33  ;;  %v3204_v33 = vsub.f32 %v6613_v51, %v8633_v30 }
 0x707   : > { %v3289_v4 = vmul.f32 1.442695, %v3258_v7  ;;  %v5758_v56 = vpop.eup %5757  ;;  %5767 = vpow2.f32 %v3287_v58  ;;  %v3198_v58 = vsub.f32 %v6637_v44, %v8598_v31  ;;  %v3196_v7 = vsub.f32 %v6645_v47, %v8601_v3 }
 0x708   : > { %3317 = vadd.xlane.f32.xlu1 %v5748_v5  ;;  %v3383_v6 = vpack.c.bf16 %v5758_v56, %v5756_v10  ;;  %v3215_v60 = vmul.f32 1.442695, %v3197_v57  ;;  %v3202_v44 = vsub.f32 %v6621_v43, %v8621_v39  ;;  %v3200_v3 = vsub.f32 %v6629_v63, %v8613_v25 }
 0x709   : > { %v5760_v61 = vpop.eup %5759  ;;  %5769 = vpow2.f32 %v3289_v4  ;;  %v3217_v4 = vmul.f32 1.442695, %v3198_v58  ;;  %v3223_v28 = vmul.f32 1.442695, %v3201_v38  ;;  %v3227_v25 = vmul.f32 1.442695, %v3203_v40 }
 0x70a   : > { %4465 = vmatprep.mubr.bf16.mxu1 %v3383_v6  ;;  %3327 = vadd.xlane.f32.xlu0 %v5760_v61  ;;  %5771 = vpow2.f32 %v3215_v60  ;;  %v3225_v48 = vmul.f32 1.442695, %v3202_v44  ;;  %v3221_v39 = vmul.f32 1.442695, %v3200_v3 }
 0x70c   : > { %v5762_v16 = vpop.eup %5761 }
 0x70d   : > { %3329 = vadd.xlane.f32.xlu1 %v5762_v16  ;;  %v3384_v26 = vpack.c.bf16 %v5762_v16, %v5760_v61  ;;  %v5764_v46 = vpop.eup %5763  ;;  %v3219_v16 = vmul.f32 1.442695, %v3199_v8 }
 0x70e   : > { %3323 = vadd.xlane.f32.xlu0 %v5756_v10  ;;  %v3211_v10 = vmul.f32 1.442695, %v3195_v22  ;;  %v3229_v22 = vmul.f32 1.442695, %v3204_v33 }
 0x70f   : > { %v5766_v50 = vpop.eup %5765  ;;  %4466 = vmatmul.mubr.bf16.gmra.mrb[8].mxu1 %v3384_v26  ;;  %v3205_v26 = vsub.f32 %v6609_v21, %v8636_v34  ;;  %v3233_v34 = vmul.f32 1.442695, %v3206_v17 }
 0x710   : > { %v3385_v54 = vpack.c.bf16 %v5766_v50, %v5764_v46  ;;  %5773 = vpow2.f32 %v3211_v10 }
 0x711   : > { %3325 = vadd.xlane.f32.xlu1 %v5758_v56  ;;  %v5768_v49 = vpop.eup %5767  ;;  %v3213_v56 = vmul.f32 1.442695, %v3196_v7  ;;  %5775 = vpow2.f32 %v3217_v4 }
 0x712   : > { %3331 = vadd.xlane.f32.xlu0 %v5764_v46  ;;  %4469 = vmatprep.mubr.bf16.mxu1 %v3385_v54  ;;  %v3231_v46 = vmul.f32 1.442695, %v3205_v26 }
 0x713   : > { %v5770_v0 = vpop.eup %5769  ;;  %5777 = vpow2.f32 %v3213_v56 }
 0x714   : > { %v3386_v5 = vpack.c.bf16 %v5770_v0, %v5768_v49  ;;  %v8687_v41 = vpop.eup %5771  ;;  %5779 = vpow2.f32 %v3223_v28 }
 0x715   : > { %3333 = vadd.xlane.f32.xlu1 %v5766_v50  ;;  %5781 = vpow2.f32 %v3219_v16  ;;  %v3293_v21 = vmul.f32 %v6577_v42, %v8687_v41  ;;  %v3207_v42 = vsub.f32 %v6601_v55, %v8648_v62 }
 0x716   : > { %3335 = vadd.xlane.f32.xlu0 %v5768_v49  ;;  %5783 = vpow2.f32 %v3225_v48 }
 0x717   : > { %4470 = vmatmul.mubr.bf16.gmra.mrb[12].mxu1 %v3386_v5  ;;  %5785 = vpow2.f32 %v3221_v39  ;;  %v3235_v58 = vmul.f32 1.442695, %v3207_v42 }
 0x718   : > { %5787 = vpow2.f32 %v3227_v25 }
 0x719   : > { %3337 = vadd.xlane.f32.xlu1 %v5770_v0  ;;  %5789 = vpow2.f32 %v3231_v46 }
 0x71a   : > { %v8691_v52 = vpop.eup %5773  ;;  %5791 = vpow2.f32 %v3233_v34 }
 0x71b   : > { %v8693_v63 = vpop.eup %5775  ;;  %v3291_v32 = vmul.f32 %v6585_v23, %v8691_v52  ;;  %v3208_v23 = vsub.f32 %v6597_v36, %v8651_v53  ;;  %v3363_v42 = vmul.f32 %v6521_v37, %v8691_v52  ;;  %v9184_v52 = vld [vmem:[#allocation77_spill] sm:$0xff] }
 0x71c   : > { %v3294_v54 = vmul.f32 %v6573_v29, %v8693_v63  ;;  %v3209_v29 = vsub.f32 %v6593_v35, %v8658_v9 }
 0x71d   : > { %v8695_v45 = vpop.eup %5777  ;;  %v3237_v55 = vmul.f32 1.442695, %v3208_v23 }
 0x71e   : > { %v3292_v0 = vmul.f32 %v6581_v24, %v8695_v45  ;;  %v3210_v24 = vsub.f32 %v6589_v2, %v8663_v1  ;;  %v8715_v7 = vpop.eup %5779  ;;  %v3239_v36 = vmul.f32 1.442695, %v3209_v29 }
 0x71f   : > { %v8717_v60 = vpop.eup %5781  ;;  %v3297_v2 = vmul.f32 %v6561_v11, %v8715_v7 }
 0x720   : > { %v8719_v53 = vpop.eup %5783  ;;  %v3241_v10 = vmul.f32 1.442695, %v3210_v24  ;;  %v3295_v4 = vmul.f32 %v6569_v59, %v8717_v60  ;;  %v9183_v24 = vld [vmem:[#allocation75_spill] sm:$0xff] }
 0x721   : > { %v8721_v9 = vpop.eup %5785 }
 0x722   : > { %v8725_v1 = vpop.eup %5787  ;;  %v3296_v11 = vmul.f32 %v6565_v27, %v8721_v9 }
 0x723   : > { %v8729_v56 = vpop.eup %5789  ;;  %v3299_v17 = vmul.f32 %v6553_v20, %v8725_v1 }
 0x724   : > { %v8735_v38 = vpop.eup %5791  ;;  %v3301_v27 = vmul.f32 %v6545_v14, %v8729_v56 }
 0x782   : > { %v3312_v6 = vpop.xlane.xlu0 %3311 }
 0x783   : > { %v3341_v50 = vadd.f32 %v3312_v6, %v3293_v21  ;;  %v3302_v21 = vmul.f32 %v6541_v19, %v8735_v38 }
 0x785   : > { %5793 = vrcp.f32 %v3341_v50 }
 0x786   : > { %v3314_v61 = vpop.xlane.xlu1 %3313  ;;  %v3308_v47 = vpop.xlane.xlu0 %3307 }
 0x787   : > { %v3339_v49 = vadd.f32 %v3308_v47, %v3291_v32  ;;  %v3342_v57 = vadd.f32 %v3314_v61, %v3294_v54  ;;  %v3298_v61 = vmul.f32 %v6557_v18, %v8719_v53  ;;  %v3365_v54 = vmul.f32 %v6513_v13, %v8687_v41  ;;  %v9181_v13 = vld [vmem:[#allocation79_spill] sm:$0xff] }
 0x789   : > { %5795 = vrcp.f32 %v3339_v49 }
 0x78a   : > { %v3310_v31 = vpop.xlane.xlu1 %3309  ;;  %5797 = vrcp.f32 %v3342_v57 }
 0x78b   : > { %v3340_v51 = vadd.f32 %v3310_v31, %v3292_v0 }
 0x78d   : > { %5799 = vrcp.f32 %v3340_v51 }
 0x78e   : > { %5801 = vpow2.f32 %v3229_v22 }
 0x78f   : > { %v3320_v43 = vpop.xlane.xlu0 %3319  ;;  %5803 = vpow2.f32 %v3235_v58  ;;  %v5794_v47 = vpop.eup %5793  ;;  %v3364_v58 = vmul.f32 %v9183_v24, %v8695_v45 }
 0x790   : > { %5805 = vpow2.f32 %v3237_v55  ;;  %v8731_v6 = vadd.f32 %v3320_v43, %v3297_v2  ;;  %v3518_v26 = vmul.f32 %v5794_v47, %v3341_v50 }
 0x791   : > { %v3322_v12 = vpop.xlane.xlu1 %3321  ;;  %5807 = vpow2.f32 %v3239_v36 }
 0x792   : > { %5809 = vpow2.f32 %v3241_v10  ;;  %v8741_v3 = vadd.f32 %v3322_v12, %v3298_v61  ;;  %v3534_v0 = vsub.f32 2.0, %v3518_v26 }
 0x793   : > { %v3316_v5 = vpop.xlane.xlu0 %3315  ;;  %v5796_v59 = vpop.eup %5795  ;;  %5811 = vrcp.f32 %v8731_v6 }
 0x794   : > { %v8737_v8 = vadd.f32 %v3316_v5, %v3295_v4  ;;  %v5798_v31 = vpop.eup %5797  ;;  %v3516_v48 = vmul.f32 %v5796_v59, %v3339_v49  ;;  %v3550_v4 = vmul.f32 %v5794_v47, %v3534_v0 }
 0x795   : > { %v3318_v30 = vpop.xlane.xlu1 %3317  ;;  %v3519_v25 = vmul.f32 %v5798_v31, %v3342_v57 }
 0x796   : > { %v8743_v28 = vadd.f32 %v3318_v30, %v3296_v11  ;;  %5813 = vrcp.f32 %v8737_v8  ;;  %v3532_v5 = vsub.f32 2.0, %v3516_v48  ;;  %v9182_v30 = vld [vmem:[#allocation78_spill] sm:$0xff] }
 0x797   : > { %v3328_v62 = vpop.xlane.xlu0 %3327  ;;  %v5800_v18 = vpop.eup %5799  ;;  %5815 = vrcp.f32 %v8741_v3  ;;  %v3535_v57 = vsub.f32 2.0, %v3519_v25 }
 0x798   : > { %v8747_v16 = vpop.eup %5801  ;;  %5817 = vrcp.f32 %v8743_v28  ;;  %v3517_v12 = vmul.f32 %v5800_v18, %v3340_v51  ;;  %v8757_v46 = vadd.f32 %v3328_v62, %v3301_v27  ;;  %v3548_v11 = vmul.f32 %v5796_v59, %v3532_v5 }
 0x799   : > { %v8755_v39 = vpop.eup %5803  ;;  %v3300_v32 = vmul.f32 %v6549_v15, %v8747_v16  ;;  %v9180_v15 = vld [vmem:[#allocation74_spill] sm:$0xff]  ;;  %v3551_v26 = vmul.f32 %v5798_v31, %v3535_v57 }
 0x79a   : > { %v3330_v35 = vpop.xlane.xlu1 %3329  ;;  %v8761_v34 = vpop.eup %5805  ;;  %v3533_v23 = vsub.f32 2.0, %v3517_v12  ;;  %5819 = vrcp.f32 %v8757_v46  ;;  %v3366_v51 = vmul.f32 %v9180_v15, %v8693_v63  ;;  %v3303_v41 = vmul.f32 %v9181_v13, %v8755_v39  ;;  %v9185_v63 = vld [vmem:[#allocation76_spill] sm:$0xff] }
 0x79b   : > { %v3324_v44 = vpop.xlane.xlu0 %3323  ;;  %v8767_v50 = vpop.eup %5807  ;;  %v8769_v20 = vadd.f32 %v3330_v35, %v3302_v21  ;;  %v3304_v22 = vmul.f32 %v9182_v30, %v8761_v34  ;;  %v9187_v30 = vld [vmem:[#allocation73_spill] sm:$0xff] }
 0x79c   : > { %v8763_v14 = vadd.f32 %v3324_v44, %v3299_v17  ;;  %v8773_v49 = vpop.eup %5809  ;;  %v3305_v55 = vmul.f32 %v9184_v52, %v8767_v50  ;;  %v3549_v48 = vmul.f32 %v5800_v18, %v3533_v23 }
 0x79d   : > { %v5812_v37 = vpop.eup %5811  ;;  %v3306_v62 = vmul.f32 %v9185_v63, %v8773_v49  ;;  %v9188_v63 = vld [vmem:[#allocation70_spill] sm:$0xff] }
 0x79e   : > { %v3326_v40 = vpop.xlane.xlu1 %3325  ;;  %5821 = vrcp.f32 %v8763_v14  ;;  %v3522_v25 = vmul.f32 %v5812_v37, %v8731_v6 }
 0x79f   : > { %v3332_v43 = vpop.xlane.xlu0 %3331  ;;  %v8775_v19 = vadd.f32 %v3326_v40, %v3300_v32  ;;  %5823 = vrcp.f32 %v8769_v20 }
 0x7a0   : > { %v5814_v10 = vpop.eup %5813  ;;  %v8798_v12 = vadd.f32 %v3332_v43, %v3303_v41 }
 0x7a1   : > { %5825 = vrcp.f32 %v8775_v19  ;;  %v5816_v45 = vpop.eup %5815  ;;  %v3520_v59 = vmul.f32 %v5814_v10, %v8737_v8  ;;  %v3538_v8 = vsub.f32 2.0, %v3522_v25 }
 0x7a2   : > { %v3334_v33 = vpop.xlane.xlu1 %3333  ;;  %v5818_v17 = vpop.eup %5817  ;;  %v3523_v31 = vmul.f32 %v5816_v45, %v8741_v3 }
 0x7a3   : > { %v3336_v29 = vpop.xlane.xlu0 %3335  ;;  %v8804_v18 = vadd.f32 %v3334_v33, %v3304_v22  ;;  %v3521_v43 = vmul.f32 %v5818_v17, %v8743_v28  ;;  %v3536_v23 = vsub.f32 2.0, %v3520_v59  ;;  %v9186_v28 = vld [vmem:[#allocation71_spill] sm:$0xff]  ;;  %v3367_v22 = vmul.f32 %v9187_v30, %v8717_v60 }
 0x7a4   : > { %v8795_v44 = vadd.f32 %v3336_v29, %v3305_v55  ;;  %v5820_v57 = vpop.eup %5819  ;;  %v3539_v33 = vsub.f32 2.0, %v3523_v31  ;;  %v3369_v15 = vmul.f32 %v9186_v28, %v8715_v7  ;;  %v3554_v52 = vmul.f32 %v5812_v37, %v3538_v8 }
 0x7a5   : > { %v3537_v13 = vsub.f32 2.0, %v3521_v43  ;;  %v3526_v24 = vmul.f32 %v5820_v57, %v8757_v46  ;;  %v3552_v7 = vmul.f32 %v5814_v10, %v3536_v23  ;;  %v9192_v23 = vld [vmem:[#allocation66_spill] sm:$0xff] }
 0x7a6   : > { %v3338_v35 = vpop.xlane.xlu1 %3337  ;;  %5827 = vrcp.f32 %v8795_v44  ;;  %v3555_v37 = vmul.f32 %v5816_v45, %v3539_v33  ;;  %v9190_v45 = vld [vmem:[#allocation67_spill] sm:$0xff]  ;;  %v3374_v33 = vmul.f32 %v9192_v23, %v8735_v38 }
 0x7a7   : > { %5829 = vrcp.f32 %v8798_v12 }
 0x7a8   : > { %v5822_v3 = vpop.eup %5821 }
 0x7d0   : > { %v4459_v36 = vpop.f32.mrb[0].mxu1 }
 0x7d1   : > { %v3486_v2 = vadd.f32 %v4459_v36, %v3365_v54  ;;  %v3421_v61 = vpop.f32.mrb[1].mxu1  ;;  %v8801_v54 = vadd.f32 %v3338_v35, %v3306_v62  ;;  %v3370_v62 = vmul.f32 %v9188_v63, %v8719_v53  ;;  %v3524_v36 = vmul.f32 %v5822_v3, %v8763_v14 }
 0x7d2   : > { %v3484_v40 = vadd.f32 %v3421_v61, %v3363_v42  ;;  %v4460_v27 = vpop.f32.mrb[2].mxu1  ;;  %v3553_v14 = vmul.f32 %v5818_v17, %v3537_v13 }
 0x7d3   : > { %v3566_v21 = vmul.f32 %v3550_v4, %v3486_v2  ;;  %v3487_v32 = vadd.f32 %v4460_v27, %v3366_v51  ;;  %v3424_v47 = vpop.f32.mrb[3].mxu1  ;;  %5831 = vrcp.f32 %v8801_v54  ;;  %v5824_v51 = vpop.eup %5823  ;;  %v9189_v4 = vld [vmem:[#allocation72_spill] sm:$0xff] }
 0x7d4   : > { %v3564_v0 = vmul.f32 %v3548_v11, %v3484_v40  ;;  %v3485_v5 = vadd.f32 %v3424_v47, %v3364_v58  ;;  %5833 = vrcp.f32 %v8804_v18  ;;  %v5826_v29 = vpop.eup %5825  ;;  %v3368_v61 = vmul.f32 %v9189_v4, %v8721_v9 }
 0x7d5   : > { %3583 = vst.msk [vmem:[%s6708_s26 + $0x10] sm:$0xff] %vm3580_vm0, %v3566_v21  ;;  %v3567_v6 = vmul.f32 %v3551_v26, %v3487_v32  ;;  %v3527_v60 = vmul.f32 %v5824_v51, %v8769_v20  ;;  %v3525_v27 = vmul.f32 %v5826_v29, %v8775_v19  ;;  %v5828_v25 = vpop.eup %5827  ;;  %v3540_v21 = vsub.f32 2.0, %v3524_v36 }
 0x7d6   : > { %3581 = vst.msk [vmem:[%s6708_s26] sm:$0xff] %vm3580_vm0, %v3564_v0  ;;  %v3565_v42 = vmul.f32 %v3549_v48, %v3485_v5  ;;  %v3542_v48 = vsub.f32 2.0, %v3526_v24  ;;  %v5830_v20 = vpop.eup %5829  ;;  %v3373_v19 = vmul.f32 %v9190_v45, %v8729_v56  ;;  %v9191_v0 = vld [vmem:[#allocation69_spill] sm:$0xff] }
 0x7d7   : > { %3584 = vst.msk [vmem:[%s6708_s26 + $0x18] sm:$0xff] %vm3580_vm0, %v3567_v6  ;;  %v3543_v32 = vsub.f32 2.0, %v3527_v60  ;;  %v3541_v59 = vsub.f32 2.0, %v3525_v27  ;;  %v3371_v5 = vmul.f32 %v9191_v0, %v8725_v1  ;;  %v3530_v6 = vmul.f32 %v5828_v25, %v8795_v44 }
 0x7d8   : > { %3582 = vst.msk [vmem:[%s6708_s26 + $0x8] sm:$0xff] %vm3580_vm0, %v3565_v42  ;;  %v3558_v42 = vmul.f32 %v5820_v57, %v3542_v48  ;;  %v3528_v56 = vmul.f32 %v5830_v20, %v8798_v12 }
 0x7d9   : > { %v4463_v41 = vpop.f32.mrb[4].mxu1  ;;  %v3559_v57 = vmul.f32 %v5824_v51, %v3543_v32  ;;  %v3557_v12 = vmul.f32 %v5826_v29, %v3541_v59  ;;  %v9194_v51 = vld [vmem:[#allocation63_spill] sm:$0xff]  ;;  %v9195_v29 = vld [vmem:[#allocation65_spill] sm:$0xff] }
 0x7da   : > { %v3490_v58 = vadd.f32 %v4463_v41, %v3369_v15  ;;  %v3437_v55 = vpop.f32.mrb[5].mxu1  ;;  %v3556_v15 = vmul.f32 %v5822_v3, %v3540_v21  ;;  %v9193_v41 = vld [vmem:[#allocation68_spill] sm:$0xff]  ;;  %v3544_v63 = vsub.f32 2.0, %v3528_v56 }
 0x7db   : > { %v3488_v35 = vadd.f32 %v3437_v55, %v3367_v22  ;;  %v4464_v2 = vpop.f32.mrb[6].mxu1  ;;  %v3372_v30 = vmul.f32 %v9193_v41, %v8747_v16  ;;  %v3546_v55 = vsub.f32 2.0, %v3530_v6 }
 0x7dc   : > { %v3570_v11 = vmul.f32 %v3554_v52, %v3490_v58  ;;  %v3491_v46 = vadd.f32 %v4464_v2, %v3370_v62  ;;  %v3440_v40 = vpop.f32.mrb[7].mxu1  ;;  %v3377_v62 = vmul.f32 %v9194_v51, %v8767_v50 }
 0x7dd   : > { %v3568_v53 = vmul.f32 %v3552_v7, %v3488_v35  ;;  %v3489_v26 = vadd.f32 %v3440_v40, %v3368_v61  ;;  %v5832_v47 = vpop.eup %5831  ;;  %v3375_v35 = vmul.f32 %v9195_v29, %v8755_v39  ;;  %v3562_v2 = vmul.f32 %v5828_v25, %v3546_v55  ;;  %v9196_v61 = vld [vmem:[#allocation62_spill] sm:$0xff] }
 0x7de   : > { %3587 = vst.msk [vmem:[%s6708_s26 + $0x30] sm:$0xff] %vm3580_vm0, %v3570_v11  ;;  %v3571_v10 = vmul.f32 %v3555_v37, %v3491_v46  ;;  %v5834_v31 = vpop.eup %5833  ;;  %v3531_v1 = vmul.f32 %v5832_v47, %v8801_v54  ;;  %v3378_v60 = vmul.f32 %v9196_v61, %v8773_v49  ;;  %v3560_v46 = vmul.f32 %v5830_v20, %v3544_v63  ;;  %v9197_v37 = vld [vmem:[#allocation64_spill] sm:$0xff] }
 0x7df   : > { %3585 = vst.msk [vmem:[%s6708_s26 + $0x20] sm:$0xff] %vm3580_vm0, %v3568_v53  ;;  %v3569_v9 = vmul.f32 %v3553_v14, %v3489_v26  ;;  %v3529_v38 = vmul.f32 %v5834_v31, %v8804_v18  ;;  %v3376_v40 = vmul.f32 %v9197_v37, %v8761_v34 }
 0x7e0   : > { %3588 = vst.msk [vmem:[%s6708_s26 + $0x38] sm:$0xff] %vm3580_vm0, %v3571_v10  ;;  %v3547_v54 = vsub.f32 2.0, %v3531_v1 }
 0x7e1   : > { %3586 = vst.msk [vmem:[%s6708_s26 + $0x28] sm:$0xff] %vm3580_vm0, %v3569_v9  ;;  %v3545_v36 = vsub.f32 2.0, %v3529_v38 }
 0x7e2   : > { %v4467_v17 = vpop.f32.mrb[8].mxu1  ;;  %v3563_v26 = vmul.f32 %v5832_v47, %v3547_v54 }
 0x7e3   : > { %v3494_v43 = vadd.f32 %v4467_v17, %v3373_v19  ;;  %v3453_v8 = vpop.f32.mrb[9].mxu1  ;;  %v3561_v10 = vmul.f32 %v5834_v31, %v3545_v36 }
 0x7e4   : > { %v3492_v28 = vadd.f32 %v3453_v8, %v3371_v5  ;;  %v4468_v13 = vpop.f32.mrb[10].mxu1 }
 0x7e5   : > { %v3574_v44 = vmul.f32 %v3558_v42, %v3494_v43  ;;  %v3495_v22 = vadd.f32 %v4468_v13, %v3374_v33  ;;  %v3456_v24 = vpop.f32.mrb[11].mxu1 }
 0x7e6   : > { %v3572_v58 = vmul.f32 %v3556_v15, %v3492_v28  ;;  %v3493_v52 = vadd.f32 %v3456_v24, %v3372_v30 }
 0x7e7   : > { %3591 = vst.msk [vmem:[%s6708_s26 + $0x50] sm:$0xff] %vm3580_vm0, %v3574_v44  ;;  %v3575_v3 = vmul.f32 %v3559_v57, %v3495_v22 }
 0x7e8   : > { %3589 = vst.msk [vmem:[%s6708_s26 + $0x40] sm:$0xff] %vm3580_vm0, %v3572_v58  ;;  %v3573_v16 = vmul.f32 %v3557_v12, %v3493_v52 }
 0x7e9   : > { %3592 = vst.msk [vmem:[%s6708_s26 + $0x58] sm:$0xff] %vm3580_vm0, %v3575_v3 }
 0x7ea   : > { %3590 = vst.msk [vmem:[%s6708_s26 + $0x48] sm:$0xff] %vm3580_vm0, %v3573_v16  ;;  %v4471_v18 = vpop.f32.mrb[12].mxu1 }
 0x7eb   : > { %v3498_v7 = vadd.f32 %v4471_v18, %v3377_v62  ;;  %v3469_v4 = vpop.f32.mrb[13].mxu1 }
 0x7ec   : > { %v3496_v11 = vadd.f32 %v3469_v4, %v3375_v35  ;;  %v4472_v50 = vpop.f32.mrb[14].mxu1 }
 0x7ed   : > { %v3578_v27 = vmul.f32 %v3562_v2, %v3498_v7  ;;  %v3499_v53 = vadd.f32 %v4472_v50, %v3378_v60  ;;  %v3472_v39 = vpop.f32.mrb[15].mxu1 }
 0x7ee   : > { %v3576_v14 = vmul.f32 %v3560_v46, %v3496_v11  ;;  %v3497_v48 = vadd.f32 %v3472_v39, %v3376_v40 }
 0x7ef   : > { %3595 = vst.msk [vmem:[%s6708_s26 + $0x70] sm:$0xff] %vm3580_vm0, %v3578_v27  ;;  %v3579_v25 = vmul.f32 %v3563_v26, %v3499_v53 }
 0x7f0   : > { %3593 = vst.msk [vmem:[%s6708_s26 + $0x60] sm:$0xff] %vm3580_vm0, %v3576_v14  ;;  %v3577_v49 = vmul.f32 %v3561_v10, %v3497_v48 }
 0x7f1   : > { %3596 = vst.msk [vmem:[%s6708_s26 + $0x78] sm:$0xff] %vm3580_vm0, %v3579_v25 }
 0x7f2   : > { %3594 = vst.msk [vmem:[%s6708_s26 + $0x68] sm:$0xff] %vm3580_vm0, %v3577_v49 }
 0x7f3 PF: > { %s12_s13 = sadd.s32 1, %s6261_s13   ;;  %s9198_s9 = smov %s6253_s11 }
 0x7f4   : > { %p9_p10 = scmp.ge.s32.totalorder %s12_s13, 6   ;;  %s9199_s10 = smov %s6257_s12 }
 0x7f5   : > { %s9200_s11 = smov %s9203_s14  ;;  %s9201_s12 = smov %s9207_s15 }
 0x7f6   :  { %11 = sbr.rel (!%p9_p10) target bundleno = 3 (0x3), region = 85 }

</bundles_post_ra>
